<compile_context>
chip_gen: v5e
topology: v5e:2x2
jax: 0.10.0
libtpu: 0.0.40
codegen_flags: <defaults>
</compile_context>

<pallas_src>
import functools

import jax
import jax.numpy as jnp
from jax.experimental import pallas as pl
from jax.experimental.pallas import tpu as pltpu

# ---------------- small configuration consistent with the module -------------
IMG_DIM      = 16
PATCH_DIM    = 4
NUM_CHANNELS = 2
EMBED_DIM    = 32
NUM_HEADS    = 4
NUM_LAYERS   = 2
HIDDEN_DIM   = 64
BATCH        = 2

NUM_PATCHES  = (IMG_DIM // PATCH_DIM) ** 2            # S (sequence length) = 16
FLATTEN_DIM  = PATCH_DIM * PATCH_DIM * NUM_CHANNELS   # F = 32
HEAD_DIM     = EMBED_DIM // NUM_HEADS                 # 8
SCALE        = HEAD_DIM ** -0.5
LN_EPS       = 1e-5
INTMD_WIDTH  = 2 * NUM_LAYERS * EMBED_DIM             # 128 -> lane-dense intmd slab


# ---------------- shared math helpers (kernel AND reference) -----------------
def _layer_norm(x, gamma, beta):
    mu = jnp.mean(x, axis=-1, keepdims=True)
    var = jnp.mean((x - mu) ** 2, axis=-1, keepdims=True)
    return (x - mu) * jax.lax.rsqrt(var + LN_EPS) * gamma + beta


def _softmax(x):
    m = jnp.max(x, axis=-1, keepdims=True)
    e = jnp.exp(x - m)
    return e / jnp.sum(e, axis=-1, keepdims=True)


def _gelu(x):
    # TODO(synk): torch nn.GELU defaults to exact erf; tanh approximation used here.
    return 0.5 * x * (1.0 + jnp.tanh(0.7978845608028654 * (x + 0.044715 * x * x * x)))


# ---------------- Pallas kernel ----------------------------------------------
def _encoder_kernel(patches_ref, wenc_ref, benc_ref, pos_ref,
                    ln1g_ref, ln1b_ref, wslab_ref, bo_ref,
                    ln2g_ref, ln2b_ref, w1_ref, b1_ref, w2_ref, b2_ref,
                    lnfg_ref, lnfb_ref,
                    out_ref, intmd_ref, *, nb):
    S, E, NH, HD, L = NUM_PATCHES, EMBED_DIM, NUM_HEADS, HEAD_DIM, NUM_LAYERS
    R = nb * S                      # rows handled by this program (batch in sublanes)

    # linear_encoding over all rows at once: (R, F) @ (F, E) + b
    p = patches_ref[...].reshape(R, FLATTEN_DIM)
    x = jnp.dot(p, wenc_ref[...], preferred_element_type=jnp.float32) + benc_ref[...]
    # learned positional encoding (+ pe_dropout: identity in eval)
    x = (x.reshape(nb, S, E) + pos_ref[...][None]).reshape(R, E)

    for l in range(L):
        # Lane-dense per-layer weight slab: [Wq*scale | Wk | Wv | Wo] -> (E, 4E=128)
        w_all = wslab_ref[l]

        # --- Residual( PreNormDrop( LayerNorm, SelfAttention ) ) --------------
        h = _layer_norm(x, ln1g_ref[l], ln1b_ref[l])                        # (R, E)
        # ONE fused full-width QKV matmul (softmax scale pre-folded into Wq).
        qkv = jnp.dot(h, w_all[:, :3 * E],
                      preferred_element_type=jnp.float32)                   # (R, 3E)
        qkv = qkv.reshape(nb, S, 3 * E)

        # Head split: static 8-lane slices stacked along a leading group axis
        # (g = head * nb + batch).  Cheap VPU/XLU lane moves, no MXU pushes.
        def grp(base):
            return jnp.concatenate(
                [qkv[:, :, base + hh * HD: base + (hh + 1) * HD]
                 for hh in range(NH)], axis=0)                              # (G, S, HD)

        qg, kg, vg = grp(0), grp(E), grp(2 * E)

        scores = jnp.einsum('gqd,gkd->gqk', qg, kg,
                            preferred_element_type=jnp.float32)             # (G, S, S)
        m = jnp.max(scores, axis=-1, keepdims=True)
        e = jnp.exp(scores - m)
        d = jnp.sum(e, axis=-1, keepdims=True)
        r = pl.reciprocal(d, approx=True)          # EUP reciprocal
        r = r * (2.0 - d * r)                      # one Newton-Raphson step
        attn = e * r                               # attn dropout: identity in eval
        ao = jnp.einsum('gqk,gkd->gqd', attn, vg,
                        preferred_element_type=jnp.float32)                 # (G, S, HD)

        # Head merge via lane placement, then ONE (R,E)@(E,E) output projection.
        ao = ao.reshape(NH, nb, S, HD)
        merged = jnp.concatenate([ao[hh] for hh in range(NH)], axis=-1)     # (nb, S, E)
        attn_out = jnp.dot(merged.reshape(R, E), w_all[:, 3 * E:],
                           preferred_element_type=jnp.float32) + bo_ref[l]
        x = x + attn_out
        # Place this intermediate directly in its 32-lane slot of the output block.
        intmd_ref[:, :, (2 * l) * E:(2 * l + 1) * E] = x.reshape(nb, S, E)

        # --- Residual( PreNorm( LayerNorm, FeedForward ) ) ---------------------
        h = _layer_norm(x, ln2g_ref[l], ln2b_ref[l])
        h = jnp.dot(h, w1_ref[l], preferred_element_type=jnp.float32) + b1_ref[l]
        h = _gelu(h)
        h = jnp.dot(h, w2_ref[l], preferred_element_type=jnp.float32) + b2_ref[l]
        x = x + h
        intmd_ref[:, :, (2 * l + 1) * E:(2 * l + 2) * E] = x.reshape(nb, S, E)

    # pre_head_ln
    out_ref[...] = _layer_norm(x, lnfg_ref[...], lnfb_ref[...]).reshape(nb, S, E)


# ---------------- wrapper ------------------------------------------------------
def _extract_patches(x_nchw):
    """torch: x.unfold(2,p,p).unfold(3,p,p).view(n,c,-1,p*p).permute(0,2,3,1).view(n,-1,F)"""
    n, c, h, w = x_nchw.shape
    p = PATCH_DIM
    t = x_nchw.reshape(n, c, h // p, p, w // p, p)
    t = t.transpose(0, 2, 4, 3, 5, 1)                 # (n, h/p, w/p, p, p, c)
    return t.reshape(n, NUM_PATCHES, FLATTEN_DIM).astype(jnp.float32)


def _num_tensorcores_per_chip():
    """v7x has 2 TensorCores per chip; v5e/v6e have 1.  Detection failures fall
    back to 1 (the collapsed-grid path, which is correct on every chip)."""
    try:
        kind = jax.devices()[0].device_kind.lower()
    except Exception:
        return 1
    return 2 if ("v7" in kind or "7x" in kind) else 1


def _choose_nb(n):
    """Batch elements per program.  Collapse the grid (nb == n) unless the chip
    has 2 TensorCores AND splitting still leaves >= 64 rows per program."""
    min_nb = max(1, -(-64 // NUM_PATCHES))             # ceil(64 / S)
    if _num_tensorcores_per_chip() > 1 and n % 2 == 0 and (n // 2) >= min_nb:
        return n // 2
    return n


def _pallas_encode(patches, params, nb):
    n = patches.shape[0]
    S, F, E, H, L = NUM_PATCHES, FLATTEN_DIM, EMBED_DIM, HIDDEN_DIM, NUM_LAYERS
    grid = (n // nb,)

    # Lane-dense fused per-layer weight slab, built once (under jit):
    #   [Wq * scale | Wk | Wv | Wo]  ->  (L, E, 4E = 128)
    wslab = jnp.concatenate([params["w_q"] * SCALE, params["w_k"],
                             params["w_v"], params["w_o"]], axis=-1)

    def full(shape):
        return pl.BlockSpec(shape, lambda b: (0,) * len(shape))

    in_specs = [
        pl.BlockSpec((nb, S, F), lambda b: (b, 0, 0)),   # patches
        full((F, E)), full((1, E)), full((S, E)),        # w_enc, b_enc, pos
        full((L, 1, E)), full((L, 1, E)),                # ln1 gamma / beta
        full((L, E, 4 * E)),                             # fused [Wq|Wk|Wv|Wo] slab
        full((L, 1, E)),                                 # b_o
        full((L, 1, E)), full((L, 1, E)),                # ln2 gamma / beta
        full((L, E, H)), full((L, 1, H)),                # ffn w1 / b1
        full((L, H, E)), full((L, 1, E)),                # ffn w2 / b2
        full((1, E)), full((1, E)),                      # pre_head_ln gamma / beta
    ]
    out_specs = [
        pl.BlockSpec((nb, S, E), lambda b: (b, 0, 0)),
        pl.BlockSpec((nb, S, INTMD_WIDTH), lambda b: (b, 0, 0)),
    ]
    out_shape = [
        jax.ShapeDtypeStruct((n, S, E), jnp.float32),
        jax.ShapeDtypeStruct((n, S, INTMD_WIDTH), jnp.float32),
    ]

    return pl.pallas_call(
        functools.partial(_encoder_kernel, nb=nb),
        grid=grid,
        in_specs=in_specs,
        out_specs=out_specs,
        out_shape=out_shape,
        compiler_params=pltpu.CompilerParams(dimension_semantics=("parallel",)),
    )(patches,
      params["w_enc"], params["b_enc"], params["pos"],
      params["ln1_g"], params["ln1_b"], wslab, params["b_o"],
      params["ln2_g"], params["ln2_b"],
      params["w1"], params["b1"], params["w2"], params["b2"],
      params["lnf_g"], params["lnf_b"])


@functools.partial(jax.jit, static_argnames=("nb",))
def _encode_jit(x_nchw, params, nb):
    patches = _extract_patches(x_nchw)
    out, intmd = _pallas_encode(patches, params, nb)
    E = EMBED_DIM
    # torch IntermediateSequential returns a dict keyed by sub-layer index.
    intmd_dict = {str(i): intmd[:, :, i * E:(i + 1) * E]
                  for i in range(2 * NUM_LAYERS)}
    return out, intmd_dict


def transfusion_encode(x_nchw, params):
    return _encode_jit(x_nchw, params, nb=_choose_nb(x_nchw.shape[0]))


# ---------------- pure-JAX reference (for correctness check) ------------------
def reference_encode(x_nchw, params):
    n = x_nchw.shape[0]
    S, E = NUM_PATCHES, EMBED_DIM
    x = _extract_patches(x_nchw) @ params["w_enc"] + params["b_enc"]
    x = x + params["pos"]
    intmd = {}
    for l in range(NUM_LAYERS):
        h = _layer_norm(x, params["ln1_g"][l], params["ln1_b"][l])
        q = h @ params["w_q"][l]
        k = h @ params["w_k"][l]
        v = h @ params["w_v"][l]

        def heads(t):
            return t.reshape(n, S, NUM_HEADS, HEAD_DIM).transpose(0, 2, 1, 3)
        qh, kh, vh = heads(q), heads(k), heads(v)
        scores = jnp.einsum('bhqd,bhkd->bhqk', qh, kh) * SCALE
        attn = _softmax(scores)
        ao = jnp.einsum('bhqk,bhkd->bhqd', attn, vh)
        ao = ao.transpose(0, 2, 1, 3).reshape(n, S, E)
        ao = ao @ params["w_o"][l] + params["b_o"][l]
        x = x + ao
        intmd[str(2 * l)] = x

        h = _layer_norm(x, params["ln2_g"][l], params["ln2_b"][l])
        h = _gelu(h @ params["w1"][l] + params["b1"][l])
        h = h @ params["w2"][l] + params["b2"][l]
        x = x + h
        intmd[str(2 * l + 1)] = x
    x = _layer_norm(x, params["lnf_g"], params["lnf_b"])
    return x, intmd


# ---------------- deterministic parameter init --------------------------------
def init_params(key):
    E, F, H, L, S = EMBED_DIM, FLATTEN_DIM, HIDDEN_DIM, NUM_LAYERS, NUM_PATCHES
    ks = jax.random.split(key, 18)

    def rnd(k, shape, scale=0.02):
        return (scale * jax.random.normal(k, shape)).astype(jnp.float32)

    return {
        "w_enc": rnd(ks[0], (F, E)),
        "b_enc": rnd(ks[1], (1, E)),
        "pos":   rnd(ks[2], (S, E)),
        "ln1_g": jnp.ones((L, 1, E), jnp.float32) + rnd(ks[3], (L, 1, E), 0.05),
        "ln1_b": rnd(ks[4], (L, 1, E), 0.05),
        "w_q":   rnd(ks[5], (L, E, E)),
        "w_k":   rnd(ks[6], (L, E, E)),
        "w_v":   rnd(ks[7], (L, E, E)),
        "w_o":   rnd(ks[8], (L, E, E)),
        "b_o":   rnd(ks[9], (L, 1, E)),
        "ln2_g": jnp.ones((L, 1, E), jnp.float32) + rnd(ks[10], (L, 1, E), 0.05),
        "ln2_b": rnd(ks[11], (L, 1, E), 0.05),
        "w1":    rnd(ks[12], (L, E, H)),
        "b1":    rnd(ks[13], (L, 1, H)),
        "w2":    rnd(ks[14], (L, H, E)),
        "b2":    rnd(ks[15], (L, 1, E)),
        "lnf_g": jnp.ones((1, E), jnp.float32) + rnd(ks[16], (1, E), 0.05),
        "lnf_b": rnd(ks[17], (1, E), 0.05),
    }


if __name__ == "__main__":
    key = jax.random.PRNGKey(0)
    kx, kp = jax.random.split(key)
    x = jax.random.normal(kx, (BATCH, NUM_CHANNELS, IMG_DIM, IMG_DIM), jnp.float32)
    params = init_params(kp)

    out, intmd = transfusion_encode(x, params)
    out = jax.block_until_ready(out)

    ref_out, ref_intmd = reference_encode(x, params)
    assert out.shape == (BATCH, NUM_PATCHES, EMBED_DIM)
    assert jnp.allclose(out, ref_out, rtol=1e-4, atol=1e-4)
    for kname in ref_intmd:
        assert jnp.allclose(intmd[kname], ref_intmd[kname], rtol=1e-4, atol=1e-4)

    print("KERNEL_OK")
</pallas_src>

<mosaic_0001>
module attributes {stable_mosaic.version = 11 : i64} {
  func.func @_encoder_kernel(%arg0: i32, %arg1: memref<2x16x32xf32, #tpu.memory_space<vmem>>, %arg2: memref<32x32xf32, #tpu.memory_space<vmem>>, %arg3: memref<1x32xf32, #tpu.memory_space<vmem>>, %arg4: memref<16x32xf32, #tpu.memory_space<vmem>>, %arg5: memref<2x1x32xf32, #tpu.memory_space<vmem>>, %arg6: memref<2x1x32xf32, #tpu.memory_space<vmem>>, %arg7: memref<2x32x128xf32, #tpu.memory_space<vmem>>, %arg8: memref<2x1x32xf32, #tpu.memory_space<vmem>>, %arg9: memref<2x1x32xf32, #tpu.memory_space<vmem>>, %arg10: memref<2x1x32xf32, #tpu.memory_space<vmem>>, %arg11: memref<2x32x64xf32, #tpu.memory_space<vmem>>, %arg12: memref<2x1x64xf32, #tpu.memory_space<vmem>>, %arg13: memref<2x64x32xf32, #tpu.memory_space<vmem>>, %arg14: memref<2x1x32xf32, #tpu.memory_space<vmem>>, %arg15: memref<1x32xf32, #tpu.memory_space<vmem>>, %arg16: memref<1x32xf32, #tpu.memory_space<vmem>>, %arg17: memref<2x16x32xf32, #tpu.memory_space<vmem>>, %arg18: memref<2x16x128xf32, #tpu.memory_space<vmem>>) attributes {dimension_semantics = [#tpu.dimension_semantics<parallel>], iteration_bounds = array<i64: 1>, scalar_prefetch = 0 : i64, scratch_operands = 0 : i64, tpu.core_type = #tpu.core_type<tc>, window_params = [{transform_indices = @transform_0, window_bounds = array<i64: 2, 16, 32>}, {pipeline_mode = #tpu.pipeline_mode<synchronous>, transform_indices = @transform_1, window_bounds = array<i64: 32, 32>}, {pipeline_mode = #tpu.pipeline_mode<synchronous>, transform_indices = @transform_2, window_bounds = array<i64: 1, 32>}, {pipeline_mode = #tpu.pipeline_mode<synchronous>, transform_indices = @transform_3, window_bounds = array<i64: 16, 32>}, {pipeline_mode = #tpu.pipeline_mode<synchronous>, transform_indices = @transform_4, window_bounds = array<i64: 2, 1, 32>}, {pipeline_mode = #tpu.pipeline_mode<synchronous>, transform_indices = @transform_5, window_bounds = array<i64: 2, 1, 32>}, {pipeline_mode = #tpu.pipeline_mode<synchronous>, transform_indices = @transform_6, window_bounds = array<i64: 2, 32, 128>}, {pipeline_mode = #tpu.pipeline_mode<synchronous>, transform_indices = @transform_7, window_bounds = array<i64: 2, 1, 32>}, {pipeline_mode = #tpu.pipeline_mode<synchronous>, transform_indices = @transform_8, window_bounds = array<i64: 2, 1, 32>}, {pipeline_mode = #tpu.pipeline_mode<synchronous>, transform_indices = @transform_9, window_bounds = array<i64: 2, 1, 32>}, {pipeline_mode = #tpu.pipeline_mode<synchronous>, transform_indices = @transform_10, window_bounds = array<i64: 2, 32, 64>}, {pipeline_mode = #tpu.pipeline_mode<synchronous>, transform_indices = @transform_11, window_bounds = array<i64: 2, 1, 64>}, {pipeline_mode = #tpu.pipeline_mode<synchronous>, transform_indices = @transform_12, window_bounds = array<i64: 2, 64, 32>}, {pipeline_mode = #tpu.pipeline_mode<synchronous>, transform_indices = @transform_13, window_bounds = array<i64: 2, 1, 32>}, {pipeline_mode = #tpu.pipeline_mode<synchronous>, transform_indices = @transform_14, window_bounds = array<i64: 1, 32>}, {pipeline_mode = #tpu.pipeline_mode<synchronous>, transform_indices = @transform_15, window_bounds = array<i64: 1, 32>}, {transform_indices = @transform_16, window_bounds = array<i64: 2, 16, 32>}, {transform_indices = @transform_17, window_bounds = array<i64: 2, 16, 128>}]} {
    %c0 = arith.constant 0 : index
    %c0_0 = arith.constant 0 : index
    %c0_1 = arith.constant 0 : index
    %0 = vector.load %arg1[%c0, %c0_0, %c0_1] : memref<2x16x32xf32, #tpu.memory_space<vmem>>, vector<2x16x32xf32>
    %1 = vector.shape_cast %0 : vector<2x16x32xf32> to vector<32x32xf32>
    %c0_2 = arith.constant 0 : index
    %c0_3 = arith.constant 0 : index
    %2 = vector.load %arg2[%c0_2, %c0_3] : memref<32x32xf32, #tpu.memory_space<vmem>>, vector<32x32xf32>
    %cst = arith.constant dense<0.000000e+00> : vector<32x32xf32>
    %3 = tpu.matmul %1, %2, %cst {dimension_numbers = #tpu.dot_dimension_numbers<[1], [0], [0], [1], [0, 0, 1, 1], [], []>} : vector<32x32xf32>, vector<32x32xf32>, vector<32x32xf32> -> vector<32x32xf32>
    %c0_4 = arith.constant 0 : index
    %c0_5 = arith.constant 0 : index
    %4 = vector.load %arg3[%c0_4, %c0_5] : memref<1x32xf32, #tpu.memory_space<vmem>>, vector<1x32xf32>
    %5 = vector.broadcast %4 : vector<1x32xf32> to vector<32x32xf32>
    %6 = arith.addf %3, %5 : vector<32x32xf32>
    %7 = vector.shape_cast %6 : vector<32x32xf32> to vector<2x16x32xf32>
    %c0_6 = arith.constant 0 : index
    %c0_7 = arith.constant 0 : index
    %8 = vector.load %arg4[%c0_6, %c0_7] : memref<16x32xf32, #tpu.memory_space<vmem>>, vector<16x32xf32>
    %9 = vector.shape_cast %8 : vector<16x32xf32> to vector<1x16x32xf32>
    %10 = vector.broadcast %9 : vector<1x16x32xf32> to vector<2x16x32xf32>
    %11 = arith.addf %7, %10 : vector<2x16x32xf32>
    %12 = vector.shape_cast %11 : vector<2x16x32xf32> to vector<32x32xf32>
    %c0_8 = arith.constant 0 : index
    %c0_9 = arith.constant 0 : index
    %c0_10 = arith.constant 0 : index
    %13 = vector.load %arg7[%c0_8, %c0_9, %c0_10] : memref<2x32x128xf32, #tpu.memory_space<vmem>>, vector<1x32x128xf32>
    %14 = vector.shape_cast %13 : vector<1x32x128xf32> to vector<32x128xf32>
    %c0_11 = arith.constant 0 : index
    %c0_12 = arith.constant 0 : index
    %c0_13 = arith.constant 0 : index
    %15 = vector.load %arg5[%c0_11, %c0_12, %c0_13] : memref<2x1x32xf32, #tpu.memory_space<vmem>>, vector<1x1x32xf32>
    %16 = vector.shape_cast %15 : vector<1x1x32xf32> to vector<1x32xf32>
    %c0_14 = arith.constant 0 : index
    %c0_15 = arith.constant 0 : index
    %c0_16 = arith.constant 0 : index
    %17 = vector.load %arg6[%c0_14, %c0_15, %c0_16] : memref<2x1x32xf32, #tpu.memory_space<vmem>>, vector<1x1x32xf32>
    %18 = vector.shape_cast %17 : vector<1x1x32xf32> to vector<1x32xf32>
    %cst_17 = arith.constant dense<0.000000e+00> : vector<32xf32>
    %19 = vector.multi_reduction <add>, %12, %cst_17 [1] : vector<32x32xf32> to vector<32xf32>
    %20 = vector.shape_cast %19 : vector<32xf32> to vector<32x1xf32>
    %cst_18 = arith.constant 3.200000e+01 : f32
    %21 = vector.broadcast %cst_18 : f32 to vector<32x1xf32>
    %22 = arith.divf %20, %21 : vector<32x1xf32>
    %23 = vector.broadcast %22 : vector<32x1xf32> to vector<32x32xf32>
    %24 = arith.subf %12, %23 : vector<32x32xf32>
    %25 = arith.mulf %24, %24 : vector<32x32xf32>
    %cst_19 = arith.constant dense<0.000000e+00> : vector<32xf32>
    %26 = vector.multi_reduction <add>, %25, %cst_19 [1] : vector<32x32xf32> to vector<32xf32>
    %27 = vector.shape_cast %26 : vector<32xf32> to vector<32x1xf32>
    %cst_20 = arith.constant 3.200000e+01 : f32
    %28 = vector.broadcast %cst_20 : f32 to vector<32x1xf32>
    %29 = arith.divf %27, %28 : vector<32x1xf32>
    %30 = vector.broadcast %22 : vector<32x1xf32> to vector<32x32xf32>
    %31 = arith.subf %12, %30 : vector<32x32xf32>
    %cst_21 = arith.constant 9.99999974E-6 : f32
    %32 = vector.broadcast %cst_21 : f32 to vector<32x1xf32>
    %33 = arith.addf %29, %32 : vector<32x1xf32>
    %34 = math.rsqrt %33 : vector<32x1xf32>
    %35 = vector.broadcast %34 : vector<32x1xf32> to vector<32x32xf32>
    %36 = arith.mulf %31, %35 : vector<32x32xf32>
    %37 = vector.broadcast %16 : vector<1x32xf32> to vector<32x32xf32>
    %38 = arith.mulf %36, %37 : vector<32x32xf32>
    %39 = vector.broadcast %18 : vector<1x32xf32> to vector<32x32xf32>
    %40 = arith.addf %38, %39 : vector<32x32xf32>
    %41 = vector.extract_strided_slice %14 {offsets = [0, 0], sizes = [32, 96], strides = [1, 1]} : vector<32x128xf32> to vector<32x96xf32>
    %cst_22 = arith.constant dense<0.000000e+00> : vector<32x96xf32>
    %42 = tpu.matmul %40, %41, %cst_22 {dimension_numbers = #tpu.dot_dimension_numbers<[1], [0], [0], [1], [0, 0, 1, 1], [], []>} : vector<32x32xf32>, vector<32x96xf32>, vector<32x96xf32> -> vector<32x96xf32>
    %43 = vector.shape_cast %42 : vector<32x96xf32> to vector<2x16x96xf32>
    %44 = vector.extract_strided_slice %43 {offsets = [0, 0, 0], sizes = [2, 16, 8], strides = [1, 1, 1]} : vector<2x16x96xf32> to vector<2x16x8xf32>
    %45 = vector.extract_strided_slice %43 {offsets = [0, 0, 8], sizes = [2, 16, 8], strides = [1, 1, 1]} : vector<2x16x96xf32> to vector<2x16x8xf32>
    %46 = vector.extract_strided_slice %43 {offsets = [0, 0, 16], sizes = [2, 16, 8], strides = [1, 1, 1]} : vector<2x16x96xf32> to vector<2x16x8xf32>
    %47 = vector.extract_strided_slice %43 {offsets = [0, 0, 24], sizes = [2, 16, 8], strides = [1, 1, 1]} : vector<2x16x96xf32> to vector<2x16x8xf32>
    %48 = tpu.concatenate %44, %45, %46, %47 in 0 : vector<2x16x8xf32>, vector<2x16x8xf32>, vector<2x16x8xf32>, vector<2x16x8xf32> -> vector<8x16x8xf32>
    %49 = vector.extract_strided_slice %43 {offsets = [0, 0, 32], sizes = [2, 16, 8], strides = [1, 1, 1]} : vector<2x16x96xf32> to vector<2x16x8xf32>
    %50 = vector.extract_strided_slice %43 {offsets = [0, 0, 40], sizes = [2, 16, 8], strides = [1, 1, 1]} : vector<2x16x96xf32> to vector<2x16x8xf32>
    %51 = vector.extract_strided_slice %43 {offsets = [0, 0, 48], sizes = [2, 16, 8], strides = [1, 1, 1]} : vector<2x16x96xf32> to vector<2x16x8xf32>
    %52 = vector.extract_strided_slice %43 {offsets = [0, 0, 56], sizes = [2, 16, 8], strides = [1, 1, 1]} : vector<2x16x96xf32> to vector<2x16x8xf32>
    %53 = tpu.concatenate %49, %50, %51, %52 in 0 : vector<2x16x8xf32>, vector<2x16x8xf32>, vector<2x16x8xf32>, vector<2x16x8xf32> -> vector<8x16x8xf32>
    %54 = vector.extract_strided_slice %43 {offsets = [0, 0, 64], sizes = [2, 16, 8], strides = [1, 1, 1]} : vector<2x16x96xf32> to vector<2x16x8xf32>
    %55 = vector.extract_strided_slice %43 {offsets = [0, 0, 72], sizes = [2, 16, 8], strides = [1, 1, 1]} : vector<2x16x96xf32> to vector<2x16x8xf32>
    %56 = vector.extract_strided_slice %43 {offsets = [0, 0, 80], sizes = [2, 16, 8], strides = [1, 1, 1]} : vector<2x16x96xf32> to vector<2x16x8xf32>
    %57 = vector.extract_strided_slice %43 {offsets = [0, 0, 88], sizes = [2, 16, 8], strides = [1, 1, 1]} : vector<2x16x96xf32> to vector<2x16x8xf32>
    %58 = tpu.concatenate %54, %55, %56, %57 in 0 : vector<2x16x8xf32>, vector<2x16x8xf32>, vector<2x16x8xf32>, vector<2x16x8xf32> -> vector<8x16x8xf32>
    "tpu.trace_start"() <{level = 10 : i32, message = "gqd,gkd->gqk"}> : () -> ()
    %cst_23 = arith.constant dense<0.000000e+00> : vector<8x16x16xf32>
    %59 = tpu.matmul %48, %53, %cst_23 {dimension_numbers = #tpu.dot_dimension_numbers<[2], [2], [1], [1], [0, 0, 0, 1, 1, 1], [0], [0]>} : vector<8x16x8xf32>, vector<8x16x8xf32>, vector<8x16x16xf32> -> vector<8x16x16xf32>
    "tpu.trace_stop"() : () -> ()
    %cst_24 = arith.constant dense<0xFF800000> : vector<8x16xf32>
    %60 = vector.multi_reduction <maximumf>, %59, %cst_24 [2] : vector<8x16x16xf32> to vector<8x16xf32>
    %61 = vector.shape_cast %60 : vector<8x16xf32> to vector<8x16x1xf32>
    %62 = vector.broadcast %61 : vector<8x16x1xf32> to vector<8x16x16xf32>
    %63 = arith.subf %59, %62 : vector<8x16x16xf32>
    %64 = math.exp %63 : vector<8x16x16xf32>
    %cst_25 = arith.constant dense<0.000000e+00> : vector<8x16xf32>
    %65 = vector.multi_reduction <add>, %64, %cst_25 [2] : vector<8x16x16xf32> to vector<8x16xf32>
    %66 = vector.shape_cast %65 : vector<8x16xf32> to vector<8x16x1xf32>
    %67 = tpu.reciprocal %66 {approx = true} : vector<8x16x1xf32> -> vector<8x16x1xf32>
    %68 = arith.mulf %66, %67 : vector<8x16x1xf32>
    %cst_26 = arith.constant 2.000000e+00 : f32
    %69 = vector.broadcast %cst_26 : f32 to vector<8x16x1xf32>
    %70 = arith.subf %69, %68 : vector<8x16x1xf32>
    %71 = arith.mulf %67, %70 : vector<8x16x1xf32>
    %72 = vector.broadcast %71 : vector<8x16x1xf32> to vector<8x16x16xf32>
    %73 = arith.mulf %64, %72 : vector<8x16x16xf32>
    "tpu.trace_start"() <{level = 10 : i32, message = "gqk,gkd->gqd"}> : () -> ()
    %cst_27 = arith.constant dense<0.000000e+00> : vector<8x16x8xf32>
    %74 = tpu.matmul %73, %58, %cst_27 {dimension_numbers = #tpu.dot_dimension_numbers<[2], [1], [1], [2], [0, 0, 0, 1, 1, 2], [0], [0]>} : vector<8x16x16xf32>, vector<8x16x8xf32>, vector<8x16x8xf32> -> vector<8x16x8xf32>
    "tpu.trace_stop"() : () -> ()
    %75 = vector.shape_cast %74 : vector<8x16x8xf32> to vector<4x2x16x8xf32>
    %76 = vector.extract_strided_slice %75 {offsets = [0, 0, 0, 0], sizes = [1, 2, 16, 8], strides = [1, 1, 1, 1]} : vector<4x2x16x8xf32> to vector<1x2x16x8xf32>
    %77 = vector.shape_cast %76 : vector<1x2x16x8xf32> to vector<2x16x8xf32>
    %78 = vector.extract_strided_slice %75 {offsets = [1, 0, 0, 0], sizes = [1, 2, 16, 8], strides = [1, 1, 1, 1]} : vector<4x2x16x8xf32> to vector<1x2x16x8xf32>
    %79 = vector.shape_cast %78 : vector<1x2x16x8xf32> to vector<2x16x8xf32>
    %80 = vector.extract_strided_slice %75 {offsets = [2, 0, 0, 0], sizes = [1, 2, 16, 8], strides = [1, 1, 1, 1]} : vector<4x2x16x8xf32> to vector<1x2x16x8xf32>
    %81 = vector.shape_cast %80 : vector<1x2x16x8xf32> to vector<2x16x8xf32>
    %82 = vector.extract_strided_slice %75 {offsets = [3, 0, 0, 0], sizes = [1, 2, 16, 8], strides = [1, 1, 1, 1]} : vector<4x2x16x8xf32> to vector<1x2x16x8xf32>
    %83 = vector.shape_cast %82 : vector<1x2x16x8xf32> to vector<2x16x8xf32>
    %84 = tpu.concatenate %77, %79, %81, %83 in 2 : vector<2x16x8xf32>, vector<2x16x8xf32>, vector<2x16x8xf32>, vector<2x16x8xf32> -> vector<2x16x32xf32>
    %85 = vector.shape_cast %84 : vector<2x16x32xf32> to vector<32x32xf32>
    %86 = vector.extract_strided_slice %14 {offsets = [0, 96], sizes = [32, 32], strides = [1, 1]} : vector<32x128xf32> to vector<32x32xf32>
    %cst_28 = arith.constant dense<0.000000e+00> : vector<32x32xf32>
    %87 = tpu.matmul %85, %86, %cst_28 {dimension_numbers = #tpu.dot_dimension_numbers<[1], [0], [0], [1], [0, 0, 1, 1], [], []>} : vector<32x32xf32>, vector<32x32xf32>, vector<32x32xf32> -> vector<32x32xf32>
    %c0_29 = arith.constant 0 : index
    %c0_30 = arith.constant 0 : index
    %c0_31 = arith.constant 0 : index
    %88 = vector.load %arg8[%c0_29, %c0_30, %c0_31] : memref<2x1x32xf32, #tpu.memory_space<vmem>>, vector<1x1x32xf32>
    %89 = vector.shape_cast %88 : vector<1x1x32xf32> to vector<1x32xf32>
    %90 = vector.broadcast %89 : vector<1x32xf32> to vector<32x32xf32>
    %91 = arith.addf %87, %90 : vector<32x32xf32>
    %92 = arith.addf %12, %91 : vector<32x32xf32>
    %93 = vector.shape_cast %92 : vector<32x32xf32> to vector<2x16x32xf32>
    %c0_32 = arith.constant 0 : index
    %c0_33 = arith.constant 0 : index
    %c0_34 = arith.constant 0 : index
    %94 = vector.load %arg18[%c0_32, %c0_33, %c0_34] : memref<2x16x128xf32, #tpu.memory_space<vmem>>, vector<2x16x32xf32>
    tpu.vector_store %arg18[%c0_32, %c0_33, %c0_34], %93 {strides = array<i32>} : memref<2x16x128xf32, #tpu.memory_space<vmem>>, vector<2x16x32xf32>,
    %c0_35 = arith.constant 0 : index
    %c0_36 = arith.constant 0 : index
    %c0_37 = arith.constant 0 : index
    %95 = vector.load %arg9[%c0_35, %c0_36, %c0_37] : memref<2x1x32xf32, #tpu.memory_space<vmem>>, vector<1x1x32xf32>
    %96 = vector.shape_cast %95 : vector<1x1x32xf32> to vector<1x32xf32>
    %c0_38 = arith.constant 0 : index
    %c0_39 = arith.constant 0 : index
    %c0_40 = arith.constant 0 : index
    %97 = vector.load %arg10[%c0_38, %c0_39, %c0_40] : memref<2x1x32xf32, #tpu.memory_space<vmem>>, vector<1x1x32xf32>
    %98 = vector.shape_cast %97 : vector<1x1x32xf32> to vector<1x32xf32>
    %cst_41 = arith.constant dense<0.000000e+00> : vector<32xf32>
    %99 = vector.multi_reduction <add>, %92, %cst_41 [1] : vector<32x32xf32> to vector<32xf32>
    %100 = vector.shape_cast %99 : vector<32xf32> to vector<32x1xf32>
    %cst_42 = arith.constant 3.200000e+01 : f32
    %101 = vector.broadcast %cst_42 : f32 to vector<32x1xf32>
    %102 = arith.divf %100, %101 : vector<32x1xf32>
    %103 = vector.broadcast %102 : vector<32x1xf32> to vector<32x32xf32>
    %104 = arith.subf %92, %103 : vector<32x32xf32>
    %105 = arith.mulf %104, %104 : vector<32x32xf32>
    %cst_43 = arith.constant dense<0.000000e+00> : vector<32xf32>
    %106 = vector.multi_reduction <add>, %105, %cst_43 [1] : vector<32x32xf32> to vector<32xf32>
    %107 = vector.shape_cast %106 : vector<32xf32> to vector<32x1xf32>
    %cst_44 = arith.constant 3.200000e+01 : f32
    %108 = vector.broadcast %cst_44 : f32 to vector<32x1xf32>
    %109 = arith.divf %107, %108 : vector<32x1xf32>
    %110 = vector.broadcast %102 : vector<32x1xf32> to vector<32x32xf32>
    %111 = arith.subf %92, %110 : vector<32x32xf32>
    %cst_45 = arith.constant 9.99999974E-6 : f32
    %112 = vector.broadcast %cst_45 : f32 to vector<32x1xf32>
    %113 = arith.addf %109, %112 : vector<32x1xf32>
    %114 = math.rsqrt %113 : vector<32x1xf32>
    %115 = vector.broadcast %114 : vector<32x1xf32> to vector<32x32xf32>
    %116 = arith.mulf %111, %115 : vector<32x32xf32>
    %117 = vector.broadcast %96 : vector<1x32xf32> to vector<32x32xf32>
    %118 = arith.mulf %116, %117 : vector<32x32xf32>
    %119 = vector.broadcast %98 : vector<1x32xf32> to vector<32x32xf32>
    %120 = arith.addf %118, %119 : vector<32x32xf32>
    %c0_46 = arith.constant 0 : index
    %c0_47 = arith.constant 0 : index
    %c0_48 = arith.constant 0 : index
    %121 = vector.load %arg11[%c0_46, %c0_47, %c0_48] : memref<2x32x64xf32, #tpu.memory_space<vmem>>, vector<1x32x64xf32>
    %122 = vector.shape_cast %121 : vector<1x32x64xf32> to vector<32x64xf32>
    %cst_49 = arith.constant dense<0.000000e+00> : vector<32x64xf32>
    %123 = tpu.matmul %120, %122, %cst_49 {dimension_numbers = #tpu.dot_dimension_numbers<[1], [0], [0], [1], [0, 0, 1, 1], [], []>} : vector<32x32xf32>, vector<32x64xf32>, vector<32x64xf32> -> vector<32x64xf32>
    %c0_50 = arith.constant 0 : index
    %c0_51 = arith.constant 0 : index
    %c0_52 = arith.constant 0 : index
    %124 = vector.load %arg12[%c0_50, %c0_51, %c0_52] : memref<2x1x64xf32, #tpu.memory_space<vmem>>, vector<1x1x64xf32>
    %125 = vector.shape_cast %124 : vector<1x1x64xf32> to vector<1x64xf32>
    %126 = vector.broadcast %125 : vector<1x64xf32> to vector<32x64xf32>
    %127 = arith.addf %123, %126 : vector<32x64xf32>
    %cst_53 = arith.constant 5.000000e-01 : f32
    %128 = vector.broadcast %cst_53 : f32 to vector<32x64xf32>
    %129 = arith.mulf %128, %127 : vector<32x64xf32>
    %cst_54 = arith.constant 4.471500e-02 : f32
    %130 = vector.broadcast %cst_54 : f32 to vector<32x64xf32>
    %131 = arith.mulf %130, %127 : vector<32x64xf32>
    %132 = arith.mulf %131, %127 : vector<32x64xf32>
    %133 = arith.mulf %132, %127 : vector<32x64xf32>
    %134 = arith.addf %127, %133 : vector<32x64xf32>
    %cst_55 = arith.constant 0.797884583 : f32
    %135 = vector.broadcast %cst_55 : f32 to vector<32x64xf32>
    %136 = arith.mulf %135, %134 : vector<32x64xf32>
    %137 = math.tanh %136 : vector<32x64xf32>
    %cst_56 = arith.constant 1.000000e+00 : f32
    %138 = vector.broadcast %cst_56 : f32 to vector<32x64xf32>
    %139 = arith.addf %138, %137 : vector<32x64xf32>
    %140 = arith.mulf %129, %139 : vector<32x64xf32>
    %c0_57 = arith.constant 0 : index
    %c0_58 = arith.constant 0 : index
    %c0_59 = arith.constant 0 : index
    %141 = vector.load %arg13[%c0_57, %c0_58, %c0_59] : memref<2x64x32xf32, #tpu.memory_space<vmem>>, vector<1x64x32xf32>
    %142 = vector.shape_cast %141 : vector<1x64x32xf32> to vector<64x32xf32>
    %cst_60 = arith.constant dense<0.000000e+00> : vector<32x32xf32>
    %143 = tpu.matmul %140, %142, %cst_60 {dimension_numbers = #tpu.dot_dimension_numbers<[1], [0], [0], [1], [0, 0, 1, 1], [], []>} : vector<32x64xf32>, vector<64x32xf32>, vector<32x32xf32> -> vector<32x32xf32>
    %c0_61 = arith.constant 0 : index
    %c0_62 = arith.constant 0 : index
    %c0_63 = arith.constant 0 : index
    %144 = vector.load %arg14[%c0_61, %c0_62, %c0_63] : memref<2x1x32xf32, #tpu.memory_space<vmem>>, vector<1x1x32xf32>
    %145 = vector.shape_cast %144 : vector<1x1x32xf32> to vector<1x32xf32>
    %146 = vector.broadcast %145 : vector<1x32xf32> to vector<32x32xf32>
    %147 = arith.addf %143, %146 : vector<32x32xf32>
    %148 = arith.addf %92, %147 : vector<32x32xf32>
    %149 = vector.shape_cast %148 : vector<32x32xf32> to vector<2x16x32xf32>
    %c0_64 = arith.constant 0 : index
    %c0_65 = arith.constant 0 : index
    %c32 = arith.constant 32 : index
    %150 = vector.load %arg18[%c0_64, %c0_65, %c32] : memref<2x16x128xf32, #tpu.memory_space<vmem>>, vector<2x16x32xf32>
    tpu.vector_store %arg18[%c0_64, %c0_65, %c32], %149 {strides = array<i32>} : memref<2x16x128xf32, #tpu.memory_space<vmem>>, vector<2x16x32xf32>,
    %c1 = arith.constant 1 : index
    %c0_66 = arith.constant 0 : index
    %c0_67 = arith.constant 0 : index
    %151 = vector.load %arg7[%c1, %c0_66, %c0_67] : memref<2x32x128xf32, #tpu.memory_space<vmem>>, vector<1x32x128xf32>
    %152 = vector.shape_cast %151 : vector<1x32x128xf32> to vector<32x128xf32>
    %c1_68 = arith.constant 1 : index
    %c0_69 = arith.constant 0 : index
    %c0_70 = arith.constant 0 : index
    %153 = vector.load %arg5[%c1_68, %c0_69, %c0_70] : memref<2x1x32xf32, #tpu.memory_space<vmem>>, vector<1x1x32xf32>
    %154 = vector.shape_cast %153 : vector<1x1x32xf32> to vector<1x32xf32>
    %c1_71 = arith.constant 1 : index
    %c0_72 = arith.constant 0 : index
    %c0_73 = arith.constant 0 : index
    %155 = vector.load %arg6[%c1_71, %c0_72, %c0_73] : memref<2x1x32xf32, #tpu.memory_space<vmem>>, vector<1x1x32xf32>
    %156 = vector.shape_cast %155 : vector<1x1x32xf32> to vector<1x32xf32>
    %cst_74 = arith.constant dense<0.000000e+00> : vector<32xf32>
    %157 = vector.multi_reduction <add>, %148, %cst_74 [1] : vector<32x32xf32> to vector<32xf32>
    %158 = vector.shape_cast %157 : vector<32xf32> to vector<32x1xf32>
    %cst_75 = arith.constant 3.200000e+01 : f32
    %159 = vector.broadcast %cst_75 : f32 to vector<32x1xf32>
    %160 = arith.divf %158, %159 : vector<32x1xf32>
    %161 = vector.broadcast %160 : vector<32x1xf32> to vector<32x32xf32>
    %162 = arith.subf %148, %161 : vector<32x32xf32>
    %163 = arith.mulf %162, %162 : vector<32x32xf32>
    %cst_76 = arith.constant dense<0.000000e+00> : vector<32xf32>
    %164 = vector.multi_reduction <add>, %163, %cst_76 [1] : vector<32x32xf32> to vector<32xf32>
    %165 = vector.shape_cast %164 : vector<32xf32> to vector<32x1xf32>
    %cst_77 = arith.constant 3.200000e+01 : f32
    %166 = vector.broadcast %cst_77 : f32 to vector<32x1xf32>
    %167 = arith.divf %165, %166 : vector<32x1xf32>
    %168 = vector.broadcast %160 : vector<32x1xf32> to vector<32x32xf32>
    %169 = arith.subf %148, %168 : vector<32x32xf32>
    %cst_78 = arith.constant 9.99999974E-6 : f32
    %170 = vector.broadcast %cst_78 : f32 to vector<32x1xf32>
    %171 = arith.addf %167, %170 : vector<32x1xf32>
    %172 = math.rsqrt %171 : vector<32x1xf32>
    %173 = vector.broadcast %172 : vector<32x1xf32> to vector<32x32xf32>
    %174 = arith.mulf %169, %173 : vector<32x32xf32>
    %175 = vector.broadcast %154 : vector<1x32xf32> to vector<32x32xf32>
    %176 = arith.mulf %174, %175 : vector<32x32xf32>
    %177 = vector.broadcast %156 : vector<1x32xf32> to vector<32x32xf32>
    %178 = arith.addf %176, %177 : vector<32x32xf32>
    %179 = vector.extract_strided_slice %152 {offsets = [0, 0], sizes = [32, 96], strides = [1, 1]} : vector<32x128xf32> to vector<32x96xf32>
    %cst_79 = arith.constant dense<0.000000e+00> : vector<32x96xf32>
    %180 = tpu.matmul %178, %179, %cst_79 {dimension_numbers = #tpu.dot_dimension_numbers<[1], [0], [0], [1], [0, 0, 1, 1], [], []>} : vector<32x32xf32>, vector<32x96xf32>, vector<32x96xf32> -> vector<32x96xf32>
    %181 = vector.shape_cast %180 : vector<32x96xf32> to vector<2x16x96xf32>
    %182 = vector.extract_strided_slice %181 {offsets = [0, 0, 0], sizes = [2, 16, 8], strides = [1, 1, 1]} : vector<2x16x96xf32> to vector<2x16x8xf32>
    %183 = vector.extract_strided_slice %181 {offsets = [0, 0, 8], sizes = [2, 16, 8], strides = [1, 1, 1]} : vector<2x16x96xf32> to vector<2x16x8xf32>
    %184 = vector.extract_strided_slice %181 {offsets = [0, 0, 16], sizes = [2, 16, 8], strides = [1, 1, 1]} : vector<2x16x96xf32> to vector<2x16x8xf32>
    %185 = vector.extract_strided_slice %181 {offsets = [0, 0, 24], sizes = [2, 16, 8], strides = [1, 1, 1]} : vector<2x16x96xf32> to vector<2x16x8xf32>
    %186 = tpu.concatenate %182, %183, %184, %185 in 0 : vector<2x16x8xf32>, vector<2x16x8xf32>, vector<2x16x8xf32>, vector<2x16x8xf32> -> vector<8x16x8xf32>
    %187 = vector.extract_strided_slice %181 {offsets = [0, 0, 32], sizes = [2, 16, 8], strides = [1, 1, 1]} : vector<2x16x96xf32> to vector<2x16x8xf32>
    %188 = vector.extract_strided_slice %181 {offsets = [0, 0, 40], sizes = [2, 16, 8], strides = [1, 1, 1]} : vector<2x16x96xf32> to vector<2x16x8xf32>
    %189 = vector.extract_strided_slice %181 {offsets = [0, 0, 48], sizes = [2, 16, 8], strides = [1, 1, 1]} : vector<2x16x96xf32> to vector<2x16x8xf32>
    %190 = vector.extract_strided_slice %181 {offsets = [0, 0, 56], sizes = [2, 16, 8], strides = [1, 1, 1]} : vector<2x16x96xf32> to vector<2x16x8xf32>
    %191 = tpu.concatenate %187, %188, %189, %190 in 0 : vector<2x16x8xf32>, vector<2x16x8xf32>, vector<2x16x8xf32>, vector<2x16x8xf32> -> vector<8x16x8xf32>
    %192 = vector.extract_strided_slice %181 {offsets = [0, 0, 64], sizes = [2, 16, 8], strides = [1, 1, 1]} : vector<2x16x96xf32> to vector<2x16x8xf32>
    %193 = vector.extract_strided_slice %181 {offsets = [0, 0, 72], sizes = [2, 16, 8], strides = [1, 1, 1]} : vector<2x16x96xf32> to vector<2x16x8xf32>
    %194 = vector.extract_strided_slice %181 {offsets = [0, 0, 80], sizes = [2, 16, 8], strides = [1, 1, 1]} : vector<2x16x96xf32> to vector<2x16x8xf32>
    %195 = vector.extract_strided_slice %181 {offsets = [0, 0, 88], sizes = [2, 16, 8], strides = [1, 1, 1]} : vector<2x16x96xf32> to vector<2x16x8xf32>
    %196 = tpu.concatenate %192, %193, %194, %195 in 0 : vector<2x16x8xf32>, vector<2x16x8xf32>, vector<2x16x8xf32>, vector<2x16x8xf32> -> vector<8x16x8xf32>
    "tpu.trace_start"() <{level = 10 : i32, message = "gqd,gkd->gqk"}> : () -> ()
    %cst_80 = arith.constant dense<0.000000e+00> : vector<8x16x16xf32>
    %197 = tpu.matmul %186, %191, %cst_80 {dimension_numbers = #tpu.dot_dimension_numbers<[2], [2], [1], [1], [0, 0, 0, 1, 1, 1], [0], [0]>} : vector<8x16x8xf32>, vector<8x16x8xf32>, vector<8x16x16xf32> -> vector<8x16x16xf32>
    "tpu.trace_stop"() : () -> ()
    %cst_81 = arith.constant dense<0xFF800000> : vector<8x16xf32>
    %198 = vector.multi_reduction <maximumf>, %197, %cst_81 [2] : vector<8x16x16xf32> to vector<8x16xf32>
    %199 = vector.shape_cast %198 : vector<8x16xf32> to vector<8x16x1xf32>
    %200 = vector.broadcast %199 : vector<8x16x1xf32> to vector<8x16x16xf32>
    %201 = arith.subf %197, %200 : vector<8x16x16xf32>
    %202 = math.exp %201 : vector<8x16x16xf32>
    %cst_82 = arith.constant dense<0.000000e+00> : vector<8x16xf32>
    %203 = vector.multi_reduction <add>, %202, %cst_82 [2] : vector<8x16x16xf32> to vector<8x16xf32>
    %204 = vector.shape_cast %203 : vector<8x16xf32> to vector<8x16x1xf32>
    %205 = tpu.reciprocal %204 {approx = true} : vector<8x16x1xf32> -> vector<8x16x1xf32>
    %206 = arith.mulf %204, %205 : vector<8x16x1xf32>
    %cst_83 = arith.constant 2.000000e+00 : f32
    %207 = vector.broadcast %cst_83 : f32 to vector<8x16x1xf32>
    %208 = arith.subf %207, %206 : vector<8x16x1xf32>
    %209 = arith.mulf %205, %208 : vector<8x16x1xf32>
    %210 = vector.broadcast %209 : vector<8x16x1xf32> to vector<8x16x16xf32>
    %211 = arith.mulf %202, %210 : vector<8x16x16xf32>
    "tpu.trace_start"() <{level = 10 : i32, message = "gqk,gkd->gqd"}> : () -> ()
    %cst_84 = arith.constant dense<0.000000e+00> : vector<8x16x8xf32>
    %212 = tpu.matmul %211, %196, %cst_84 {dimension_numbers = #tpu.dot_dimension_numbers<[2], [1], [1], [2], [0, 0, 0, 1, 1, 2], [0], [0]>} : vector<8x16x16xf32>, vector<8x16x8xf32>, vector<8x16x8xf32> -> vector<8x16x8xf32>
    "tpu.trace_stop"() : () -> ()
    %213 = vector.shape_cast %212 : vector<8x16x8xf32> to vector<4x2x16x8xf32>
    %214 = vector.extract_strided_slice %213 {offsets = [0, 0, 0, 0], sizes = [1, 2, 16, 8], strides = [1, 1, 1, 1]} : vector<4x2x16x8xf32> to vector<1x2x16x8xf32>
    %215 = vector.shape_cast %214 : vector<1x2x16x8xf32> to vector<2x16x8xf32>
    %216 = vector.extract_strided_slice %213 {offsets = [1, 0, 0, 0], sizes = [1, 2, 16, 8], strides = [1, 1, 1, 1]} : vector<4x2x16x8xf32> to vector<1x2x16x8xf32>
    %217 = vector.shape_cast %216 : vector<1x2x16x8xf32> to vector<2x16x8xf32>
    %218 = vector.extract_strided_slice %213 {offsets = [2, 0, 0, 0], sizes = [1, 2, 16, 8], strides = [1, 1, 1, 1]} : vector<4x2x16x8xf32> to vector<1x2x16x8xf32>
    %219 = vector.shape_cast %218 : vector<1x2x16x8xf32> to vector<2x16x8xf32>
    %220 = vector.extract_strided_slice %213 {offsets = [3, 0, 0, 0], sizes = [1, 2, 16, 8], strides = [1, 1, 1, 1]} : vector<4x2x16x8xf32> to vector<1x2x16x8xf32>
    %221 = vector.shape_cast %220 : vector<1x2x16x8xf32> to vector<2x16x8xf32>
    %222 = tpu.concatenate %215, %217, %219, %221 in 2 : vector<2x16x8xf32>, vector<2x16x8xf32>, vector<2x16x8xf32>, vector<2x16x8xf32> -> vector<2x16x32xf32>
    %223 = vector.shape_cast %222 : vector<2x16x32xf32> to vector<32x32xf32>
    %224 = vector.extract_strided_slice %152 {offsets = [0, 96], sizes = [32, 32], strides = [1, 1]} : vector<32x128xf32> to vector<32x32xf32>
    %cst_85 = arith.constant dense<0.000000e+00> : vector<32x32xf32>
    %225 = tpu.matmul %223, %224, %cst_85 {dimension_numbers = #tpu.dot_dimension_numbers<[1], [0], [0], [1], [0, 0, 1, 1], [], []>} : vector<32x32xf32>, vector<32x32xf32>, vector<32x32xf32> -> vector<32x32xf32>
    %c1_86 = arith.constant 1 : index
    %c0_87 = arith.constant 0 : index
    %c0_88 = arith.constant 0 : index
    %226 = vector.load %arg8[%c1_86, %c0_87, %c0_88] : memref<2x1x32xf32, #tpu.memory_space<vmem>>, vector<1x1x32xf32>
    %227 = vector.shape_cast %226 : vector<1x1x32xf32> to vector<1x32xf32>
    %228 = vector.broadcast %227 : vector<1x32xf32> to vector<32x32xf32>
    %229 = arith.addf %225, %228 : vector<32x32xf32>
    %230 = arith.addf %148, %229 : vector<32x32xf32>
    %231 = vector.shape_cast %230 : vector<32x32xf32> to vector<2x16x32xf32>
    %c0_89 = arith.constant 0 : index
    %c0_90 = arith.constant 0 : index
    %c64 = arith.constant 64 : index
    %232 = vector.load %arg18[%c0_89, %c0_90, %c64] : memref<2x16x128xf32, #tpu.memory_space<vmem>>, vector<2x16x32xf32>
    tpu.vector_store %arg18[%c0_89, %c0_90, %c64], %231 {strides = array<i32>} : memref<2x16x128xf32, #tpu.memory_space<vmem>>, vector<2x16x32xf32>,
    %c1_91 = arith.constant 1 : index
    %c0_92 = arith.constant 0 : index
    %c0_93 = arith.constant 0 : index
    %233 = vector.load %arg9[%c1_91, %c0_92, %c0_93] : memref<2x1x32xf32, #tpu.memory_space<vmem>>, vector<1x1x32xf32>
    %234 = vector.shape_cast %233 : vector<1x1x32xf32> to vector<1x32xf32>
    %c1_94 = arith.constant 1 : index
    %c0_95 = arith.constant 0 : index
    %c0_96 = arith.constant 0 : index
    %235 = vector.load %arg10[%c1_94, %c0_95, %c0_96] : memref<2x1x32xf32, #tpu.memory_space<vmem>>, vector<1x1x32xf32>
    %236 = vector.shape_cast %235 : vector<1x1x32xf32> to vector<1x32xf32>
    %cst_97 = arith.constant dense<0.000000e+00> : vector<32xf32>
    %237 = vector.multi_reduction <add>, %230, %cst_97 [1] : vector<32x32xf32> to vector<32xf32>
    %238 = vector.shape_cast %237 : vector<32xf32> to vector<32x1xf32>
    %cst_98 = arith.constant 3.200000e+01 : f32
    %239 = vector.broadcast %cst_98 : f32 to vector<32x1xf32>
    %240 = arith.divf %238, %239 : vector<32x1xf32>
    %241 = vector.broadcast %240 : vector<32x1xf32> to vector<32x32xf32>
    %242 = arith.subf %230, %241 : vector<32x32xf32>
    %243 = arith.mulf %242, %242 : vector<32x32xf32>
    %cst_99 = arith.constant dense<0.000000e+00> : vector<32xf32>
    %244 = vector.multi_reduction <add>, %243, %cst_99 [1] : vector<32x32xf32> to vector<32xf32>
    %245 = vector.shape_cast %244 : vector<32xf32> to vector<32x1xf32>
    %cst_100 = arith.constant 3.200000e+01 : f32
    %246 = vector.broadcast %cst_100 : f32 to vector<32x1xf32>
    %247 = arith.divf %245, %246 : vector<32x1xf32>
    %248 = vector.broadcast %240 : vector<32x1xf32> to vector<32x32xf32>
    %249 = arith.subf %230, %248 : vector<32x32xf32>
    %cst_101 = arith.constant 9.99999974E-6 : f32
    %250 = vector.broadcast %cst_101 : f32 to vector<32x1xf32>
    %251 = arith.addf %247, %250 : vector<32x1xf32>
    %252 = math.rsqrt %251 : vector<32x1xf32>
    %253 = vector.broadcast %252 : vector<32x1xf32> to vector<32x32xf32>
    %254 = arith.mulf %249, %253 : vector<32x32xf32>
    %255 = vector.broadcast %234 : vector<1x32xf32> to vector<32x32xf32>
    %256 = arith.mulf %254, %255 : vector<32x32xf32>
    %257 = vector.broadcast %236 : vector<1x32xf32> to vector<32x32xf32>
    %258 = arith.addf %256, %257 : vector<32x32xf32>
    %c1_102 = arith.constant 1 : index
    %c0_103 = arith.constant 0 : index
    %c0_104 = arith.constant 0 : index
    %259 = vector.load %arg11[%c1_102, %c0_103, %c0_104] : memref<2x32x64xf32, #tpu.memory_space<vmem>>, vector<1x32x64xf32>
    %260 = vector.shape_cast %259 : vector<1x32x64xf32> to vector<32x64xf32>
    %cst_105 = arith.constant dense<0.000000e+00> : vector<32x64xf32>
    %261 = tpu.matmul %258, %260, %cst_105 {dimension_numbers = #tpu.dot_dimension_numbers<[1], [0], [0], [1], [0, 0, 1, 1], [], []>} : vector<32x32xf32>, vector<32x64xf32>, vector<32x64xf32> -> vector<32x64xf32>
    %c1_106 = arith.constant 1 : index
    %c0_107 = arith.constant 0 : index
    %c0_108 = arith.constant 0 : index
    %262 = vector.load %arg12[%c1_106, %c0_107, %c0_108] : memref<2x1x64xf32, #tpu.memory_space<vmem>>, vector<1x1x64xf32>
    %263 = vector.shape_cast %262 : vector<1x1x64xf32> to vector<1x64xf32>
    %264 = vector.broadcast %263 : vector<1x64xf32> to vector<32x64xf32>
    %265 = arith.addf %261, %264 : vector<32x64xf32>
    %cst_109 = arith.constant 5.000000e-01 : f32
    %266 = vector.broadcast %cst_109 : f32 to vector<32x64xf32>
    %267 = arith.mulf %266, %265 : vector<32x64xf32>
    %cst_110 = arith.constant 4.471500e-02 : f32
    %268 = vector.broadcast %cst_110 : f32 to vector<32x64xf32>
    %269 = arith.mulf %268, %265 : vector<32x64xf32>
    %270 = arith.mulf %269, %265 : vector<32x64xf32>
    %271 = arith.mulf %270, %265 : vector<32x64xf32>
    %272 = arith.addf %265, %271 : vector<32x64xf32>
    %cst_111 = arith.constant 0.797884583 : f32
    %273 = vector.broadcast %cst_111 : f32 to vector<32x64xf32>
    %274 = arith.mulf %273, %272 : vector<32x64xf32>
    %275 = math.tanh %274 : vector<32x64xf32>
    %cst_112 = arith.constant 1.000000e+00 : f32
    %276 = vector.broadcast %cst_112 : f32 to vector<32x64xf32>
    %277 = arith.addf %276, %275 : vector<32x64xf32>
    %278 = arith.mulf %267, %277 : vector<32x64xf32>
    %c1_113 = arith.constant 1 : index
    %c0_114 = arith.constant 0 : index
    %c0_115 = arith.constant 0 : index
    %279 = vector.load %arg13[%c1_113, %c0_114, %c0_115] : memref<2x64x32xf32, #tpu.memory_space<vmem>>, vector<1x64x32xf32>
    %280 = vector.shape_cast %279 : vector<1x64x32xf32> to vector<64x32xf32>
    %cst_116 = arith.constant dense<0.000000e+00> : vector<32x32xf32>
    %281 = tpu.matmul %278, %280, %cst_116 {dimension_numbers = #tpu.dot_dimension_numbers<[1], [0], [0], [1], [0, 0, 1, 1], [], []>} : vector<32x64xf32>, vector<64x32xf32>, vector<32x32xf32> -> vector<32x32xf32>
    %c1_117 = arith.constant 1 : index
    %c0_118 = arith.constant 0 : index
    %c0_119 = arith.constant 0 : index
    %282 = vector.load %arg14[%c1_117, %c0_118, %c0_119] : memref<2x1x32xf32, #tpu.memory_space<vmem>>, vector<1x1x32xf32>
    %283 = vector.shape_cast %282 : vector<1x1x32xf32> to vector<1x32xf32>
    %284 = vector.broadcast %283 : vector<1x32xf32> to vector<32x32xf32>
    %285 = arith.addf %281, %284 : vector<32x32xf32>
    %286 = arith.addf %230, %285 : vector<32x32xf32>
    %287 = vector.shape_cast %286 : vector<32x32xf32> to vector<2x16x32xf32>
    %c0_120 = arith.constant 0 : index
    %c0_121 = arith.constant 0 : index
    %c96 = arith.constant 96 : index
    %288 = vector.load %arg18[%c0_120, %c0_121, %c96] : memref<2x16x128xf32, #tpu.memory_space<vmem>>, vector<2x16x32xf32>
    tpu.vector_store %arg18[%c0_120, %c0_121, %c96], %287 {strides = array<i32>} : memref<2x16x128xf32, #tpu.memory_space<vmem>>, vector<2x16x32xf32>,
    %c0_122 = arith.constant 0 : index
    %c0_123 = arith.constant 0 : index
    %289 = vector.load %arg15[%c0_122, %c0_123] : memref<1x32xf32, #tpu.memory_space<vmem>>, vector<1x32xf32>
    %c0_124 = arith.constant 0 : index
    %c0_125 = arith.constant 0 : index
    %290 = vector.load %arg16[%c0_124, %c0_125] : memref<1x32xf32, #tpu.memory_space<vmem>>, vector<1x32xf32>
    %cst_126 = arith.constant dense<0.000000e+00> : vector<32xf32>
    %291 = vector.multi_reduction <add>, %286, %cst_126 [1] : vector<32x32xf32> to vector<32xf32>
    %292 = vector.shape_cast %291 : vector<32xf32> to vector<32x1xf32>
    %cst_127 = arith.constant 3.200000e+01 : f32
    %293 = vector.broadcast %cst_127 : f32 to vector<32x1xf32>
    %294 = arith.divf %292, %293 : vector<32x1xf32>
    %295 = vector.broadcast %294 : vector<32x1xf32> to vector<32x32xf32>
    %296 = arith.subf %286, %295 : vector<32x32xf32>
    %297 = arith.mulf %296, %296 : vector<32x32xf32>
    %cst_128 = arith.constant dense<0.000000e+00> : vector<32xf32>
    %298 = vector.multi_reduction <add>, %297, %cst_128 [1] : vector<32x32xf32> to vector<32xf32>
    %299 = vector.shape_cast %298 : vector<32xf32> to vector<32x1xf32>
    %cst_129 = arith.constant 3.200000e+01 : f32
    %300 = vector.broadcast %cst_129 : f32 to vector<32x1xf32>
    %301 = arith.divf %299, %300 : vector<32x1xf32>
    %302 = vector.broadcast %294 : vector<32x1xf32> to vector<32x32xf32>
    %303 = arith.subf %286, %302 : vector<32x32xf32>
    %cst_130 = arith.constant 9.99999974E-6 : f32
    %304 = vector.broadcast %cst_130 : f32 to vector<32x1xf32>
    %305 = arith.addf %301, %304 : vector<32x1xf32>
    %306 = math.rsqrt %305 : vector<32x1xf32>
    %307 = vector.broadcast %306 : vector<32x1xf32> to vector<32x32xf32>
    %308 = arith.mulf %303, %307 : vector<32x32xf32>
    %309 = vector.broadcast %289 : vector<1x32xf32> to vector<32x32xf32>
    %310 = arith.mulf %308, %309 : vector<32x32xf32>
    %311 = vector.broadcast %290 : vector<1x32xf32> to vector<32x32xf32>
    %312 = arith.addf %310, %311 : vector<32x32xf32>
    %313 = vector.shape_cast %312 : vector<32x32xf32> to vector<2x16x32xf32>
    %c0_131 = arith.constant 0 : index
    %c0_132 = arith.constant 0 : index
    %c0_133 = arith.constant 0 : index
    %314 = vector.load %arg17[%c0_131, %c0_132, %c0_133] : memref<2x16x32xf32, #tpu.memory_space<vmem>>, vector<2x16x32xf32>
    tpu.vector_store %arg17[%c0_131, %c0_132, %c0_133], %313 {strides = array<i32>} : memref<2x16x32xf32, #tpu.memory_space<vmem>>, vector<2x16x32xf32>,
    return
  }
  func.func @transform_0(%arg0: i32) -> (i32, i32, i32) {
    %c0_i32 = arith.constant 0 : i32
    %c0_i32_0 = arith.constant 0 : i32
    %c0_i32_1 = arith.constant 0 : i32
    return %arg0, %c0_i32, %c0_i32_0 : i32, i32, i32
  }
  func.func @transform_1(%arg0: i32) -> (i32, i32) {
    %c0_i32 = arith.constant 0 : i32
    %c0_i32_0 = arith.constant 0 : i32
    %c0_i32_1 = arith.constant 0 : i32
    return %c0_i32, %c0_i32_0 : i32, i32
  }
  func.func @transform_2(%arg0: i32) -> (i32, i32) {
    %c0_i32 = arith.constant 0 : i32
    %c0_i32_0 = arith.constant 0 : i32
    %c0_i32_1 = arith.constant 0 : i32
    return %c0_i32, %c0_i32_0 : i32, i32
  }
  func.func @transform_3(%arg0: i32) -> (i32, i32) {
    %c0_i32 = arith.constant 0 : i32
    %c0_i32_0 = arith.constant 0 : i32
    %c0_i32_1 = arith.constant 0 : i32
    return %c0_i32, %c0_i32_0 : i32, i32
  }
  func.func @transform_4(%arg0: i32) -> (i32, i32, i32) {
    %c0_i32 = arith.constant 0 : i32
    %c0_i32_0 = arith.constant 0 : i32
    %c0_i32_1 = arith.constant 0 : i32
    %c0_i32_2 = arith.constant 0 : i32
    return %c0_i32, %c0_i32_0, %c0_i32_1 : i32, i32, i32
  }
  func.func @transform_5(%arg0: i32) -> (i32, i32, i32) {
    %c0_i32 = arith.constant 0 : i32
    %c0_i32_0 = arith.constant 0 : i32
    %c0_i32_1 = arith.constant 0 : i32
    %c0_i32_2 = arith.constant 0 : i32
    return %c0_i32, %c0_i32_0, %c0_i32_1 : i32, i32, i32
  }
  func.func @transform_6(%arg0: i32) -> (i32, i32, i32) {
    %c0_i32 = arith.constant 0 : i32
    %c0_i32_0 = arith.constant 0 : i32
    %c0_i32_1 = arith.constant 0 : i32
    %c0_i32_2 = arith.constant 0 : i32
    return %c0_i32, %c0_i32_0, %c0_i32_1 : i32, i32, i32
  }
  func.func @transform_7(%arg0: i32) -> (i32, i32, i32) {
    %c0_i32 = arith.constant 0 : i32
    %c0_i32_0 = arith.constant 0 : i32
    %c0_i32_1 = arith.constant 0 : i32
    %c0_i32_2 = arith.constant 0 : i32
    return %c0_i32, %c0_i32_0, %c0_i32_1 : i32, i32, i32
  }
  func.func @transform_8(%arg0: i32) -> (i32, i32, i32) {
    %c0_i32 = arith.constant 0 : i32
    %c0_i32_0 = arith.constant 0 : i32
    %c0_i32_1 = arith.constant 0 : i32
    %c0_i32_2 = arith.constant 0 : i32
    return %c0_i32, %c0_i32_0, %c0_i32_1 : i32, i32, i32
  }
  func.func @transform_9(%arg0: i32) -> (i32, i32, i32) {
    %c0_i32 = arith.constant 0 : i32
    %c0_i32_0 = arith.constant 0 : i32
    %c0_i32_1 = arith.constant 0 : i32
    %c0_i32_2 = arith.constant 0 : i32
    return %c0_i32, %c0_i32_0, %c0_i32_1 : i32, i32, i32
  }
  func.func @transform_10(%arg0: i32) -> (i32, i32, i32) {
    %c0_i32 = arith.constant 0 : i32
    %c0_i32_0 = arith.constant 0 : i32
    %c0_i32_1 = arith.constant 0 : i32
    %c0_i32_2 = arith.constant 0 : i32
    return %c0_i32, %c0_i32_0, %c0_i32_1 : i32, i32, i32
  }
  func.func @transform_11(%arg0: i32) -> (i32, i32, i32) {
    %c0_i32 = arith.constant 0 : i32
    %c0_i32_0 = arith.constant 0 : i32
    %c0_i32_1 = arith.constant 0 : i32
    %c0_i32_2 = arith.constant 0 : i32
    return %c0_i32, %c0_i32_0, %c0_i32_1 : i32, i32, i32
  }
  func.func @transform_12(%arg0: i32) -> (i32, i32, i32) {
    %c0_i32 = arith.constant 0 : i32
    %c0_i32_0 = arith.constant 0 : i32
    %c0_i32_1 = arith.constant 0 : i32
    %c0_i32_2 = arith.constant 0 : i32
    return %c0_i32, %c0_i32_0, %c0_i32_1 : i32, i32, i32
  }
  func.func @transform_13(%arg0: i32) -> (i32, i32, i32) {
    %c0_i32 = arith.constant 0 : i32
    %c0_i32_0 = arith.constant 0 : i32
    %c0_i32_1 = arith.constant 0 : i32
    %c0_i32_2 = arith.constant 0 : i32
    return %c0_i32, %c0_i32_0, %c0_i32_1 : i32, i32, i32
  }
  func.func @transform_14(%arg0: i32) -> (i32, i32) {
    %c0_i32 = arith.constant 0 : i32
    %c0_i32_0 = arith.constant 0 : i32
    %c0_i32_1 = arith.constant 0 : i32
    return %c0_i32, %c0_i32_0 : i32, i32
  }
  func.func @transform_15(%arg0: i32) -> (i32, i32) {
    %c0_i32 = arith.constant 0 : i32
    %c0_i32_0 = arith.constant 0 : i32
    %c0_i32_1 = arith.constant 0 : i32
    return %c0_i32, %c0_i32_0 : i32, i32
  }
  func.func @transform_16(%arg0: i32) -> (i32, i32, i32) {
    %c0_i32 = arith.constant 0 : i32
    %c0_i32_0 = arith.constant 0 : i32
    %c0_i32_1 = arith.constant 0 : i32
    return %arg0, %c0_i32, %c0_i32_0 : i32, i32, i32
  }
  func.func @transform_17(%arg0: i32) -> (i32, i32, i32) {
    %c0_i32 = arith.constant 0 : i32
    %c0_i32_0 = arith.constant 0 : i32
    %c0_i32_1 = arith.constant 0 : i32
    return %arg0, %c0_i32, %c0_i32_0 : i32, i32, i32
  }
}

</mosaic_0001>

<bundles_post_ra>
// kernel: _encode_jit.1
= control target key start
LH: loop header
LB: loop body
LE: loop exit
PB: predicated region body
PF: predicated region fallthrough
CT: control target
= control target key end

     0   :  { %s4827_s0 = inlined_call_operand.vmem [shape: f32[2,16,32], index: 0, kind: input, shape index: {}]   ;;  %s4828_s1 = inlined_call_operand.vmem [shape: f32[32,32], index: 1, kind: input, shape index: {}]   ;;  %s4829_s2 = inlined_call_operand.vmem [shape: f32[1,32], index: 2, kind: input, shape index: {}]   ;;  %s4830_s3 = inlined_call_operand.vmem [shape: f32[16,32], index: 3, kind: input, shape index: {}]   ;;  %s4831_s4 = inlined_call_operand.vmem [shape: f32[2,1,32], index: 4, kind: input, shape index: {}]   ;;  %s4832_s5 = inlined_call_operand.vmem [shape: f32[2,1,32], index: 5, kind: input, shape index: {}]   ;;  %s4833_s6 = inlined_call_operand.vmem [shape: f32[2,32,128], index: 6, kind: input, shape index: {}]   ;;  %s4834_s7 = inlined_call_operand.vmem [shape: f32[2,1,32], index: 7, kind: input, shape index: {}]   ;;  %s4835_s8 = inlined_call_operand.vmem [shape: f32[2,1,32], index: 8, kind: input, shape index: {}]   ;;  %s4836_s9 = inlined_call_operand.vmem [shape: f32[2,1,32], index: 9, kind: input, shape index: {}]   ;;  %s4837_s10 = inlined_call_operand.vmem [shape: f32[2,32,64], index: 10, kind: input, shape index: {}]   ;;  %s4838_s11 = inlined_call_operand.vmem [shape: f32[2,1,64], index: 11, kind: input, shape index: {}]   ;;  %s4839_s12 = inlined_call_operand.vmem [shape: f32[2,64,32], index: 12, kind: input, shape index: {}]   ;;  %s4840_s13 = inlined_call_operand.vmem [shape: f32[2,1,32], index: 13, kind: input, shape index: {}]   ;;  %s4841_s14 = inlined_call_operand.vmem [shape: f32[1,32], index: 14, kind: input, shape index: {}]   ;;  %s4842_s15 = inlined_call_operand.vmem [shape: f32[1,32], index: 15, kind: input, shape index: {}]   ;;  %s4843_s16 = inlined_call_operand.hbm [shape: f32[2,16,32], index: 16, kind: output, shape index: {0}]   ;;  %s4844_s17 = inlined_call_operand.vmem [shape: f32[2,16,128], index: 17, kind: output, shape index: {1}]  }
   0x1   :  { %4851 = sst [smem:[#allocation5_spill]] %s4827_s0 }
   0x2   :  { %4852 = sst [smem:[#allocation6_spill]] %s4828_s1 }
   0x3   :  { %s4853_s26 = sld [smem:[#allocation6_spill]]  ;;  %vm68_vm0 = vcmask 261120  }
   0x4   :  { %s4854_s20 = sld [smem:[#allocation5_spill]] }
   0x9   :  { %v63_v0 = vld [vmem:[%s4853_s26 + $0x18] sm:$0xff]  ;;  %v62_v1 = vld [vmem:[%s4853_s26 + $0x10] sm:$0xff]  ;;  %v61_v2 = vld [vmem:[%s4853_s26 + $0x8] sm:$0xff] }
   0xa   :  { %93 = vmatpush.msra.mxu0 %v63_v0  ;;  %v60_v3 = vld [vmem:[%s4853_s26] sm:$0xff] }
   0xb   :  { %v56_v4 = vld [vmem:[%s4854_s20] sm:$0xff] }
   0xc   :  { %94 = vmatpush.msra.mxu0 %v62_v1 }
   0xe   :  { %95 = vmatpush.msra.mxu0 %v61_v2 }
  0x10   :  { %96 = vmatpush.msra.mxu0 %v60_v3 }
  0x11   :  { %2998 = vmatmul.msk.f32.vlgmr.msra.gmra.mxu0 %vm68_vm0, %v56_v4 }
  0x12   :  { %23 = vsyncpa [#allocation3], 0  ;;  %v57_v5 = vld [vmem:[%s4854_s20 + $0x8] sm:$0xff]  ;;  %v58_v6 = vld [vmem:[%s4854_s20 + $0x10] sm:$0xff]  ;;  %v3502_v27 = vmov 32.0   ;;  %s3503_s28 = smov 120  }
  0x13   :  { %v59_v7 = vld [vmem:[%s4854_s20 + $0x18] sm:$0xff]  ;;  %v3271_v9 = vld [vmem:[%s4829_s2] ss:$0 sm:$0xff]  ;;  %v111_v11 = vld [vmem:[%s4830_s3 + $0x8] sm:$0xff]  ;;  %3288 = vrcp.f32 %v3502_v27  ;;  %s3504_s29 = smov 112   ;;  %s3505_s0 = smov 96  }
  0x14   :  { %v110_v17 = vld [vmem:[%s4830_s3] sm:$0xff]  ;;  %v119_v54 = vld [vmem:[%s4833_s6 + $0x18] sm:$0xff]  ;;  %v118_v55 = vld [vmem:[%s4833_s6 + $0x10] sm:$0xff]  ;;  %s3506_s30 = smov 104   ;;  %vm304_vm14 = vcmask 64512   ;;  %s3507_s18 = smov 64  }
  0x15   :  { %3153 = vmatpush.msra.mxu1 %v119_v54  ;;  %255 = vmatpush.msrb.mxu0 %v119_v54  ;;  %v3692_v56 = vld [vmem:[%s4833_s6 + $0x8] sm:$0xff]  ;;  %v3699_v57 = vld [vmem:[%s4833_s6] sm:$0xff]  ;;  %vm581_vm15 = vcmask 130048   ;;  %s3508_s2 = smov 32   ;;  %s3509_s3 = smov 8  }
  0x16   :  { %s4847_s22 = smov 24   ;;  %s4849_s23 = smov 16  }
  0x17   :  { %3154 = vmatpush.msra.mxu1 %v118_v55  ;;  %256 = vmatpush.msrb.mxu0 %v118_v55 }
  0x19   :  { %2999 = vmatmul.msk.f32.gmra.mxu0 %vm68_vm0, %v57_v5  ;;  %v3289_v28 = vpop.eup %3288  ;;  %3155 = vmatpush.msra.mxu1 %v3692_v56 }
  0x1a   :  { %v135_v29 = vmul.f32 32.0, %v3289_v28  ;;  %vm139_vm1 = vweird.f32 %v3289_v28  ;;  %257 = vmatpush.msrb.mxu0 %v3692_v56 }
  0x1b   :  { %3156 = vmatpush.msra.mxu1 %v3699_v57 }
  0x1c   :  { %v136_v30 = vsub.f32 1.0, %v135_v29  ;;  %258 = vmatpush.msrb.mxu0 %v3699_v57 }
  0x1e   :  { %v137_v31 = vmul.f32 %v3289_v28, %v136_v30 }
  0x20   :  { %v138_v32 = vadd.f32 %v3289_v28, %v137_v31 }
  0x21   :  { %3000 = vmatmul.msk.f32.gmra.mxu0 %vm68_vm0, %v58_v6 }
  0x22   :  { %v3657_v33 = vsel %vm139_vm1, %v3289_v28, %v138_v32  ;;  %vm1142_vm1 = vcmask 195584  }
  0x29   :  { %3001 = vmatmul.msk.f32.gmra.mxu0 %vm68_vm0, %v59_v7 }
  0x8e   :  { %v98_v8 = vpop.f32.mrf.mxu0 }
  0x8f   :  { %v99_v23 = vadd.f32 %v3271_v9, %v98_v8 }
  0x91   :  { %v3653_v25 = vadd.f32 %v110_v17, %v99_v23 }
  0x93   :  { %v122_v26 = vsel %vm68_vm0, %v3653_v25, 0.0 }
  0x96   :  { %v101_v10 = vpop.f32.mrf.mxu0 }
  0x97   :  { %v102_v12 = vadd.f32 %v3271_v9, %v101_v10 }
  0x99   :  { %v3638_v13 = vadd.f32 %v111_v11, %v102_v12 }
  0x9b   :  { %v125_v14 = vsel %vm68_vm0, %v3638_v13, 0.0 }
  0x9c   :  { %126 = vadd.xlane.f32.xlu0 %v125_v14 }
  0x9e   :  { %v104_v15 = vpop.f32.mrf.mxu0 }
  0x9f   :  { %v105_v16 = vadd.f32 %v3271_v9, %v104_v15 }
  0xa1   :  { %v3645_v18 = vadd.f32 %v110_v17, %v105_v16  ;;  %v3273_v16 = vld [vmem:[%s4832_s5] ss:$0 sm:$0xff] }
  0xa3   :  { %v128_v19 = vsel %vm68_vm0, %v3645_v18, 0.0 }
  0xa4   :  { %129 = vadd.xlane.f32.xlu0 %v128_v19 }
  0xa6   :  { %v107_v20 = vpop.f32.mrf.mxu0 }
  0xa7   :  { %v108_v21 = vadd.f32 %v3271_v9, %v107_v20 }
  0xa9   :  { %v3649_v22 = vadd.f32 %v111_v11, %v108_v21  ;;  %v3272_v11 = vld [vmem:[%s4831_s4] ss:$0 sm:$0xff] }
  0xab   :  { %v131_v24 = vsel %vm68_vm0, %v3649_v22, 0.0 }
  0xac   :  { %132 = vadd.xlane.f32.xlu1 %v131_v24 }
  0xb4   :  { %123 = vadd.xlane.f32.xlu1 %v122_v26 }
 0x10f   :  { %v127_v34 = vpop.xlane.xlu0 %126 }
 0x110   :  { %v142_v35 = vmul.f32 %v3657_v33, %v127_v34 }
 0x112   :  { %v146_v36 = vsub.f32 %v3638_v13, %v142_v35 }
 0x114   :  { %v150_v37 = vmul.f32 %v146_v36, %v146_v36 }
 0x116   :  { %v156_v38 = vsel %vm68_vm0, %v150_v37, 0.0 }
 0x117   :  { %157 = vadd.xlane.f32.xlu2 %v156_v38  ;;  %v130_v39 = vpop.xlane.xlu0 %129 }
 0x118   :  { %v143_v40 = vmul.f32 %v3657_v33, %v130_v39 }
 0x11a   :  { %v3664_v41 = vsub.f32 %v3645_v18, %v143_v40 }
 0x11c   :  { %v151_v42 = vmul.f32 %v3664_v41, %v3664_v41 }
 0x11e   :  { %v159_v43 = vsel %vm68_vm0, %v151_v42, 0.0 }
 0x11f   :  { %v133_v44 = vpop.xlane.xlu1 %132  ;;  %160 = vadd.xlane.f32.xlu2 %v159_v43 }
 0x120   :  { %v144_v45 = vmul.f32 %v3657_v33, %v133_v44 }
 0x122   :  { %v3671_v46 = vsub.f32 %v3649_v22, %v144_v45 }
 0x124   :  { %v152_v47 = vmul.f32 %v3671_v46, %v3671_v46 }
 0x126   :  { %v162_v48 = vsel %vm68_vm0, %v152_v47, 0.0 }
 0x127   :  { %163 = vadd.xlane.f32.xlu0 %v162_v48  ;;  %v124_v49 = vpop.xlane.xlu1 %123 }
 0x128   :  { %v141_v50 = vmul.f32 %v3657_v33, %v124_v49 }
 0x12a   :  { %v3678_v51 = vsub.f32 %v3653_v25, %v141_v50 }
 0x12c   :  { %v149_v52 = vmul.f32 %v3678_v51, %v3678_v51 }
 0x12e   :  { %v153_v53 = vsel %vm68_vm0, %v149_v52, 0.0 }
 0x12f   :  { %154 = vadd.xlane.f32.xlu1 %v153_v53 }
 0x18a   :  { %v158_v58 = vpop.xlane.xlu2 %157 }
 0x18b   :  { %v166_v59 = vmul.f32 %v158_v58, %v3657_v33 }
 0x18d   :  { %v170_v60 = vadd.f32 1e-05, %v166_v59 }
 0x18f   :  { %3290 = vrsqrt.f32 %v170_v60  ;;  %vm189_vm3 = vweird.f32 %v170_v60 }
 0x192   :  { %v161_v61 = vpop.xlane.xlu2 %160 }
 0x193   :  { %v167_v62 = vmul.f32 %v161_v61, %v3657_v33 }
 0x195   :  { %v3291_v63 = vpop.eup %3290  ;;  %v171_v0 = vadd.f32 1e-05, %v167_v62 }
 0x196   :  { %v184_v1 = vmul.f32 %v3291_v63, %v170_v60  ;;  %vm190_vm2 = vweird.f32 %v3291_v63 }
 0x197   :  { %3292 = vrsqrt.f32 %v171_v0  ;;  %vm191_vm4 = vmor %vm189_vm3, %vm190_vm2  ;;  %vm199_vm6 = vweird.f32 %v171_v0 }
 0x198   :  { %v185_v2 = vmul.f32 %v3291_v63, %v184_v1 }
 0x19a   :  { %v186_v3 = vmul.f32 0.5, %v185_v2  ;;  %v164_v4 = vpop.xlane.xlu0 %163 }
 0x19b   :  { %v168_v5 = vmul.f32 %v164_v4, %v3657_v33 }
 0x19c   :  { %v187_v6 = vsub.f32 1.5, %v186_v3 }
 0x19d   :  { %v3293_v7 = vpop.eup %3292  ;;  %v172_v8 = vadd.f32 1e-05, %v168_v5 }
 0x19e   :  { %v188_v9 = vmul.f32 %v3291_v63, %v187_v6  ;;  %v194_v10 = vmul.f32 %v3293_v7, %v171_v0  ;;  %vm200_vm5 = vweird.f32 %v3293_v7 }
 0x19f   :  { %3294 = vrsqrt.f32 %v172_v8  ;;  %vm201_vm7 = vmor %vm199_vm6, %vm200_vm5  ;;  %vm209_vm9 = vweird.f32 %v172_v8 }
 0x1a0   :  { %v195_v12 = vmul.f32 %v3293_v7, %v194_v10  ;;  %v192_v14 = vsel %vm191_vm4, %v3291_v63, %v188_v9 }
 0x1a1   :  { %v214_v15 = vmul.f32 %v192_v14, %v146_v36 }
 0x1a2   :  { %v196_v17 = vmul.f32 0.5, %v195_v12  ;;  %v155_v19 = vpop.xlane.xlu1 %154 }
 0x1a3   :  { %v165_v20 = vmul.f32 %v155_v19, %v3657_v33  ;;  %v221_v21 = vmul.f32 %v3272_v11, %v214_v15 }
 0x1a4   :  { %v197_v23 = vsub.f32 1.5, %v196_v17 }
 0x1a5   :  { %v3295_v24 = vpop.eup %3294  ;;  %v169_v26 = vadd.f32 1e-05, %v165_v20  ;;  %v228_v27 = vadd.f32 %v3273_v16, %v221_v21 }
 0x1a6   :  { %v198_v28 = vmul.f32 %v3293_v7, %v197_v23  ;;  %v204_v29 = vmul.f32 %v3295_v24, %v172_v8  ;;  %vm210_vm8 = vweird.f32 %v3295_v24 }
 0x1a7   :  { %3296 = vrsqrt.f32 %v169_v26  ;;  %3003 = vmatmul.msk.f32.vlgmr.msra.gmra.mxu1 %vm68_vm0, %v228_v27  ;;  %vm211_vm10 = vmor %vm209_vm9, %vm210_vm8  ;;  %vm179_vm12 = vweird.f32 %v169_v26 }
 0x1a8   :  { %v205_v30 = vmul.f32 %v3295_v24, %v204_v29  ;;  %v202_v31 = vsel %vm201_vm7, %v3293_v7, %v198_v28 }
 0x1a9   :  { %v215_v32 = vmul.f32 %v202_v31, %v3664_v41 }
 0x1aa   :  { %v206_v34 = vmul.f32 0.5, %v205_v30 }
 0x1ab   :  { %v222_v35 = vmul.f32 %v3272_v11, %v215_v32 }
 0x1ac   :  { %v207_v36 = vsub.f32 1.5, %v206_v34 }
 0x1ad   :  { %v3297_v37 = vpop.eup %3296  ;;  %v229_v38 = vadd.f32 %v3273_v16, %v222_v35 }
 0x1ae   :  { %v208_v39 = vmul.f32 %v3295_v24, %v207_v36  ;;  %v174_v40 = vmul.f32 %v3297_v37, %v169_v26  ;;  %vm180_vm11 = vweird.f32 %v3297_v37 }
 0x1af   :  { %3004 = vmatmul.msk.f32.gmra.mxu1 %vm68_vm0, %v229_v38  ;;  %vm181_vm13 = vmor %vm179_vm12, %vm180_vm11 }
 0x1b0   :  { %v175_v42 = vmul.f32 %v3297_v37, %v174_v40  ;;  %v212_v43 = vsel %vm211_vm10, %v3295_v24, %v208_v39 }
 0x1b1   :  { %v216_v44 = vmul.f32 %v212_v43, %v3671_v46 }
 0x1b2   :  { %v176_v45 = vmul.f32 0.5, %v175_v42 }
 0x1b3   :  { %v223_v47 = vmul.f32 %v3272_v11, %v216_v44 }
 0x1b4   :  { %v177_v48 = vsub.f32 1.5, %v176_v45 }
 0x1b5   :  { %v230_v41 = vadd.f32 %v3273_v16, %v223_v47 }
 0x1b6   :  { %v178_v49 = vmul.f32 %v3297_v37, %v177_v48 }
 0x1b7   :  { %3005 = vmatmul.msk.f32.gmra.mxu1 %vm68_vm0, %v230_v41 }
 0x1b8   :  { %v182_v50 = vsel %vm181_vm13, %v3297_v37, %v178_v49 }
 0x1b9   :  { %v213_v52 = vmul.f32 %v182_v50, %v3678_v51 }
 0x1bb   :  { %v220_v53 = vmul.f32 %v3272_v11, %v213_v52 }
 0x1bd   :  { %v227_v54 = vadd.f32 %v3273_v16, %v220_v53 }
 0x1bf   :  { %3002 = vmatmul.msk.f32.vlgmr.msrb.gmra.mxu0 %vm68_vm0, %v227_v54 }
 0x224   :  { %v263_v55 = vpop.f32.mrf.mxu1 }
 0x225   :  { %278 = vrot.lane.b32.xlu2 %v263_v55, %s3503_s28 }
 0x22c   :  { %v3721_v46 = vpop.f32.mrf.mxu1 }
 0x22d   :  { %280 = vrot.lane.b32.xlu2 %v3721_v46, %s3503_s28 }
 0x234   :  { %v3725_v58 = vpop.f32.mrf.mxu1 }
 0x235   :  { %286 = vrot.lane.b32.xlu2 %v263_v55, %s3504_s29  ;;  %282 = vrot.lane.b32.xlu0 %v3725_v58, %s3503_s28 }
 0x23c   :  { %v260_v51 = vpop.f32.mrf.mxu0 }
 0x23d   :  { %302 = vrot.lane.b32.xlu0 %v263_v55, %s3505_s0  ;;  %284 = vrot.lane.b32.xlu2 %v260_v51, %s3504_s29  ;;  %v3176_v9 = vpack.i.bf16 %v260_v51, %v263_v55 }
 0x23e   :  { %276 = vrot.lane.b32.xlu1 %v260_v51, %s3503_s28 }
 0x245   :  { %336 = vrot.lane.b32.xlu2 %v3721_v46, %s3505_s0  ;;  %300 = vrot.lane.b32.xlu0 %v260_v51, %s3505_s0 }
 0x246   :  { %294 = vrot.lane.b32.xlu1 %v263_v55, %s3506_s30 }
 0x24d   :  { %338 = vrot.lane.b32.xlu0 %v3725_v58, %s3505_s0 }
 0x24e   :  { %292 = vrot.lane.b32.xlu1 %v260_v51, %s3506_s30 }
 0x255   :  { %296 = vrot.lane.b32.xlu0 %v3721_v46, %s3506_s30 }
 0x256   :  { %298 = vrot.lane.b32.xlu1 %v3725_v58, %s3506_s30 }
 0x25d   :  { %290 = vrot.lane.b32.xlu0 %v3725_v58, %s3504_s29 }
 0x265   :  { %288 = vrot.lane.b32.xlu0 %v3721_v46, %s3504_s29 }
 0x27f   :  { %v279_v59 = vpop.permute.xlu2 %278 }
 0x280   :  { %373 = vrot.lane.b32.xlu2 %v279_v59, %s3505_s0 }
 0x287   :  { %v281_v60 = vpop.permute.xlu2 %280 }
 0x28f   :  { %v3749_v61 = vpop.permute.xlu2 %286 }
 0x297   :  { %v3751_v62 = vpop.permute.xlu2 %284 }
 0x298   :  { %441 = vrot.lane.b32.xlu0 %v3751_v62, %s3505_s0 }
 0x29f   :  { %v337_v6 = vpop.permute.xlu2 %336 }
 0x2a7   :  { %v283_v63 = vpop.permute.xlu0 %282 }
 0x2a8   :  { %408 = vrot.lane.b32.xlu1 %v283_v63, %s3505_s0 }
 0x2af   :  { %v303_v0 = vpop.permute.xlu0 %302 }
 0x2b0   :  { %v277_v1 = vpop.permute.xlu1 %276  ;;  %3006 = vmatpush.xpose.msk.msra.mxu2 %vm304_vm14, %v303_v0  ;;  %3157 = vmatpush.xpose.msk.msra.mxu3 %vm304_vm14, %v303_v0 }
 0x2b1   :  { %406 = vrot.lane.b32.xlu1 %v281_v60, %s3505_s0  ;;  %371 = vrot.lane.b32.xlu2 %v277_v1, %s3505_s0  ;;  %v3171_v15 = vpack.i.bf16 %v277_v1, %v279_v59 }
 0x2b7   :  { %v301_v2 = vpop.permute.xlu0 %300 }
 0x2b8   :  { %v295_v3 = vpop.permute.xlu1 %294  ;;  %3007 = vmatpush.xpose.msk.msra.mxu2 %vm304_vm14, %v301_v2  ;;  %3158 = vmatpush.xpose.msk.msra.mxu3 %vm304_vm14, %v301_v2 }
 0x2b9   :  { %443 = vrot.lane.b32.xlu2 %v3749_v61, %s3505_s0  ;;  %513 = vrot.lane.b32.xlu1 %v295_v3, %s3505_s0  ;;  %v3186_v11 = vpack.i.bf16 %v295_v3, %v283_v63 }
 0x2bb   :  { %3008 = vmatmul.msk.f32.vlgmr.msra.gmra.mxu2 %vm304_vm14, %v260_v51  ;;  %3009 = vmatmul.msk.f32.vlgmr.msra.gmra.mxu3 %vm304_vm14, %v263_v55 }
 0x2bf   :  { %v339_v4 = vpop.permute.xlu0 %338 }
 0x2c0   :  { %v293_v5 = vpop.permute.xlu1 %292  ;;  %3010 = vmatpush.xpose.msk.msrb.mxu3 %vm304_vm14, %v339_v4 }
 0x2c1   :  { %511 = vrot.lane.b32.xlu2 %v293_v5, %s3505_s0  ;;  %v3181_v16 = vpack.i.bf16 %v293_v5, %v281_v60 }
 0x2c4   :  { %3011 = vmatpush.xpose.msk.msrb.mxu3 %vm304_vm14, %v337_v6 }
 0x2c7   :  { %3012 = vmatmul.msk.f32.vlgmr.msrb.gmra.mxu3 %vm304_vm14, %v3721_v46  ;;  %v3772_v7 = vpop.permute.xlu0 %296 }
 0x2c8   :  { %v3774_v8 = vpop.permute.xlu1 %298  ;;  %546 = vrot.lane.b32.xlu0 %v3772_v7, %s3505_s0 }
 0x2c9   :  { %548 = vrot.lane.b32.xlu1 %v3774_v8, %s3505_s0 }
 0x2cf   :  { %3013 = vmatmul.msk.f32.gmra.mxu3 %vm304_vm14, %v3725_v58  ;;  %v3782_v10 = vpop.permute.xlu0 %290 }
 0x2d0   :  { %3177 = vrot.lane.b32.xlu0 %v3176_v9, %s3507_s18  ;;  %478 = vrot.lane.b32.xlu2 %v3782_v10, %s3505_s0 }
 0x2d7   :  { %v3787_v12 = vpop.permute.xlu0 %288 }
 0x2d8   :  { %3187 = vrot.lane.b32.xlu2 %v3186_v11, %s3507_s18  ;;  %476 = vrot.lane.b32.xlu1 %v3787_v12, %s3505_s0 }
 0x2da   :  { %v374_v14 = vpop.permute.xlu2 %373 }
 0x2db   :  { %3014 = vmatpush.xpose.msk.msrb.mxu2 %vm304_vm14, %v374_v14 }
 0x2e0   :  { %3172 = vrot.lane.b32.xlu1 %v3171_v15, %s3507_s18 }
 0x2e8   :  { %3182 = vrot.lane.b32.xlu1 %v3181_v16, %s3507_s18 }
 0x30a   :  { %v442_v24 = vpop.permute.xlu0 %441 }
 0x30b   :  { %v372_v17 = vpop.permute.xlu2 %371 }
 0x30c   :  { %3015 = vmatpush.xpose.msk.msrb.mxu2 %vm304_vm14, %v372_v17 }
 0x30f   :  { %3016 = vmatmul.msk.f32.vlgmr.msrb.gmra.mxu2 %vm304_vm14, %v277_v1 }
 0x313   :  { %v444_v19 = vpop.permute.xlu2 %443 }
 0x317   :  { %3017 = vmatmul.msk.f32.gmra.mxu2 %vm304_vm14, %v279_v59 }
 0x31a   :  { %v409_v20 = vpop.permute.xlu1 %408 }
 0x31b   :  { %3018 = vmatpush.xpose.msk.msra.mxu3 %vm304_vm14, %v409_v20  ;;  %v512_v21 = vpop.permute.xlu2 %511 }
 0x323   :  { %v407_v23 = vpop.permute.xlu1 %406 }
 0x324   :  { %3019 = vmatpush.xpose.msk.msra.mxu3 %vm304_vm14, %v407_v23 }
 0x327   :  { %3020 = vmatmul.msk.f32.vlgmr.msra.gmra.mxu3 %vm304_vm14, %v281_v60 }
 0x328   :  { %3022 = vmatpush.xpose.msk.msrb.mxu3 %vm304_vm14, %v444_v19 }
 0x32a   :  { %v479_v26 = vpop.permute.xlu2 %478 }
 0x32b   :  { %v514_v27 = vpop.permute.xlu1 %513  ;;  %3026 = vmatpush.xpose.msk.msrb.mxu1 %vm304_vm14, %v479_v26 }
 0x32c   :  { %3023 = vmatpush.xpose.msk.msrb.mxu3 %vm304_vm14, %v442_v24  ;;  %3030 = vmatpush.xpose.msk.msra.mxu2 %vm304_vm14, %v514_v27 }
 0x32f   :  { %3021 = vmatmul.msk.f32.gmra.mxu3 %vm304_vm14, %v283_v63 }
 0x330   :  { %3031 = vmatpush.xpose.msk.msra.mxu2 %vm304_vm14, %v512_v21 }
 0x332   :  { %v3188_v30 = vpop.permute.xlu2 %3187 }
 0x333   :  { %3032 = vmatmul.msk.f32.vlgmr.msra.gmra.mxu2 %vm304_vm14, %v293_v5  ;;  %v3189_v34 = vunpack.i.l.bf16 %v3188_v30  ;;  %v3190_v49 = vunpack.i.h.bf16 %v3188_v30 }
 0x337   :  { %3024 = vmatmul.msk.f32.vlgmr.msrb.gmra.mxu3 %vm304_vm14, %v3751_v62 }
 0x33a   :  { %v547_v28 = vpop.permute.xlu0 %546 }
 0x33b   :  { %3033 = vmatmul.msk.f32.gmra.mxu2 %vm304_vm14, %v295_v3  ;;  %v549_v29 = vpop.permute.xlu1 %548 }
 0x33c   :  { %3034 = vmatpush.xpose.msk.msra.mxu3 %vm304_vm14, %v549_v29 }
 0x33e   :  { %v330_v31 = vpop.f32.mrf.mxu2  ;;  %v333_v32 = vpop.f32.mrf.mxu3 }
 0x33f   :  { %3025 = vmatmul.msk.f32.gmra.mxu3 %vm304_vm14, %v3749_v61  ;;  %v585_v35 = vsel %vm581_vm15, %v333_v32, -inf  ;;  %v582_v36 = vsel %vm581_vm15, %v330_v31, -inf }
 0x340   :  { %3035 = vmatpush.xpose.msk.msra.mxu3 %vm304_vm14, %v547_v28  ;;  %586 = vmax.xlane.f32.xlu0 %v585_v35 }
 0x341   :  { %583 = vmax.xlane.f32.xlu2 %v582_v36 }
 0x342   :  { %v3178_v37 = vpop.permute.xlu0 %3177 }
 0x343   :  { %v3179_v38 = vunpack.i.l.bf16 %v3178_v37  ;;  %v3180_v39 = vunpack.i.h.bf16 %v3178_v37 }
 0x344   :  { %937 = vmatpush.msrb.mxu3 %v3189_v34 }
 0x345   :  { %832 = vmatpush.msra.mxu0 %v3179_v38 }
 0x347   :  { %3036 = vmatmul.msk.f32.vlgmr.msra.gmra.mxu3 %vm304_vm14, %v3772_v7  ;;  %833 = vmatpush.msra.mxu0 %v3180_v39 }
 0x34a   :  { %v3819_v40 = vpop.f32.mrf.mxu3  ;;  %v477_v42 = vpop.permute.xlu1 %476 }
 0x34b   :  { %3027 = vmatpush.xpose.msk.msrb.mxu1 %vm304_vm14, %v477_v42  ;;  %v588_v43 = vsel %vm581_vm15, %v3819_v40, -inf }
 0x34c   :  { %589 = vmax.xlane.f32.xlu0 %v588_v43 }
 0x34e   :  { %3028 = vmatmul.msk.f32.vlgmr.msrb.gmra.mxu1 %vm304_vm14, %v3787_v12 }
 0x34f   :  { %3037 = vmatmul.msk.f32.gmra.mxu3 %vm304_vm14, %v3774_v8 }
 0x352   :  { %v368_v44 = vpop.f32.mrf.mxu3  ;;  %v3173_v45 = vpop.permute.xlu1 %3172 }
 0x353   :  { %v3174_v47 = vunpack.i.l.bf16 %v3173_v45  ;;  %v591_v48 = vsel %vm581_vm15, %v368_v44, -inf  ;;  %v3175_v41 = vunpack.i.h.bf16 %v3173_v45 }
 0x354   :  { %592 = vmax.xlane.f32.xlu2 %v591_v48 }
 0x355   :  { %902 = vmatpush.msrb.mxu2 %v3174_v47 }
 0x356   :  { %3029 = vmatmul.msk.f32.gmra.mxu1 %vm304_vm14, %v3782_v10 }
 0x357   :  { %903 = vmatpush.msrb.mxu2 %v3175_v41  ;;  %v3191_v41 = vpack.i.bf16 %v3749_v61, %v3725_v58 }
 0x359   :  { %1042 = vmatpush.msra.mxu2 %v3190_v49 }
 0x35a   :  { %v3183_v50 = vpop.permute.xlu1 %3182 }
 0x35b   :  { %v3185_v52 = vunpack.i.h.bf16 %v3183_v50  ;;  %v3184_v53 = vunpack.i.l.bf16 %v3183_v50 }
 0x35d   :  { %938 = vmatpush.msrb.mxu3 %v3184_v53  ;;  %1043 = vmatpush.msra.mxu2 %v3185_v52 }
 0x392   :  { %v3831_v54 = vpop.f32.mrf.mxu2 }
 0x393   :  { %v594_v55 = vsel %vm581_vm15, %v3831_v54, -inf }
 0x394   :  { %595 = vmax.xlane.f32.xlu0 %v594_v55 }
 0x39a   :  { %v3835_v51 = vpop.f32.mrf.mxu2 }
 0x39b   :  { %v597_v59 = vsel %vm581_vm15, %v3835_v51, -inf }
 0x39c   :  { %598 = vmax.xlane.f32.xlu1 %v597_v59 }
 0x3aa   :  { %v3839_v60 = vpop.f32.mrf.mxu3 }
 0x3ab   :  { %v600_v37 = vsel %vm581_vm15, %v3839_v60, -inf }
 0x3b2   :  { %v3841_v0 = vpop.f32.mrf.mxu3 }
 0x3b3   :  { %v587_v5 = vpop.xlane.xlu0 %586  ;;  %v603_v23 = vsel %vm581_vm15, %v3841_v0, -inf }
 0x3b4   :  { %v584_v63 = vpop.xlane.xlu2 %583  ;;  %v631_v9 = vsub.f32 %v333_v32, %v587_v5 }
 0x3b5   :  { %v630_v1 = vsub.f32 %v330_v31, %v584_v63 }
 0x3b6   :  { %v3849_v11 = vpop.f32.mrf.mxu2  ;;  %v648_v14 = vmul.f32 1.442695, %v631_v9 }
 0x3b7   :  { %v646_v2 = vmul.f32 1.442695, %v630_v1  ;;  %v618_v15 = vsel %vm581_vm15, %v3849_v11, -inf }
 0x3b9   :  { %3298 = vpow2.f32 %v646_v2 }
 0x3ba   :  { %v3845_v4 = vpop.f32.mrf.mxu3  ;;  %3300 = vpow2.f32 %v648_v14 }
 0x3bb   :  { %v606_v47 = vsel %vm581_vm15, %v3845_v4, -inf }
 0x3be   :  { %v3874_v36 = vpop.f32.mrf.mxu2 }
 0x3bf   :  { %v3843_v3 = vpop.eup %3298  ;;  %v590_v20 = vpop.xlane.xlu0 %589  ;;  %v621_v38 = vsel %vm581_vm15, %v3874_v36, -inf }
 0x3c0   :  { %v678_v6 = vsel %vm581_vm15, %v3843_v3, 0.0  ;;  %v3861_v24 = vpop.eup %3300  ;;  %v632_v26 = vsub.f32 %v3819_v40, %v590_v20 }
 0x3c1   :  { %679 = vadd.xlane.f32.xlu1 %v678_v6  ;;  %v681_v30 = vsel %vm581_vm15, %v3861_v24, 0.0 }
 0x3c2   :  { %v3853_v16 = vpop.f32.mrf.mxu3  ;;  %v650_v32 = vmul.f32 1.442695, %v632_v26 }
 0x3c3   :  { %v609_v35 = vsel %vm581_vm15, %v3853_v16, -inf }
 0x3c4   :  { %3302 = vpow2.f32 %v650_v32 }
 0x3c7   :  { %v593_v21 = vpop.xlane.xlu2 %592 }
 0x3c8   :  { %v633_v27 = vsub.f32 %v368_v44, %v593_v21 }
 0x3c9   :  { %619 = vmax.xlane.f32.xlu1 %v618_v15 }
 0x3ca   :  { %v3864_v28 = vpop.f32.mrf.mxu3  ;;  %v652_v34 = vmul.f32 1.442695, %v633_v27  ;;  %v3882_v40 = vpop.eup %3302 }
 0x3cb   :  { %v3855_v17 = vpop.f32.mrf.mxu1  ;;  %v684_v44 = vsel %vm581_vm15, %v3882_v40, 0.0  ;;  %v624_v48 = vsel %vm581_vm15, %v3864_v28, -inf }
 0x3cc   :  { %v612_v19 = vsel %vm581_vm15, %v3855_v17, -inf  ;;  %3304 = vpow2.f32 %v652_v34 }
 0x3cd   :  { %613 = vmax.xlane.f32.xlu2 %v612_v19 }
 0x3d1   :  { %604 = vmax.xlane.f32.xlu1 %v603_v23 }
 0x3d2   :  { %v3880_v39 = vpop.f32.mrf.mxu3  ;;  %v3886_v43 = vpop.eup %3304 }
 0x3d3   :  { %v3866_v29 = vpop.f32.mrf.mxu1  ;;  %v627_v42 = vsel %vm581_vm15, %v3880_v39, -inf  ;;  %v687_v45 = vsel %vm581_vm15, %v3886_v43, 0.0 }
 0x3d4   :  { %v615_v31 = vsel %vm581_vm15, %v3866_v29, -inf }
 0x3d5   :  { %682 = vadd.xlane.f32.xlu2 %v681_v30  ;;  %616 = vmax.xlane.f32.xlu0 %v615_v31 }
 0x3d9   :  { %610 = vmax.xlane.f32.xlu1 %v609_v35 }
 0x3dd   :  { %601 = vmax.xlane.f32.xlu2 %v600_v37  ;;  %622 = vmax.xlane.f32.xlu0 %v621_v38 }
 0x3e1   :  { %628 = vmax.xlane.f32.xlu1 %v627_v42 }
 0x3e5   :  { %685 = vadd.xlane.f32.xlu2 %v684_v44  ;;  %688 = vadd.xlane.f32.xlu0 %v687_v45 }
 0x3ed   :  { %607 = vmax.xlane.f32.xlu2 %v606_v47  ;;  %625 = vmax.xlane.f32.xlu0 %v624_v48 }
 0x401   :  { %3192 = vrot.lane.b32.xlu0 %v3191_v41, %s3507_s18 }
 0x407   :  { %v596_v49 = vpop.xlane.xlu0 %595 }
 0x408   :  { %v634_v50 = vsub.f32 %v3831_v54, %v596_v49 }
 0x40a   :  { %v654_v52 = vmul.f32 1.442695, %v634_v50 }
 0x40c   :  { %3306 = vpow2.f32 %v654_v52 }
 0x40f   :  { %v599_v59 = vpop.xlane.xlu1 %598 }
 0x410   :  { %v635_v63 = vsub.f32 %v3835_v51, %v599_v59 }
 0x412   :  { %v3900_v53 = vpop.eup %3306  ;;  %v656_v1 = vmul.f32 1.442695, %v635_v63 }
 0x413   :  { %v690_v55 = vsel %vm581_vm15, %v3900_v53, 0.0 }
 0x414   :  { %691 = vadd.xlane.f32.xlu2 %v690_v55  ;;  %3308 = vpow2.f32 %v656_v1 }
 0x41a   :  { %v3905_v2 = vpop.eup %3308 }
 0x41b   :  { %v693_v58 = vsel %vm581_vm15, %v3905_v2, 0.0 }
 0x42b   :  { %694 = vadd.xlane.f32.xlu0 %v693_v58 }
 0x434   :  { %v680_v61 = vpop.xlane.xlu1 %679 }
 0x435   :  { %3310 = vrcp.f32 %v680_v61 }
 0x43b   :  { %v3311_v54 = vpop.eup %3310 }
 0x43c   :  { %v742_v5 = vmul.f32 %v3311_v54, %v680_v61  ;;  %v620_v6 = vpop.xlane.xlu1 %619 }
 0x43d   :  { %v642_v9 = vsub.f32 %v3849_v11, %v620_v6 }
 0x43e   :  { %v758_v14 = vsub.f32 2.0, %v742_v5 }
 0x43f   :  { %v670_v15 = vmul.f32 1.442695, %v642_v9 }
 0x440   :  { %v774_v19 = vmul.f32 %v3311_v54, %v758_v14  ;;  %v614_v20 = vpop.xlane.xlu2 %613  ;;  %v3196_v14 = vpack.i.bf16 %v3751_v62, %v3721_v46 }
 0x441   :  { %3312 = vpow2.f32 %v670_v15  ;;  %v640_v44 = vsub.f32 %v3855_v17, %v614_v20 }
 0x442   :  { %v790_v51 = vmul.f32 %v3843_v3, %v774_v19 }
 0x443   :  { %v666_v49 = vmul.f32 1.442695, %v640_v44 }
 0x444   :  { %3038 = vmatmul.msk.f32.vlgmr.msra.gmra.mxu0 %vm581_vm15, %v790_v51  ;;  %v605_v21 = vpop.xlane.xlu1 %604 }
 0x445   :  { %v637_v23 = vsub.f32 %v3841_v0, %v605_v21 }
 0x447   :  { %v3913_v26 = vpop.eup %3312  ;;  %v660_v27 = vmul.f32 1.442695, %v637_v23 }
 0x448   :  { %v683_v30 = vpop.xlane.xlu2 %682  ;;  %v617_v31 = vpop.xlane.xlu0 %616  ;;  %v714_v11 = vsel %vm581_vm15, %v3913_v26, 0.0 }
 0x449   :  { %3314 = vpow2.f32 %v660_v27  ;;  %715 = vadd.xlane.f32.xlu2 %v714_v11  ;;  %v641_v51 = vsub.f32 %v3866_v29, %v617_v31  ;;  %v3206_v27 = vpack.i.bf16 %v3787_v12, %v3782_v10 }
 0x44a   :  { %3316 = vrcp.f32 %v683_v30 }
 0x44f   :  { %v3917_v32 = vpop.eup %3314 }
 0x450   :  { %v3317_v34 = vpop.eup %3316  ;;  %v602_v3 = vpop.xlane.xlu2 %601  ;;  %v699_v37 = vsel %vm581_vm15, %v3917_v32, 0.0 }
 0x451   :  { %v623_v35 = vpop.xlane.xlu0 %622  ;;  %v743_v0 = vmul.f32 %v3317_v34, %v683_v30  ;;  %v636_v38 = vsub.f32 %v3839_v60, %v602_v3  ;;  %700 = vadd.xlane.f32.xlu1 %v699_v37 }
 0x452   :  { %v643_v42 = vsub.f32 %v3874_v36, %v623_v35 }
 0x453   :  { %v759_v45 = vsub.f32 2.0, %v743_v0  ;;  %v658_v47 = vmul.f32 1.442695, %v636_v38 }
 0x454   :  { %v672_v48 = vmul.f32 1.442695, %v643_v42 }
 0x455   :  { %3318 = vpow2.f32 %v658_v47  ;;  %v775_v41 = vmul.f32 %v3317_v34, %v759_v45  ;;  %v3201_v45 = vpack.i.bf16 %v3772_v7, %v3774_v8 }
 0x456   :  { %3320 = vpow2.f32 %v672_v48 }
 0x457   :  { %v791_v50 = vmul.f32 %v3861_v24, %v775_v41  ;;  %3322 = vpow2.f32 %v666_v49  ;;  %v611_v24 = vpop.xlane.xlu1 %610 }
 0x458   :  { %v3925_v52 = vpop.xlane.xlu2 %685  ;;  %v639_v61 = vsub.f32 %v3853_v16, %v611_v24 }
 0x459   :  { %3039 = vmatmul.msk.f32.gmra.mxu0 %vm581_vm15, %v791_v50  ;;  %v3936_v59 = vpop.xlane.xlu0 %688 }
 0x45a   :  { %v664_v6 = vmul.f32 1.442695, %v639_v61 }
 0x45b   :  { %v3928_v55 = vpop.eup %3318 }
 0x45c   :  { %v3930_v60 = vpop.eup %3320  ;;  %v696_v17 = vsel %vm581_vm15, %v3928_v55, 0.0 }
 0x45d   :  { %697 = vadd.xlane.f32.xlu0 %v696_v17  ;;  %v717_v36 = vsel %vm581_vm15, %v3930_v60, 0.0  ;;  %v3938_v1 = vpop.eup %3322 }
 0x45e   :  { %718 = vadd.xlane.f32.xlu2 %v717_v36  ;;  %v708_v5 = vsel %vm581_vm15, %v3938_v1, 0.0 }
 0x45f   :  { %v629_v31 = vpop.xlane.xlu1 %628 }
 0x460   :  { %v608_v63 = vpop.xlane.xlu2 %607  ;;  %v645_v34 = vsub.f32 %v3880_v39, %v629_v31 }
 0x461   :  { %v638_v58 = vsub.f32 %v3845_v4, %v608_v63  ;;  %v626_v9 = vpop.xlane.xlu0 %625 }
 0x462   :  { %v644_v4 = vsub.f32 %v3864_v28, %v626_v9  ;;  %v668_v28 = vmul.f32 1.442695, %v641_v51  ;;  %v676_v35 = vmul.f32 1.442695, %v645_v34 }
 0x463   :  { %v662_v54 = vmul.f32 1.442695, %v638_v58 }
 0x464   :  { %v674_v19 = vmul.f32 1.442695, %v644_v4 }
 0x465   :  { %3324 = vpow2.f32 %v662_v54  ;;  %709 = vadd.xlane.f32.xlu0 %v708_v5 }
 0x466   :  { %3326 = vpow2.f32 %v664_v6 }
 0x467   :  { %3328 = vpow2.f32 %v674_v19 }
 0x468   :  { %3330 = vpow2.f32 %v668_v28 }
 0x46a   :  { %3197 = vrot.lane.b32.xlu1 %v3196_v14, %s3507_s18 }
 0x46b   :  { %v3947_v15 = vpop.eup %3324 }
 0x46c   :  { %v702_v16 = vsel %vm581_vm15, %v3947_v15, 0.0  ;;  %v3952_v20 = vpop.eup %3326 }
 0x46d   :  { %703 = vadd.xlane.f32.xlu2 %v702_v16  ;;  %v705_v62 = vsel %vm581_vm15, %v3952_v20, 0.0  ;;  %v3959_v30 = vpop.eup %3328 }
 0x46e   :  { %v720_v29 = vsel %vm581_vm15, %v3959_v30, 0.0  ;;  %v3964_v11 = vpop.eup %3330 }
 0x46f   :  { %v711_v3 = vsel %vm581_vm15, %v3964_v11, 0.0 }
 0x473   :  { %v3193_v21 = vpop.permute.xlu0 %3192 }
 0x474   :  { %v3195_v23 = vunpack.i.h.bf16 %v3193_v21  ;;  %v3194_v46 = vunpack.i.l.bf16 %v3193_v21 }
 0x475   :  { %706 = vadd.xlane.f32.xlu2 %v705_v62 }
 0x476   :  { %867 = vmatpush.msra.mxu1 %v3194_v46  ;;  %972 = vmatpush.msrb.mxu0 %v3195_v23 }
 0x479   :  { %3207 = vrot.lane.b32.xlu0 %v3206_v27, %s3507_s18 }
 0x47d   :  { %721 = vadd.xlane.f32.xlu2 %v720_v29 }
 0x485   :  { %712 = vadd.xlane.f32.xlu2 %v711_v3 }
 0x487   :  { %v692_v10 = vpop.xlane.xlu2 %691 }
 0x488   :  { %3332 = vrcp.f32 %v692_v10 }
 0x489   :  { %3334 = vpow2.f32 %v676_v35 }
 0x48e   :  { %v3333_v12 = vpop.eup %3332 }
 0x48f   :  { %v746_v37 = vmul.f32 %v3333_v12, %v692_v10  ;;  %v3969_v0 = vpop.eup %3334 }
 0x490   :  { %v723_v44 = vsel %vm581_vm15, %v3969_v0, 0.0 }
 0x491   :  { %v762_v38 = vsub.f32 2.0, %v746_v37 }
 0x493   :  { %v778_v42 = vmul.f32 %v3333_v12, %v762_v38 }
 0x494   :  { %724 = vadd.xlane.f32.xlu1 %v723_v44 }
 0x495   :  { %v794_v39 = vmul.f32 %v3900_v53, %v778_v42 }
 0x497   :  { %3042 = vmatmul.msk.f32.vlgmr.msrb.gmra.mxu2 %vm581_vm15, %v794_v39 }
 0x49d   :  { %3202 = vrot.lane.b32.xlu2 %v3201_v45, %s3507_s18 }
 0x49e   :  { %v695_v47 = vpop.xlane.xlu0 %694 }
 0x49f   :  { %3336 = vrcp.f32 %v695_v47 }
 0x4a5   :  { %v3337_v48 = vpop.eup %3336 }
 0x4a6   :  { %v747_v41 = vmul.f32 %v3337_v48, %v695_v47 }
 0x4a8   :  { %v763_v49 = vsub.f32 2.0, %v747_v41 }
 0x4aa   :  { %v779_v50 = vmul.f32 %v3337_v48, %v763_v49 }
 0x4ac   :  { %v795_v17 = vmul.f32 %v3905_v2, %v779_v50 }
 0x4ae   :  { %3043 = vmatmul.msk.f32.gmra.mxu2 %vm581_vm15, %v795_v17 }
 0x4bc   :  { %v716_v36 = vpop.xlane.xlu2 %715 }
 0x4bd   :  { %3338 = vrcp.f32 %v716_v36 }
 0x4be   :  { %3340 = vrcp.f32 %v3925_v52 }
 0x4bf   :  { %3342 = vrcp.f32 %v3936_v59 }
 0x4c3   :  { %v3339_v53 = vpop.eup %3338 }
 0x4c4   :  { %v754_v24 = vmul.f32 %v3339_v53, %v716_v36  ;;  %v701_v8 = vpop.xlane.xlu1 %700  ;;  %v3341_v61 = vpop.eup %3340 }
 0x4c5   :  { %3344 = vrcp.f32 %v701_v8  ;;  %v744_v5 = vmul.f32 %v3341_v61, %v3925_v52  ;;  %v3343_v6 = vpop.eup %3342 }
 0x4c6   :  { %v770_v63 = vsub.f32 2.0, %v754_v24  ;;  %v745_v51 = vmul.f32 %v3343_v6, %v3936_v59 }
 0x4c7   :  { %v760_v14 = vsub.f32 2.0, %v744_v5 }
 0x4c8   :  { %v786_v58 = vmul.f32 %v3339_v53, %v770_v63  ;;  %v761_v35 = vsub.f32 2.0, %v745_v51 }
 0x4c9   :  { %v776_v23 = vmul.f32 %v3341_v61, %v760_v14 }
 0x4ca   :  { %v802_v7 = vmul.f32 %v3913_v26, %v786_v58  ;;  %v777_v42 = vmul.f32 %v3343_v6, %v761_v35 }
 0x4cb   :  { %v3345_v9 = vpop.eup %3344  ;;  %v792_v3 = vmul.f32 %v3882_v40, %v776_v23 }
 0x4cc   :  { %3050 = vmatmul.msk.f32.vlgmr.msra.gmra.mxu2 %vm581_vm15, %v802_v7  ;;  %v749_v46 = vmul.f32 %v3345_v9, %v701_v8  ;;  %v793_v39 = vmul.f32 %v3886_v43, %v777_v42  ;;  %v3216_v7 = vpack.i.bf16 %v3699_v57, %v3692_v56 }
 0x4ce   :  { %v765_v10 = vsub.f32 2.0, %v749_v46  ;;  %3217 = vrot.lane.b32.xlu2 %v3216_v7, %s3508_s2 }
 0x4d0   :  { %v698_v2 = vpop.xlane.xlu0 %697  ;;  %v781_v44 = vmul.f32 %v3345_v9, %v765_v10 }
 0x4d1   :  { %3346 = vrcp.f32 %v698_v2  ;;  %v719_v54 = vpop.xlane.xlu2 %718 }
 0x4d2   :  { %3348 = vrcp.f32 %v719_v54 }
 0x4d7   :  { %v3347_v4 = vpop.eup %3346 }
 0x4d8   :  { %v3349_v16 = vpop.eup %3348  ;;  %v748_v19 = vmul.f32 %v3347_v4, %v698_v2  ;;  %v710_v26 = vpop.xlane.xlu0 %709 }
 0x4d9   :  { %v755_v21 = vmul.f32 %v3349_v16, %v719_v54  ;;  %3350 = vrcp.f32 %v710_v26 }
 0x4da   :  { %v764_v62 = vsub.f32 2.0, %v748_v19 }
 0x4db   :  { %v771_v28 = vsub.f32 2.0, %v755_v21 }
 0x4dc   :  { %v780_v27 = vmul.f32 %v3347_v4, %v764_v62  ;;  %v3198_v29 = vpop.permute.xlu1 %3197 }
 0x4dd   :  { %v3200_v31 = vunpack.i.h.bf16 %v3198_v29  ;;  %v3199_v52 = vunpack.i.l.bf16 %v3198_v29  ;;  %v787_v34 = vmul.f32 %v3349_v16, %v771_v28 }
 0x4de   :  { %v796_v12 = vmul.f32 %v3928_v55, %v780_v27  ;;  %v797_v55 = vmul.f32 %v3917_v32, %v781_v44 }
 0x4df   :  { %868 = vmatpush.msra.mxu1 %v3199_v52  ;;  %973 = vmatpush.msrb.mxu0 %v3200_v31  ;;  %v803_v59 = vmul.f32 %v3930_v60, %v787_v34  ;;  %v3351_v37 = vpop.eup %3350 }
 0x4e0   :  { %3040 = vmatmul.msk.f32.vlgmr.msra.gmra.mxu1 %vm581_vm15, %v792_v3  ;;  %v704_v38 = vpop.xlane.xlu2 %703  ;;  %3044 = vmatmul.msk.f32.vlgmr.msrb.gmra.mxu3 %vm581_vm15, %v796_v12  ;;  %v752_v40 = vmul.f32 %v3351_v37, %v710_v26 }
 0x4e1   :  { %3352 = vrcp.f32 %v704_v38  ;;  %3051 = vmatmul.msk.f32.gmra.mxu2 %vm581_vm15, %v803_v59 }
 0x4e2   :  { %v768_v47 = vsub.f32 2.0, %v752_v40 }
 0x4e4   :  { %v784_v49 = vmul.f32 %v3351_v37, %v768_v47 }
 0x4e6   :  { %v800_v32 = vmul.f32 %v3938_v1, %v784_v49 }
 0x4e7   :  { %v3353_v45 = vpop.eup %3352 }
 0x4e8   :  { %v750_v48 = vmul.f32 %v3353_v45, %v704_v38  ;;  %3041 = vmatmul.msk.f32.gmra.mxu1 %vm581_vm15, %v793_v39  ;;  %v707_v60 = vpop.xlane.xlu2 %706  ;;  %3045 = vmatmul.msk.f32.gmra.mxu3 %vm581_vm15, %v797_v55 }
 0x4e9   :  { %3354 = vrcp.f32 %v707_v60 }
 0x4ea   :  { %v766_v41 = vsub.f32 2.0, %v750_v48 }
 0x4eb   :  { %v3208_v50 = vpop.permute.xlu0 %3207 }
 0x4ec   :  { %v782_v17 = vmul.f32 %v3353_v45, %v766_v41  ;;  %v3209_v36 = vunpack.i.l.bf16 %v3208_v50  ;;  %v3210_v24 = vunpack.i.h.bf16 %v3208_v50 }
 0x4ee   :  { %v798_v53 = vmul.f32 %v3947_v15, %v782_v17  ;;  %1007 = vmatpush.msrb.mxu1 %v3209_v36 }
 0x4ef   :  { %v3355_v43 = vpop.eup %3354 }
 0x4f0   :  { %v751_v63 = vmul.f32 %v3355_v43, %v707_v60  ;;  %v722_v58 = vpop.xlane.xlu2 %721  ;;  %3046 = vmatmul.msk.f32.vlgmr.msrb.gmra.mxu0 %vm581_vm15, %v798_v53  ;;  %1008 = vmatpush.msrb.mxu1 %v3210_v24 }
 0x4f1   :  { %3356 = vrcp.f32 %v722_v58  ;;  %3048 = vmatmul.msk.f32.vlgmr.msrb.gmra.mxu1 %vm581_vm15, %v800_v32 }
 0x4f2   :  { %v767_v8 = vsub.f32 2.0, %v751_v63 }
 0x4f4   :  { %v783_v15 = vmul.f32 %v3355_v43, %v767_v8 }
 0x4f6   :  { %v799_v61 = vmul.f32 %v3952_v20, %v783_v15 }
 0x4f7   :  { %v3357_v2 = vpop.eup %3356 }
 0x4f8   :  { %v756_v1 = vmul.f32 %v3357_v2, %v722_v58  ;;  %v713_v54 = vpop.xlane.xlu2 %712  ;;  %3047 = vmatmul.msk.f32.gmra.mxu0 %vm581_vm15, %v799_v61 }
 0x4f9   :  { %3358 = vrcp.f32 %v713_v54 }
 0x4fa   :  { %v772_v5 = vsub.f32 2.0, %v756_v1 }
 0x4fc   :  { %v788_v9 = vmul.f32 %v3357_v2, %v772_v5 }
 0x4fe   :  { %v804_v19 = vmul.f32 %v3959_v30, %v788_v9  ;;  %v3474_v30 = vld [vmem:[%s4833_s6 + $0x18] sm:$0xff] }
 0x4ff   :  { %v3359_v6 = vpop.eup %3358 }
 0x500   :  { %v753_v14 = vmul.f32 %v3359_v6, %v713_v54  ;;  %v3203_v4 = vpop.permute.xlu2 %3202 }
 0x501   :  { %v3204_v16 = vunpack.i.l.bf16 %v3203_v4  ;;  %v3205_v57 = vunpack.i.h.bf16 %v3203_v4 }
 0x502   :  { %v769_v56 = vsub.f32 2.0, %v753_v14 }
 0x503   :  { %1077 = vmatpush.msra.mxu3 %v3204_v16 }
 0x504   :  { %v785_v26 = vmul.f32 %v3359_v6, %v769_v56 }
 0x505   :  { %1078 = vmatpush.msra.mxu3 %v3205_v57  ;;  %v3274_v57 = vld [vmem:[%s4834_s7] ss:$0 sm:$0xff] }
 0x506   :  { %3052 = vmatmul.msk.f32.vlgmr.msra.gmra.mxu3 %vm581_vm15, %v804_v19  ;;  %v801_v20 = vmul.f32 %v3964_v11, %v785_v26  ;;  %v3475_v11 = vld [vmem:[%s4833_s6 + $0x10] sm:$0xff] }
 0x507   :  { %v725_v51 = vpop.xlane.xlu1 %724  ;;  %v3211_v29 = vpack.i.bf16 %v3475_v11, %v3474_v30 }
 0x508   :  { %3360 = vrcp.f32 %v725_v51  ;;  %3049 = vmatmul.msk.f32.gmra.mxu1 %vm581_vm15, %v801_v20 }
 0x509   :  { %3212 = vrot.lane.b32.xlu1 %v3211_v29, %s3508_s2 }
 0x50e   :  { %v3361_v21 = vpop.eup %3360 }
 0x50f   :  { %v757_v23 = vmul.f32 %v3361_v21, %v725_v51 }
 0x511   :  { %v773_v46 = vsub.f32 2.0, %v757_v23 }
 0x513   :  { %v789_v62 = vmul.f32 %v3361_v21, %v773_v46 }
 0x515   :  { %v805_v28 = vmul.f32 %v3969_v0, %v789_v62  ;;  %v835_v0 = vpop.f32.mrf.mxu0 }
 0x517   :  { %3053 = vmatmul.msk.f32.gmra.mxu3 %vm581_vm15, %v805_v28 }
 0x51a   :  { %v905_v27 = vpop.f32.mrf.mxu2 }
 0x51b   :  { %1090 = vrot.lane.b32.xlu2 %v905_v27, %s3509_s3 }
 0x51d   :  { %v838_v3 = vpop.f32.mrf.mxu0 }
 0x528   :  { %v3218_v48 = vpop.permute.xlu2 %3217 }
 0x529   :  { %v3219_v60 = vunpack.i.l.bf16 %v3218_v48  ;;  %v3220_v41 = vunpack.i.h.bf16 %v3218_v48 }
 0x531   :  { %v908_v31 = vpop.f32.mrf.mxu2 }
 0x54f   :  { %v1045_v52 = vpop.f32.mrf.mxu2 }
 0x550   :  { %1122 = vrot.lane.b32.xlu2 %v1045_v52, %s4847_s22 }
 0x55d   :  { %v870_v35 = vpop.f32.mrf.mxu1 }
 0x563   :  { %v940_v37 = vpop.f32.mrf.mxu3 }
 0x564   :  { %v1048_v34 = vpop.f32.mrf.mxu2 }
 0x565   :  { %1124 = vrot.lane.b32.xlu2 %v1048_v34, %s4847_s22  ;;  %v873_v12 = vpop.f32.mrf.mxu1 }
 0x56b   :  { %v943_v42 = vpop.f32.mrf.mxu3 }
 0x56d   :  { %v975_v10 = vpop.f32.mrf.mxu0 }
 0x56e   :  { %1106 = vrot.lane.b32.xlu0 %v975_v10, %s4849_s23  ;;  %v1010_v38 = vpop.f32.mrf.mxu1 }
 0x575   :  { %v978_v59 = vpop.f32.mrf.mxu0  ;;  %v1091_v49 = vpop.permute.xlu2 %1090 }
 0x576   :  { %1108 = vrot.lane.b32.xlu1 %v978_v59, %s4849_s23  ;;  %1092 = vrot.lane.b32.xlu0 %v908_v31, %s3509_s3  ;;  %v1134_v50 = vsel %vm304_vm14, %v835_v0, %v1091_v49  ;;  %v1321_v49 = vld [vmem:[%s4837_s10 + $0x8] sm:$0xff] }
 0x57b   :  { %v3213_v55 = vpop.permute.xlu1 %3212 }
 0x57c   :  { %v3215_v45 = vunpack.i.h.bf16 %v3213_v55  ;;  %v3214_v47 = vunpack.i.l.bf16 %v3213_v55 }
 0x57e   :  { %1110 = vrot.lane.b32.xlu1 %v1010_v38, %s4849_s23  ;;  %1094 = vrot.lane.b32.xlu0 %v940_v37, %s3509_s3 }
 0x57f   :  { %1191 = vmatpush.msra.mxu0 %v3214_v47 }
 0x581   :  { %1192 = vmatpush.msra.mxu0 %v3215_v45 }
 0x583   :  { %1193 = vmatpush.msra.mxu0 %v3219_v60  ;;  %v1323_v60 = vld [vmem:[%s4837_s10 + $0x18] sm:$0xff] }
 0x584   :  { %1352 = vmatpush.msra.mxu1 %v1323_v60 }
 0x585   :  { %v1013_v44 = vpop.f32.mrf.mxu1  ;;  %1194 = vmatpush.msra.mxu0 %v3220_v41  ;;  %v1322_v41 = vld [vmem:[%s4837_s10 + $0x10] sm:$0xff] }
 0x586   :  { %1112 = vrot.lane.b32.xlu1 %v1013_v44, %s4849_s23  ;;  %1096 = vrot.lane.b32.xlu0 %v943_v42, %s3509_s3 }
 0x587   :  { %1353 = vmatpush.msra.mxu1 %v1322_v41  ;;  %v1411_v41 = vld [vmem:[%s4839_s12 + $0x30] sm:$0xff] }
 0x589   :  { %v1080_v40 = vpop.f32.mrf.mxu3  ;;  %1354 = vmatpush.msra.mxu1 %v1321_v49  ;;  %v1410_v49 = vld [vmem:[%s4839_s12 + $0x28] sm:$0xff] }
 0x58a   :  { %1126 = vrot.lane.b32.xlu2 %v1080_v40, %s4847_s22 }
 0x59a   :  { %v1083_v39 = vpop.f32.mrf.mxu3 }
 0x59b   :  { %1128 = vrot.lane.b32.xlu2 %v1083_v39, %s4847_s22  ;;  %s2982_s22 = sshll.u32 %s4843_s16, 4  ;;  %s2983_s22 = int_to_ptr.hbm [resolvable:$true] %s2982_s22 }
 0x5aa   :  { %v1123_v36 = vpop.permute.xlu2 %1122 }
 0x5bf   :  { %v1125_v58 = vpop.permute.xlu2 %1124 }
 0x5e0   :  { %v1107_v17 = vpop.permute.xlu0 %1106 }
 0x5e1   :  { %v1138_v53 = vsel %vm581_vm15, %v1134_v50, %v1107_v17  ;;  %v1320_v50 = vld [vmem:[%s4837_s10] sm:$0xff] }
 0x5e2   :  { %v1143_v24 = vsel %vm1142_vm1, %v1138_v53, %v1123_v36  ;;  %1355 = vmatpush.msra.mxu1 %v1320_v50  ;;  %v1408_v50 = vld [vmem:[%s4839_s12 + $0x18] sm:$0xff] }
 0x5e3   :  { %3054 = vmatmul.msk.f32.vlgmr.msra.gmra.mxu0 %vm68_vm0, %v1143_v24 }
 0x5e4   :  { %v1127_v1 = vpop.permute.xlu2 %1126 }
 0x5e8   :  { %v1109_v43 = vpop.permute.xlu1 %1108  ;;  %v1093_v32 = vpop.permute.xlu0 %1092 }
 0x5e9   :  { %v1135_v63 = vsel %vm304_vm14, %v838_v3, %v1093_v32 }
 0x5ea   :  { %v1139_v7 = vsel %vm581_vm15, %v1135_v63, %v1109_v43 }
 0x5eb   :  { %v1144_v8 = vsel %vm1142_vm1, %v1139_v7, %v1125_v58 }
 0x5ec   :  { %3055 = vmatmul.msk.f32.gmra.mxu0 %vm68_vm0, %v1144_v8 }
 0x5f0   :  { %v1111_v15 = vpop.permute.xlu1 %1110  ;;  %v1095_v61 = vpop.permute.xlu0 %1094 }
 0x5f1   :  { %v1136_v2 = vsel %vm304_vm14, %v870_v35, %v1095_v61 }
 0x5f2   :  { %v1140_v54 = vsel %vm581_vm15, %v1136_v2, %v1111_v15 }
 0x5f3   :  { %v1145_v5 = vsel %vm1142_vm1, %v1140_v54, %v1127_v1 }
 0x5f4   :  { %3056 = vmatmul.msk.f32.gmra.mxu0 %vm68_vm0, %v1145_v5 }
 0x5f5   :  { %v1129_v4 = vpop.permute.xlu2 %1128 }
 0x5f8   :  { %v1113_v6 = vpop.permute.xlu1 %1112  ;;  %v1097_v9 = vpop.permute.xlu0 %1096 }
 0x5f9   :  { %v1137_v14 = vsel %vm304_vm14, %v873_v12, %v1097_v9 }
 0x5fa   :  { %v1141_v16 = vsel %vm581_vm15, %v1137_v14, %v1113_v6  ;;  %v3275_v6 = vld [vmem:[%s4835_s8] ss:$0 sm:$0xff] }
 0x5fb   :  { %v1146_v56 = vsel %vm1142_vm1, %v1141_v16, %v1129_v4 }
 0x5fc   :  { %3057 = vmatmul.msk.f32.gmra.mxu0 %vm68_vm0, %v1146_v56  ;;  %v3276_v56 = vld [vmem:[%s4836_s9] ss:$0 sm:$0xff] }
 0x660   :  { %v1196_v19 = vpop.f32.mrf.mxu0 }
 0x661   :  { %v1197_v26 = vadd.f32 %v3274_v57, %v1196_v19 }
 0x663   :  { %v4050_v20 = vadd.f32 %v1197_v26, %v3653_v25 }
 0x665   :  { %1212 = vst.msk [vmem:[%s4844_s17] sm:$0xff] %vm68_vm0, %v4050_v20  ;;  %v1218_v51 = vsel %vm68_vm0, %v4050_v20, 0.0 }
 0x666   :  { %1219 = vadd.xlane.f32.xlu0 %v1218_v51 }
 0x669   :  { %v1199_v21 = vpop.f32.mrf.mxu0 }
 0x66a   :  { %v1200_v23 = vadd.f32 %v3274_v57, %v1199_v21 }
 0x66c   :  { %v4060_v46 = vadd.f32 %v1200_v23, %v3638_v13 }
 0x66e   :  { %1213 = vst.msk [vmem:[%s4844_s17 + $0x8] sm:$0xff] %vm68_vm0, %v4060_v46  ;;  %v1221_v25 = vsel %vm68_vm0, %v4060_v46, 0.0 }
 0x66f   :  { %1222 = vadd.xlane.f32.xlu1 %v1221_v25 }
 0x671   :  { %v1202_v62 = vpop.f32.mrf.mxu0 }
 0x672   :  { %v1203_v28 = vadd.f32 %v3274_v57, %v1202_v62 }
 0x674   :  { %v4070_v27 = vadd.f32 %v1203_v28, %v3645_v18 }
 0x676   :  { %1214 = vst.msk [vmem:[%s4844_s17 + $0x10] sm:$0xff] %vm68_vm0, %v4070_v27  ;;  %v1224_v13 = vsel %vm68_vm0, %v4070_v27, 0.0 }
 0x677   :  { %1225 = vadd.xlane.f32.xlu2 %v1224_v13 }
 0x679   :  { %v1205_v30 = vpop.f32.mrf.mxu0 }
 0x67a   :  { %v1206_v11 = vadd.f32 %v3274_v57, %v1205_v30 }
 0x67c   :  { %v4080_v29 = vadd.f32 %v1206_v11, %v3649_v22 }
 0x67e   :  { %1215 = vst.msk [vmem:[%s4844_s17 + $0x18] sm:$0xff] %vm68_vm0, %v4080_v29  ;;  %v1227_v18 = vsel %vm68_vm0, %v4080_v29, 0.0 }
 0x67f   :  { %1228 = vadd.xlane.f32.xlu0 %v1227_v18 }
 0x6d9   :  { %v1220_v31 = vpop.xlane.xlu0 %1219 }
 0x6da   :  { %v1230_v52 = vmul.f32 %v1220_v31, %v3657_v33 }
 0x6dc   :  { %v1234_v0 = vsub.f32 %v4050_v20, %v1230_v52 }
 0x6de   :  { %v1238_v34 = vmul.f32 %v1234_v0, %v1234_v0 }
 0x6e0   :  { %v1242_v3 = vsel %vm68_vm0, %v1238_v34, 0.0 }
 0x6e1   :  { %1243 = vadd.xlane.f32.xlu2 %v1242_v3 }
 0x6e2   :  { %v1223_v22 = vpop.xlane.xlu1 %1222 }
 0x6e3   :  { %v1231_v35 = vmul.f32 %v1223_v22, %v3657_v33 }
 0x6e5   :  { %v4094_v10 = vsub.f32 %v4060_v46, %v1231_v35 }
 0x6e7   :  { %v1239_v12 = vmul.f32 %v4094_v10, %v4094_v10 }
 0x6e9   :  { %v1245_v59 = vsel %vm68_vm0, %v1239_v12, 0.0 }
 0x6ea   :  { %1246 = vadd.xlane.f32.xlu1 %v1245_v59  ;;  %v1226_v37 = vpop.xlane.xlu2 %1225 }
 0x6eb   :  { %v1232_v38 = vmul.f32 %v1226_v37, %v3657_v33 }
 0x6ed   :  { %v4101_v42 = vsub.f32 %v4070_v27, %v1232_v38 }
 0x6ef   :  { %v1240_v44 = vmul.f32 %v4101_v42, %v4101_v42 }
 0x6f1   :  { %v1248_v40 = vsel %vm68_vm0, %v1240_v44, 0.0 }
 0x6f2   :  { %v1229_v39 = vpop.xlane.xlu0 %1228  ;;  %1249 = vadd.xlane.f32.xlu0 %v1248_v40 }
 0x6f3   :  { %v1233_v55 = vmul.f32 %v1229_v39, %v3657_v33 }
 0x6f5   :  { %v4108_v45 = vsub.f32 %v4080_v29, %v1233_v55 }
 0x6f7   :  { %v1241_v47 = vmul.f32 %v4108_v45, %v4108_v45 }
 0x6f9   :  { %v1251_v48 = vsel %vm68_vm0, %v1241_v47, 0.0 }
 0x6fa   :  { %1252 = vadd.xlane.f32.xlu2 %v1251_v48 }
 0x754   :  { %v1244_v17 = vpop.xlane.xlu2 %1243 }
 0x755   :  { %v1254_v36 = vmul.f32 %v1244_v17, %v3657_v33  ;;  %v1407_v17 = vld [vmem:[%s4839_s12 + $0x10] sm:$0xff] }
 0x757   :  { %v1258_v53 = vadd.f32 1e-05, %v1254_v36  ;;  %v1406_v36 = vld [vmem:[%s4839_s12 + $0x8] sm:$0xff] }
 0x759   :  { %3362 = vrsqrt.f32 %v1258_v53  ;;  %vm1268_vm3 = vweird.f32 %v1258_v53 }
 0x75d   :  { %v1247_v24 = vpop.xlane.xlu1 %1246 }
 0x75e   :  { %v1255_v43 = vmul.f32 %v1247_v24, %v3657_v33  ;;  %v3277_v24 = vld [vmem:[%s4838_s11] ss:$0 sm:$0xff] }
 0x75f   :  { %v3363_v32 = vpop.eup %3362 }
 0x760   :  { %v1263_v63 = vmul.f32 %v3363_v32, %v1258_v53  ;;  %v1259_v58 = vadd.f32 1e-05, %v1255_v43  ;;  %vm1269_vm2 = vweird.f32 %v3363_v32  ;;  %v1405_v53 = vld [vmem:[%s4839_s12] sm:$0xff] }
 0x761   :  { %vm1270_vm4 = vmor %vm1268_vm3, %vm1269_vm2  ;;  %vm1417_vm2 = vcmask 523264  }
 0x762   :  { %v1264_v7 = vmul.f32 %v3363_v32, %v1263_v63  ;;  %3364 = vrsqrt.f32 %v1259_v58  ;;  %vm1278_vm6 = vweird.f32 %v1259_v58 }
 0x764   :  { %v1265_v8 = vmul.f32 0.5, %v1264_v7 }
 0x765   :  { %v1250_v15 = vpop.xlane.xlu0 %1249 }
 0x766   :  { %v1266_v61 = vsub.f32 1.5, %v1265_v8  ;;  %v1256_v2 = vmul.f32 %v1250_v15, %v3657_v33 }
 0x768   :  { %v3365_v1 = vpop.eup %3364  ;;  %v1267_v54 = vmul.f32 %v3363_v32, %v1266_v61  ;;  %v1260_v5 = vadd.f32 1e-05, %v1256_v2 }
 0x769   :  { %v1273_v9 = vmul.f32 %v3365_v1, %v1259_v58  ;;  %vm1279_vm5 = vweird.f32 %v3365_v1 }
 0x76a   :  { %v1271_v14 = vsel %vm1270_vm4, %v3363_v32, %v1267_v54  ;;  %3366 = vrsqrt.f32 %v1260_v5  ;;  %vm1280_vm7 = vmor %vm1278_vm6, %vm1279_vm5  ;;  %vm1288_vm9 = vweird.f32 %v1260_v5 }
 0x76b   :  { %v1302_v4 = vmul.f32 %v1271_v14, %v1234_v0  ;;  %v1274_v16 = vmul.f32 %v3365_v1, %v1273_v9 }
 0x76d   :  { %v1309_v57 = vmul.f32 %v3275_v6, %v1302_v4  ;;  %v1275_v19 = vmul.f32 0.5, %v1274_v16  ;;  %v1253_v26 = vpop.xlane.xlu2 %1252 }
 0x76e   :  { %v1257_v51 = vmul.f32 %v1253_v26, %v3657_v33 }
 0x76f   :  { %v1276_v21 = vsub.f32 1.5, %v1275_v19  ;;  %v1316_v23 = vadd.f32 %v3276_v56, %v1309_v57 }
 0x770   :  { %v3367_v25 = vpop.eup %3366  ;;  %v1261_v62 = vadd.f32 1e-05, %v1257_v51 }
 0x771   :  { %v1277_v28 = vmul.f32 %v3365_v1, %v1276_v21  ;;  %v1283_v13 = vmul.f32 %v3367_v25, %v1260_v5  ;;  %3058 = vmatmul.msk.f32.vlgmr.msra.gmra.mxu1 %vm68_vm0, %v1316_v23  ;;  %vm1289_vm8 = vweird.f32 %v3367_v25 }
 0x772   :  { %3368 = vrsqrt.f32 %v1261_v62  ;;  %vm1290_vm10 = vmor %vm1288_vm9, %vm1289_vm8  ;;  %vm1298_vm12 = vweird.f32 %v1261_v62 }
 0x773   :  { %v1281_v30 = vsel %vm1280_vm7, %v3365_v1, %v1277_v28  ;;  %v1284_v11 = vmul.f32 %v3367_v25, %v1283_v13 }
 0x774   :  { %v1303_v18 = vmul.f32 %v1281_v30, %v4094_v10 }
 0x775   :  { %v1285_v31 = vmul.f32 0.5, %v1284_v11 }
 0x776   :  { %v1310_v52 = vmul.f32 %v3275_v6, %v1303_v18 }
 0x777   :  { %v1286_v0 = vsub.f32 1.5, %v1285_v31 }
 0x778   :  { %v3369_v34 = vpop.eup %3368  ;;  %v1317_v3 = vadd.f32 %v3276_v56, %v1310_v52 }
 0x779   :  { %v1287_v22 = vmul.f32 %v3367_v25, %v1286_v0  ;;  %v1293_v35 = vmul.f32 %v3369_v34, %v1261_v62  ;;  %vm1299_vm11 = vweird.f32 %v3369_v34 }
 0x77a   :  { %3059 = vmatmul.msk.f32.gmra.mxu1 %vm68_vm0, %v1317_v3  ;;  %vm1300_vm13 = vmor %vm1298_vm12, %vm1299_vm11 }
 0x77b   :  { %v1291_v12 = vsel %vm1290_vm10, %v3367_v25, %v1287_v22  ;;  %v1294_v59 = vmul.f32 %v3369_v34, %v1293_v35 }
 0x77c   :  { %v1304_v37 = vmul.f32 %v1291_v12, %v4101_v42  ;;  %v1412_v42 = vld [vmem:[%s4839_s12 + $0x38] sm:$0xff] }
 0x77d   :  { %v1295_v38 = vmul.f32 0.5, %v1294_v59  ;;  %1438 = vmatpush.msrb.mxu2 %v1412_v42 }
 0x77e   :  { %v1311_v44 = vmul.f32 %v3275_v6, %v1304_v37 }
 0x77f   :  { %v1296_v40 = vsub.f32 1.5, %v1295_v38  ;;  %1439 = vmatpush.msrb.mxu2 %v1411_v41 }
 0x780   :  { %v1318_v10 = vadd.f32 %v3276_v56, %v1311_v44 }
 0x781   :  { %v1297_v39 = vmul.f32 %v3369_v34, %v1296_v40  ;;  %1440 = vmatpush.msrb.mxu2 %v1410_v49 }
 0x782   :  { %3060 = vmatmul.msk.f32.gmra.mxu1 %vm68_vm0, %v1318_v10  ;;  %v3278_v10 = vld [vmem:[%s4840_s13] ss:$0 sm:$0xff] }
 0x783   :  { %v1301_v55 = vsel %vm1300_vm13, %v3369_v34, %v1297_v39 }
 0x784   :  { %v1305_v47 = vmul.f32 %v1301_v55, %v4108_v45  ;;  %v1409_v45 = vld [vmem:[%s4839_s12 + $0x20] sm:$0xff] }
 0x785   :  { %1441 = vmatpush.msrb.mxu2 %v1409_v45 }
 0x786   :  { %v1312_v48 = vmul.f32 %v3275_v6, %v1305_v47 }
 0x787   :  { %1442 = vmatpush.msrb.mxu2 %v1408_v50 }
 0x788   :  { %v1319_v60 = vadd.f32 %v3276_v56, %v1312_v48 }
 0x789   :  { %1443 = vmatpush.msrb.mxu2 %v1407_v17 }
 0x78a   :  { %3061 = vmatmul.msk.f32.gmra.mxu1 %vm68_vm0, %v1319_v60 }
 0x78b   :  { %1444 = vmatpush.msrb.mxu2 %v1406_v36 }
 0x78d   :  { %1445 = vmatpush.msrb.mxu2 %v1405_v53 }
 0x7ee   :  { %v1357_v43 = vpop.f32.mrf.mxu1 }
 0x7ef   :  { %v1358_v32 = vadd.f32 %v3277_v24, %v1357_v43 }
 0x7f1   :  { %v1373_v63 = vmul.f32 0.044715, %v1358_v32  ;;  %v1369_v16 = vmul.f32 0.5, %v1358_v32 }
 0x7f3   :  { %v1377_v58 = vmul.f32 %v1373_v63, %v1358_v32 }
 0x7f5   :  { %v1381_v7 = vmul.f32 %v1377_v58, %v1358_v32 }
 0x7f7   :  { %v1385_v8 = vadd.f32 %v1381_v7, %v1358_v32  ;;  %v1360_v15 = vpop.f32.mrf.mxu1 }
 0x7f8   :  { %v1361_v61 = vadd.f32 %v3277_v24, %v1360_v15 }
 0x7f9   :  { %v1389_v2 = vmul.f32 0.7978846, %v1385_v8 }
 0x7fa   :  { %v1374_v1 = vmul.f32 0.044715, %v1361_v61  ;;  %v1370_v11 = vmul.f32 0.5, %v1361_v61 }
 0x7fb   :  { %3370 = vtanh.f32 %v1389_v2 }
 0x7fc   :  { %v1378_v54 = vmul.f32 %v1374_v1, %v1361_v61 }
 0x7fe   :  { %v1382_v5 = vmul.f32 %v1378_v54, %v1361_v61 }
 0x7ff   :  { %v1363_v6 = vpop.f32.mrf.mxu1 }
 0x800   :  { %v1364_v9 = vadd.f32 %v3277_v24, %v1363_v6  ;;  %v1386_v14 = vadd.f32 %v1382_v5, %v1361_v61 }
 0x801   :  { %v3371_v4 = vpop.eup %3370 }
 0x802   :  { %v1375_v56 = vmul.f32 0.044715, %v1364_v9  ;;  %v1397_v57 = vadd.f32 1.0, %v3371_v4  ;;  %v1390_v19 = vmul.f32 0.7978846, %v1386_v14  ;;  %v1371_v35 = vmul.f32 0.5, %v1364_v9 }
 0x804   :  { %v1401_v26 = vmul.f32 %v1397_v57, %v1369_v16  ;;  %3372 = vtanh.f32 %v1390_v19  ;;  %v1379_v51 = vmul.f32 %v1375_v56, %v1364_v9  ;;  %v4223_v57 = vld [vmem:[%s4833_s6 + $0x38] sm:$0xff]  ;;  %v4229_v19 = vld [vmem:[%s4833_s6 + $0x30] sm:$0xff] }
 0x805   :  { %1619 = vmatpush.msrb.mxu3 %v4223_v57 }
 0x806   :  { %3062 = vmatmul.msk.f32.vlgmr.msrb.gmra.mxu2 %vm1417_vm2, %v1401_v26  ;;  %v1383_v21 = vmul.f32 %v1379_v51, %v1364_v9  ;;  %v4235_v26 = vld [vmem:[%s4833_s6 + $0x28] sm:$0xff]  ;;  %v4241_v51 = vld [vmem:[%s4833_s6 + $0x20] sm:$0xff] }
 0x807   :  { %v1366_v23 = vpop.f32.mrf.mxu1  ;;  %1620 = vmatpush.msrb.mxu3 %v4229_v19 }
 0x808   :  { %v1367_v25 = vadd.f32 %v3277_v24, %v1366_v23  ;;  %v1387_v62 = vadd.f32 %v1383_v21, %v1364_v9 }
 0x809   :  { %1621 = vmatpush.msrb.mxu3 %v4235_v26 }
 0x80a   :  { %v3373_v28 = vpop.eup %3372  ;;  %v1376_v13 = vmul.f32 0.044715, %v1367_v25  ;;  %v1391_v30 = vmul.f32 0.7978846, %v1387_v62  ;;  %v1372_v38 = vmul.f32 0.5, %v1367_v25  ;;  %v3261_v62 = vpack.i.bf16 %v4229_v19, %v4223_v57 }
 0x80b   :  { %v1398_v18 = vadd.f32 1.0, %v3373_v28  ;;  %1622 = vmatpush.msrb.mxu3 %v4241_v51 }
 0x80c   :  { %3374 = vtanh.f32 %v1391_v30  ;;  %v1380_v31 = vmul.f32 %v1376_v13, %v1367_v25 }
 0x80d   :  { %v1402_v52 = vmul.f32 %v1398_v18, %v1370_v11 }
 0x80e   :  { %v1384_v0 = vmul.f32 %v1380_v31, %v1367_v25 }
 0x80f   :  { %3063 = vmatmul.msk.f32.gmra.mxu2 %vm1417_vm2, %v1402_v52  ;;  %v3266_v52 = vpack.i.bf16 %v4241_v51, %v4235_v26 }
 0x810   :  { %v1388_v34 = vadd.f32 %v1384_v0, %v1367_v25 }
 0x812   :  { %v3375_v3 = vpop.eup %3374  ;;  %v1392_v22 = vmul.f32 0.7978846, %v1388_v34 }
 0x813   :  { %v1399_v12 = vadd.f32 1.0, %v3375_v3 }
 0x814   :  { %3376 = vtanh.f32 %v1392_v22 }
 0x815   :  { %v1403_v59 = vmul.f32 %v1399_v12, %v1371_v35 }
 0x817   :  { %3064 = vmatmul.msk.f32.gmra.mxu2 %vm1417_vm2, %v1403_v59 }
 0x81a   :  { %v3377_v37 = vpop.eup %3376 }
 0x81b   :  { %v1400_v44 = vadd.f32 1.0, %v3377_v37  ;;  %v3279_v37 = vld [vmem:[%s4831_s4 + $0x1] ss:$0 sm:$0xff]  ;;  %s4855_s4 = smov 16  }
 0x81d   :  { %v1404_v40 = vmul.f32 %v1400_v44, %v1372_v38 }
 0x81f   :  { %3065 = vmatmul.msk.f32.gmra.mxu2 %vm1417_vm2, %v1404_v40 }
 0x889   :  { %v1447_v39 = vpop.f32.mrf.mxu2 }
 0x88a   :  { %v1448_v55 = vadd.f32 %v3278_v10, %v1447_v39  ;;  %v3280_v39 = vld [vmem:[%s4832_s5 + $0x1] ss:$0 sm:$0xff]  ;;  %s4856_s5 = smov 24  }
 0x88c   :  { %v4177_v47 = vadd.f32 %v1448_v55, %v4050_v20 }
 0x88e   :  { %v1493_v48 = vsel %vm68_vm0, %v4177_v47, 0.0 }
 0x88f   :  { %1494 = vadd.xlane.f32.xlu1 %v1493_v48 }
 0x892   :  { %v1450_v60 = vpop.f32.mrf.mxu2 }
 0x893   :  { %v1451_v42 = vadd.f32 %v3278_v10, %v1450_v60 }
 0x895   :  { %v4182_v41 = vadd.f32 %v1451_v42, %v4060_v46 }
 0x897   :  { %v1496_v49 = vsel %vm68_vm0, %v4182_v41, 0.0 }
 0x898   :  { %1497 = vadd.xlane.f32.xlu0 %v1496_v49 }
 0x89a   :  { %v1453_v45 = vpop.f32.mrf.mxu2 }
 0x89b   :  { %v1454_v50 = vadd.f32 %v3278_v10, %v1453_v45 }
 0x89d   :  { %v4187_v17 = vadd.f32 %v1454_v50, %v4070_v27 }
 0x89f   :  { %v1499_v20 = vsel %vm68_vm0, %v4187_v17, 0.0 }
 0x8a0   :  { %1500 = vadd.xlane.f32.xlu2 %v1499_v20 }
 0x8a2   :  { %v1456_v36 = vpop.f32.mrf.mxu2 }
 0x8a3   :  { %v1457_v53 = vadd.f32 %v3278_v10, %v1456_v36 }
 0x8a5   :  { %v4192_v24 = vadd.f32 %v1457_v53, %v4080_v29 }
 0x8a7   :  { %v1502_v46 = vsel %vm68_vm0, %v4192_v24, 0.0 }
 0x8a8   :  { %1503 = vadd.xlane.f32.xlu1 %v1502_v46 }
 0x902   :  { %v1495_v43 = vpop.xlane.xlu1 %1494 }
 0x903   :  { %v1505_v32 = vmul.f32 %v1495_v43, %v3657_v33 }
 0x905   :  { %v1509_v63 = vsub.f32 %v4177_v47, %v1505_v32 }
 0x907   :  { %v1513_v27 = vmul.f32 %v1509_v63, %v1509_v63 }
 0x909   :  { %v1517_v58 = vsel %vm68_vm0, %v1513_v27, 0.0 }
 0x90a   :  { %1518 = vadd.xlane.f32.xlu0 %v1517_v58 }
 0x90b   :  { %v1498_v7 = vpop.xlane.xlu0 %1497 }
 0x90c   :  { %v1506_v8 = vmul.f32 %v1498_v7, %v3657_v33 }
 0x90e   :  { %v4201_v15 = vsub.f32 %v4182_v41, %v1506_v8 }
 0x910   :  { %v1514_v29 = vmul.f32 %v4201_v15, %v4201_v15 }
 0x912   :  { %v1520_v61 = vsel %vm68_vm0, %v1514_v29, 0.0 }
 0x913   :  { %1521 = vadd.xlane.f32.xlu2 %v1520_v61  ;;  %v1501_v2 = vpop.xlane.xlu2 %1500 }
 0x914   :  { %v1507_v1 = vmul.f32 %v1501_v2, %v3657_v33 }
 0x916   :  { %v4208_v54 = vsub.f32 %v4187_v17, %v1507_v1 }
 0x918   :  { %v1515_v5 = vmul.f32 %v4208_v54, %v4208_v54 }
 0x91a   :  { %v1523_v6 = vsel %vm68_vm0, %v1515_v5, 0.0 }
 0x91b   :  { %v1504_v9 = vpop.xlane.xlu1 %1503  ;;  %1524 = vadd.xlane.f32.xlu1 %v1523_v6 }
 0x91c   :  { %v1508_v14 = vmul.f32 %v1504_v9, %v3657_v33 }
 0x91e   :  { %v4215_v4 = vsub.f32 %v4192_v24, %v1508_v14 }
 0x920   :  { %v1516_v16 = vmul.f32 %v4215_v4, %v4215_v4 }
 0x922   :  { %v1526_v56 = vsel %vm68_vm0, %v1516_v16, 0.0 }
 0x923   :  { %1527 = vadd.xlane.f32.xlu0 %v1526_v56 }
 0x97d   :  { %v1519_v21 = vpop.xlane.xlu0 %1518 }
 0x97e   :  { %v1529_v23 = vmul.f32 %v1519_v21, %v3657_v33 }
 0x980   :  { %v1533_v25 = vadd.f32 1e-05, %v1529_v23 }
 0x982   :  { %3378 = vrsqrt.f32 %v1533_v25  ;;  %vm1543_vm4 = vweird.f32 %v1533_v25 }
 0x986   :  { %v1522_v28 = vpop.xlane.xlu2 %1521 }
 0x987   :  { %v1530_v13 = vmul.f32 %v1522_v28, %v3657_v33 }
 0x988   :  { %v3379_v30 = vpop.eup %3378 }
 0x989   :  { %v1538_v11 = vmul.f32 %v3379_v30, %v1533_v25  ;;  %v1534_v18 = vadd.f32 1e-05, %v1530_v13  ;;  %vm1544_vm3 = vweird.f32 %v3379_v30 }
 0x98a   :  { %vm1545_vm5 = vmor %vm1543_vm4, %vm1544_vm3 }
 0x98b   :  { %v1539_v31 = vmul.f32 %v3379_v30, %v1538_v11  ;;  %3380 = vrsqrt.f32 %v1534_v18  ;;  %vm1553_vm7 = vweird.f32 %v1534_v18 }
 0x98d   :  { %v1540_v0 = vmul.f32 0.5, %v1539_v31 }
 0x98e   :  { %v1525_v34 = vpop.xlane.xlu1 %1524 }
 0x98f   :  { %v1541_v3 = vsub.f32 1.5, %v1540_v0  ;;  %v1531_v22 = vmul.f32 %v1525_v34, %v3657_v33 }
 0x991   :  { %v3381_v35 = vpop.eup %3380  ;;  %v1542_v12 = vmul.f32 %v3379_v30, %v1541_v3  ;;  %v1535_v59 = vadd.f32 1e-05, %v1531_v22 }
 0x992   :  { %v1548_v38 = vmul.f32 %v3381_v35, %v1534_v18  ;;  %vm1554_vm6 = vweird.f32 %v3381_v35 }
 0x993   :  { %v1546_v44 = vsel %vm1545_vm5, %v3379_v30, %v1542_v12  ;;  %3382 = vrsqrt.f32 %v1535_v59  ;;  %vm1555_vm8 = vmor %vm1553_vm7, %vm1554_vm6  ;;  %vm1563_vm10 = vweird.f32 %v1535_v59  ;;  %vm1479_vm7 = vcmask 523520  }
 0x994   :  { %v1577_v40 = vmul.f32 %v1546_v44, %v1509_v63  ;;  %v1549_v10 = vmul.f32 %v3381_v35, %v1548_v38 }
 0x996   :  { %v1584_v55 = vmul.f32 %v3279_v37, %v1577_v40  ;;  %v1550_v48 = vmul.f32 0.5, %v1549_v10  ;;  %v1528_v60 = vpop.xlane.xlu0 %1527 }
 0x997   :  { %v1532_v42 = vmul.f32 %v1528_v60, %v3657_v33 }
 0x998   :  { %v1551_v49 = vsub.f32 1.5, %v1550_v48  ;;  %v1591_v45 = vadd.f32 %v3280_v39, %v1584_v55 }
 0x999   :  { %v3383_v50 = vpop.eup %3382  ;;  %v1536_v20 = vadd.f32 1e-05, %v1532_v42 }
 0x99a   :  { %v1552_v36 = vmul.f32 %v3381_v35, %v1551_v49  ;;  %v1558_v53 = vmul.f32 %v3383_v50, %v1535_v59  ;;  %3072 = vmatmul.msk.f32.vlgmr.msrb.gmra.mxu3 %vm68_vm0, %v1591_v45  ;;  %vm1564_vm9 = vweird.f32 %v3383_v50 }
 0x99b   :  { %3384 = vrsqrt.f32 %v1536_v20  ;;  %vm1565_vm11 = vmor %vm1563_vm10, %vm1564_vm9  ;;  %vm1573_vm13 = vweird.f32 %v1536_v20 }
 0x99c   :  { %v1556_v46 = vsel %vm1555_vm8, %v3381_v35, %v1552_v36  ;;  %v1559_v43 = vmul.f32 %v3383_v50, %v1558_v53  ;;  %vm2590_vm8 = vcmask 785920  }
 0x99d   :  { %v1578_v32 = vmul.f32 %v1556_v46, %v4201_v15 }
 0x99e   :  { %v1560_v63 = vmul.f32 0.5, %v1559_v43 }
 0x99f   :  { %v1585_v27 = vmul.f32 %v3279_v37, %v1578_v32 }
 0x9a0   :  { %v1561_v58 = vsub.f32 1.5, %v1560_v63 }
 0x9a1   :  { %v3385_v7 = vpop.eup %3384  ;;  %v1592_v8 = vadd.f32 %v3280_v39, %v1585_v27 }
 0x9a2   :  { %v1562_v29 = vmul.f32 %v3383_v50, %v1561_v58  ;;  %v1568_v61 = vmul.f32 %v3385_v7, %v1536_v20  ;;  %vm1574_vm12 = vweird.f32 %v3385_v7 }
 0x9a3   :  { %3073 = vmatmul.msk.f32.gmra.mxu3 %vm68_vm0, %v1592_v8  ;;  %vm1575_vm3 = vmor %vm1573_vm13, %vm1574_vm12 }
 0x9a4   :  { %v1566_v2 = vsel %vm1565_vm11, %v3383_v50, %v1562_v29  ;;  %v1569_v1 = vmul.f32 %v3385_v7, %v1568_v61 }
 0x9a5   :  { %v1579_v5 = vmul.f32 %v1566_v2, %v4208_v54 }
 0x9a6   :  { %v1570_v6 = vmul.f32 0.5, %v1569_v1 }
 0x9a7   :  { %v1586_v9 = vmul.f32 %v3279_v37, %v1579_v5 }
 0x9a8   :  { %v1571_v14 = vsub.f32 1.5, %v1570_v6 }
 0x9a9   :  { %v1593_v15 = vadd.f32 %v3280_v39, %v1586_v9 }
 0x9aa   :  { %v1572_v16 = vmul.f32 %v3385_v7, %v1571_v14 }
 0x9ab   :  { %3074 = vmatmul.msk.f32.gmra.mxu3 %vm68_vm0, %v1593_v15 }
 0x9ac   :  { %v1576_v56 = vsel %vm1575_vm3, %v3385_v7, %v1572_v16 }
 0x9ad   :  { %v1580_v21 = vmul.f32 %v1576_v56, %v4215_v4 }
 0x9af   :  { %v1587_v23 = vmul.f32 %v3279_v37, %v1580_v21 }
 0x9b1   :  { %v1594_v25 = vadd.f32 %v3280_v39, %v1587_v23 }
 0x9b3   :  { %3075 = vmatmul.msk.f32.gmra.mxu3 %vm68_vm0, %v1594_v25 }
 0xa1d   :  { %v1624_v28 = vpop.f32.mrf.mxu3 }
 0xa1e   :  { %1640 = vrot.lane.b32.xlu1 %v1624_v28, %s3503_s28 }
 0xa26   :  { %1656 = vrot.lane.b32.xlu1 %v1624_v28, %s3506_s30  ;;  %v1627_v54 = vpop.f32.mrf.mxu3 }
 0xa27   :  { %1642 = vrot.lane.b32.xlu2 %v1627_v54, %s3503_s28  ;;  %v3226_v38 = vpack.i.bf16 %v1624_v28, %v1627_v54 }
 0xa2e   :  { %v4268_v13 = vpop.f32.mrf.mxu3 }
 0xa2f   :  { %1658 = vrot.lane.b32.xlu2 %v1627_v54, %s3506_s30 }
 0xa36   :  { %v4271_v30 = vpop.f32.mrf.mxu3 }
 0xa37   :  { %1650 = vrot.lane.b32.xlu2 %v1627_v54, %s3504_s29  ;;  %1662 = vrot.lane.b32.xlu1 %v4271_v30, %s3506_s30 }
 0xa38   :  { %1646 = vrot.lane.b32.xlu0 %v4271_v30, %s3503_s28 }
 0xa3f   :  { %1660 = vrot.lane.b32.xlu2 %v4268_v13, %s3506_s30  ;;  %1654 = vrot.lane.b32.xlu1 %v4271_v30, %s3504_s29 }
 0xa40   :  { %1644 = vrot.lane.b32.xlu0 %v4268_v13, %s3503_s28 }
 0xa47   :  { %1666 = vrot.lane.b32.xlu1 %v1627_v54, %s3505_s0 }
 0xa48   :  { %1648 = vrot.lane.b32.xlu0 %v1624_v28, %s3504_s29 }
 0xa81   :  { %v1643_v4 = vpop.permute.xlu2 %1642 }
 0xa82   :  { %1736 = vrot.lane.b32.xlu0 %v1643_v4, %s3505_s0 }
 0xa89   :  { %v4287_v11 = vpop.permute.xlu2 %1658 }
 0xa8a   :  { %1876 = vrot.lane.b32.xlu1 %v4287_v11, %s3505_s0  ;;  %1652 = vrot.lane.b32.xlu0 %v4268_v13, %s3504_s29 }
 0xa90   :  { %v1641_v18 = vpop.permute.xlu1 %1640 }
 0xa91   :  { %1734 = vrot.lane.b32.xlu2 %v1641_v18, %s3505_s0  ;;  %v4304_v35 = vpop.permute.xlu2 %1650  ;;  %v3221_v60 = vpack.i.bf16 %v1641_v18, %v1643_v4 }
 0xa92   :  { %1701 = vrot.lane.b32.xlu1 %v4271_v30, %s3505_s0 }
 0xa98   :  { %v1657_v31 = vpop.permute.xlu1 %1656 }
 0xa99   :  { %1664 = vrot.lane.b32.xlu2 %v1624_v28, %s3505_s0  ;;  %v4315_v37 = vpop.permute.xlu2 %1660 }
 0xaa9   :  { %v4297_v0 = vpop.permute.xlu1 %1662 }
 0xaaa   :  { %v1647_v34 = vpop.permute.xlu0 %1646 }
 0xaab   :  { %1771 = vrot.lane.b32.xlu0 %v1647_v34, %s3505_s0  ;;  %v3236_v44 = vpack.i.bf16 %v4287_v11, %v1647_v34 }
 0xab1   :  { %v4300_v3 = vpop.permute.xlu1 %1654 }
 0xab2   :  { %v1645_v22 = vpop.permute.xlu0 %1644 }
 0xab3   :  { %1874 = vrot.lane.b32.xlu0 %v1657_v31, %s3505_s0  ;;  %1769 = vrot.lane.b32.xlu2 %v1645_v22, %s3505_s0  ;;  %v3231_v49 = vpack.i.bf16 %v1657_v31, %v1645_v22 }
 0xab9   :  { %v1667_v12 = vpop.permute.xlu1 %1666 }
 0xaba   :  { %v4306_v59 = vpop.permute.xlu0 %1648  ;;  %3076 = vmatpush.xpose.msk.msrb.mxu0 %vm304_vm14, %v1667_v12 }
 0xabb   :  { %1699 = vrot.lane.b32.xlu0 %v4268_v13, %s3505_s0  ;;  %1806 = vrot.lane.b32.xlu2 %v4304_v35, %s3505_s0 }
 0xabc   :  { %1804 = vrot.lane.b32.xlu1 %v4306_v59, %s3505_s0 }
 0xac3   :  { %1909 = vrot.lane.b32.xlu0 %v4315_v37, %s3505_s0  ;;  %1911 = vrot.lane.b32.xlu2 %v4297_v0, %s3505_s0 }
 0xac4   :  { %1841 = vrot.lane.b32.xlu1 %v4300_v3, %s3505_s0 }
 0xacb   :  { %3227 = vrot.lane.b32.xlu0 %v3226_v38, %s3507_s18 }
 0xacc   :  { %3237 = vrot.lane.b32.xlu1 %v3236_v44, %s3507_s18 }
 0xaeb   :  { %v1735_v40 = vpop.permute.xlu2 %1734 }
 0xaf3   :  { %v1665_v10 = vpop.permute.xlu2 %1664 }
 0xaf4   :  { %3077 = vmatpush.xpose.msk.msrb.mxu0 %vm304_vm14, %v1665_v10  ;;  %v1737_v39 = vpop.permute.xlu0 %1736 }
 0xaf5   :  { %3084 = vmatpush.xpose.msk.msra.mxu2 %vm304_vm14, %v1737_v39 }
 0xaf7   :  { %3078 = vmatmul.msk.f32.vlgmr.msrb.gmra.mxu0 %vm304_vm14, %v1624_v28 }
 0xaf9   :  { %3085 = vmatpush.xpose.msk.msra.mxu2 %vm304_vm14, %v1735_v40 }
 0xafc   :  { %v1877_v55 = vpop.permute.xlu1 %1876  ;;  %3086 = vmatmul.msk.f32.vlgmr.msra.gmra.mxu2 %vm304_vm14, %v1641_v18  ;;  %v4331_v48 = vpop.permute.xlu0 %1652 }
 0xafd   :  { %3100 = vmatpush.xpose.msk.msrb.mxu2 %vm304_vm14, %v1877_v55  ;;  %1839 = vrot.lane.b32.xlu2 %v4331_v48, %s3505_s0 }
 0xaff   :  { %3079 = vmatmul.msk.f32.gmra.mxu0 %vm304_vm14, %v1627_v54 }
 0xb04   :  { %v1702_v42 = vpop.permute.xlu1 %1701  ;;  %3087 = vmatmul.msk.f32.gmra.mxu2 %vm304_vm14, %v1643_v4 }
 0xb05   :  { %3080 = vmatpush.xpose.msk.msrb.mxu1 %vm304_vm14, %v1702_v42  ;;  %3222 = vrot.lane.b32.xlu2 %v3221_v60, %s3507_s18 }
 0xb0d   :  { %v1770_v45 = vpop.permute.xlu2 %1769  ;;  %3232 = vrot.lane.b32.xlu2 %v3231_v49, %s3507_s18 }
 0xb15   :  { %v1807_v50 = vpop.permute.xlu2 %1806 }
 0xb16   :  { %3092 = vmatpush.xpose.msk.msra.mxu0 %vm304_vm14, %v1807_v50 }
 0xb1d   :  { %v1772_v20 = vpop.permute.xlu0 %1771  ;;  %v1912_v36 = vpop.permute.xlu2 %1911 }
 0xb1e   :  { %3088 = vmatpush.xpose.msk.msra.mxu3 %vm304_vm14, %v1772_v20 }
 0xb22   :  { %3089 = vmatpush.xpose.msk.msra.mxu3 %vm304_vm14, %v1770_v45 }
 0xb25   :  { %3090 = vmatmul.msk.f32.vlgmr.msra.gmra.mxu3 %vm304_vm14, %v1645_v22  ;;  %v1875_v53 = vpop.permute.xlu0 %1874 }
 0xb26   :  { %3104 = vmatpush.xpose.msk.msrb.mxu3 %vm304_vm14, %v1912_v36  ;;  %3101 = vmatpush.xpose.msk.msrb.mxu2 %vm304_vm14, %v1875_v53 }
 0xb29   :  { %3102 = vmatmul.msk.f32.vlgmr.msrb.gmra.mxu2 %vm304_vm14, %v1657_v31 }
 0xb2d   :  { %3091 = vmatmul.msk.f32.gmra.mxu3 %vm304_vm14, %v1647_v34  ;;  %v1700_v46 = vpop.permute.xlu0 %1699 }
 0xb2e   :  { %v1805_v43 = vpop.permute.xlu1 %1804  ;;  %3081 = vmatpush.xpose.msk.msrb.mxu1 %vm304_vm14, %v1700_v46 }
 0xb2f   :  { %3093 = vmatpush.xpose.msk.msra.mxu0 %vm304_vm14, %v1805_v43 }
 0xb31   :  { %3082 = vmatmul.msk.f32.vlgmr.msrb.gmra.mxu1 %vm304_vm14, %v4268_v13  ;;  %3103 = vmatmul.msk.f32.gmra.mxu2 %vm304_vm14, %v4287_v11 }
 0xb32   :  { %3094 = vmatmul.msk.f32.vlgmr.msra.gmra.mxu0 %vm304_vm14, %v4306_v59 }
 0xb35   :  { %v1910_v32 = vpop.permute.xlu0 %1909 }
 0xb36   :  { %v1842_v63 = vpop.permute.xlu1 %1841  ;;  %3105 = vmatpush.xpose.msk.msrb.mxu3 %vm304_vm14, %v1910_v32 }
 0xb37   :  { %3096 = vmatpush.xpose.msk.msra.mxu1 %vm304_vm14, %v1842_v63 }
 0xb39   :  { %3083 = vmatmul.msk.f32.gmra.mxu1 %vm304_vm14, %v4271_v30  ;;  %3106 = vmatmul.msk.f32.vlgmr.msrb.gmra.mxu3 %vm304_vm14, %v4315_v37 }
 0xb3a   :  { %3095 = vmatmul.msk.f32.gmra.mxu0 %vm304_vm14, %v4304_v35 }
 0xb3d   :  { %v3228_v27 = vpop.permute.xlu0 %3227 }
 0xb3e   :  { %v3238_v58 = vpop.permute.xlu1 %3237  ;;  %v3229_v7 = vunpack.i.l.bf16 %v3228_v27  ;;  %v3230_v29 = vunpack.i.h.bf16 %v3228_v27 }
 0xb3f   :  { %v3239_v8 = vunpack.i.l.bf16 %v3238_v58  ;;  %v3240_v6 = vunpack.i.h.bf16 %v3238_v58 }
 0xb40   :  { %2194 = vmatpush.msrb.mxu0 %v3229_v7 }
 0xb41   :  { %2299 = vmatpush.msra.mxu3 %v3239_v8 }
 0xb42   :  { %3107 = vmatmul.msk.f32.gmra.mxu3 %vm304_vm14, %v4297_v0  ;;  %2195 = vmatpush.msrb.mxu0 %v3230_v29 }
 0xb57   :  { %v1840_v61 = vpop.permute.xlu2 %1839 }
 0xb58   :  { %3097 = vmatpush.xpose.msk.msra.mxu1 %vm304_vm14, %v1840_v61 }
 0xb5b   :  { %3098 = vmatmul.msk.f32.vlgmr.msra.gmra.mxu1 %vm304_vm14, %v4331_v48 }
 0xb5f   :  { %v3223_v2 = vpop.permute.xlu2 %3222 }
 0xb60   :  { %v3224_v1 = vunpack.i.l.bf16 %v3223_v2  ;;  %v3225_v5 = vunpack.i.h.bf16 %v3223_v2 }
 0xb62   :  { %2264 = vmatpush.msra.mxu2 %v3224_v1 }
 0xb63   :  { %3099 = vmatmul.msk.f32.gmra.mxu1 %vm304_vm14, %v4300_v3 }
 0xb64   :  { %2265 = vmatpush.msra.mxu2 %v3225_v5 }
 0xb66   :  { %2404 = vmatpush.msrb.mxu2 %v3240_v6 }
 0xb67   :  { %v3233_v9 = vpop.permute.xlu2 %3232 }
 0xb68   :  { %v3235_v14 = vunpack.i.h.bf16 %v3233_v9  ;;  %v3234_v15 = vunpack.i.l.bf16 %v3233_v9 }
 0xb6a   :  { %2300 = vmatpush.msra.mxu3 %v3234_v15  ;;  %2405 = vmatpush.msrb.mxu2 %v3235_v14 }
 0xb74   :  { %v1693_v16 = vpop.f32.mrf.mxu0 }
 0xb75   :  { %v1944_v56 = vsel %vm581_vm15, %v1693_v16, -inf }
 0xb76   :  { %1945 = vmax.xlane.f32.xlu1 %v1944_v56 }
 0xb7c   :  { %v1696_v21 = vpop.f32.mrf.mxu0 }
 0xb7d   :  { %v1947_v23 = vsel %vm581_vm15, %v1696_v21, -inf }
 0xb7e   :  { %1948 = vmax.xlane.f32.xlu0 %v1947_v23 }
 0xb7f   :  { %v4377_v4 = vpop.f32.mrf.mxu2 }
 0xb80   :  { %v1956_v31 = vsel %vm581_vm15, %v4377_v4, -inf }
 0xb87   :  { %v4388_v38 = vpop.f32.mrf.mxu2 }
 0xb88   :  { %v1959_v27 = vsel %vm581_vm15, %v4388_v38, -inf }
 0xba8   :  { %v4408_v32 = vpop.f32.mrf.mxu3 }
 0xba9   :  { %v1962_v29 = vsel %vm581_vm15, %v4408_v32, -inf }
 0xbac   :  { %v4394_v10 = vpop.f32.mrf.mxu2 }
 0xbad   :  { %v1980_v8 = vsel %vm581_vm15, %v4394_v10, -inf }
 0xbae   :  { %v1728_v25 = vpop.f32.mrf.mxu1 }
 0xbaf   :  { %v4374_v28 = vpop.f32.mrf.mxu0  ;;  %v1950_v54 = vsel %vm581_vm15, %v1728_v25, -inf }
 0xbb0   :  { %1951 = vmax.xlane.f32.xlu0 %v1950_v54  ;;  %v1968_v12 = vsel %vm581_vm15, %v4374_v28, -inf  ;;  %v4416_v7 = vpop.f32.mrf.mxu3 }
 0xbb1   :  { %v1965_v2 = vsel %vm581_vm15, %v4416_v7, -inf }
 0xbb4   :  { %v4400_v60 = vpop.f32.mrf.mxu2 }
 0xbb5   :  { %v1983_v49 = vsel %vm581_vm15, %v4400_v60, -inf }
 0xbb6   :  { %v1731_v11 = vpop.f32.mrf.mxu1 }
 0xbb7   :  { %v4379_v18 = vpop.f32.mrf.mxu0  ;;  %v1953_v34 = vsel %vm581_vm15, %v1731_v11, -inf }
 0xbb8   :  { %v1971_v22 = vsel %vm581_vm15, %v4379_v18, -inf  ;;  %1957 = vmax.xlane.f32.xlu0 %v1956_v31  ;;  %1954 = vmax.xlane.f32.xlu1 %v1953_v34 }
 0xbb9   :  { %1972 = vmax.xlane.f32.xlu2 %v1971_v22 }
 0xbbc   :  { %v4422_v61 = vpop.f32.mrf.mxu3 }
 0xbc0   :  { %1969 = vmax.xlane.f32.xlu1 %v1968_v12 }
 0xbc5   :  { %v4426_v1 = vpop.f32.mrf.mxu3 }
 0xbc6   :  { %v1989_v5 = vsel %vm581_vm15, %v4426_v1, -inf }
 0xbd8   :  { %v4390_v44 = vpop.f32.mrf.mxu1 }
 0xbd9   :  { %v1974_v40 = vsel %vm581_vm15, %v4390_v44, -inf }
 0xbda   :  { %1975 = vmax.xlane.f32.xlu1 %v1974_v40 }
 0xbe0   :  { %v4396_v39 = vpop.f32.mrf.mxu1 }
 0xbe1   :  { %v1977_v55 = vsel %vm581_vm15, %v4396_v39, -inf }
 0xbe2   :  { %1978 = vmax.xlane.f32.xlu0 %v1977_v55 }
 0xbe9   :  { %v1946_v42 = vpop.xlane.xlu1 %1945 }
 0xbea   :  { %v1992_v45 = vsub.f32 %v1693_v16, %v1946_v42  ;;  %1984 = vmax.xlane.f32.xlu0 %v1983_v49 }
 0xbec   :  { %v2008_v50 = vmul.f32 1.442695, %v1992_v45 }
 0xbee   :  { %3386 = vpow2.f32 %v2008_v50 }
 0xbf1   :  { %v1949_v20 = vpop.xlane.xlu0 %1948 }
 0xbf2   :  { %v1993_v36 = vsub.f32 %v1696_v21, %v1949_v20 }
 0xbf4   :  { %v4404_v53 = vpop.eup %3386  ;;  %v2010_v46 = vmul.f32 1.442695, %v1993_v36 }
 0xbf5   :  { %v2040_v43 = vsel %vm581_vm15, %v4404_v53, 0.0 }
 0xbf6   :  { %3388 = vpow2.f32 %v2010_v46  ;;  %2041 = vadd.xlane.f32.xlu2 %v2040_v43  ;;  %v3241_v46 = vpack.i.bf16 %v4304_v35, %v4271_v30 }
 0xbfc   :  { %v4410_v63 = vpop.eup %3388 }
 0xbfd   :  { %v2043_v58 = vsel %vm581_vm15, %v4410_v63, 0.0 }
 0xbfe   :  { %1960 = vmax.xlane.f32.xlu2 %v1959_v27  ;;  %2044 = vadd.xlane.f32.xlu1 %v2043_v58 }
 0xc06   :  { %1981 = vmax.xlane.f32.xlu2 %v1980_v8  ;;  %1963 = vmax.xlane.f32.xlu1 %v1962_v29 }
 0xc0e   :  { %1966 = vmax.xlane.f32.xlu2 %v1965_v2 }
 0xc16   :  { %1990 = vmax.xlane.f32.xlu2 %v1989_v5 }
 0xc23   :  { %v1952_v6 = vpop.xlane.xlu0 %1951 }
 0xc24   :  { %v1994_v9 = vsub.f32 %v1728_v25, %v1952_v6 }
 0xc26   :  { %v2012_v14 = vmul.f32 1.442695, %v1994_v9 }
 0xc28   :  { %3390 = vpow2.f32 %v2012_v14 }
 0xc2b   :  { %v1955_v15 = vpop.xlane.xlu1 %1954  ;;  %v1958_v54 = vpop.xlane.xlu0 %1957 }
 0xc2c   :  { %v1995_v16 = vsub.f32 %v1731_v11, %v1955_v15  ;;  %v1996_v25 = vsub.f32 %v4377_v4, %v1958_v54  ;;  %v1973_v55 = vpop.xlane.xlu2 %1972 }
 0xc2d   :  { %v2001_v49 = vsub.f32 %v4379_v18, %v1973_v55 }
 0xc2e   :  { %v4430_v56 = vpop.eup %3390  ;;  %v2014_v21 = vmul.f32 1.442695, %v1995_v16  ;;  %v2016_v40 = vmul.f32 1.442695, %v1996_v25 }
 0xc2f   :  { %v2046_v23 = vsel %vm581_vm15, %v4430_v56, 0.0  ;;  %v2026_v4 = vmul.f32 1.442695, %v2001_v49 }
 0xc30   :  { %3392 = vpow2.f32 %v2014_v21  ;;  %2047 = vadd.xlane.f32.xlu1 %v2046_v23 }
 0xc33   :  { %v1970_v31 = vpop.xlane.xlu1 %1969 }
 0xc34   :  { %v2000_v34 = vsub.f32 %v4374_v28, %v1970_v31  ;;  %v1986_v28 = vsel %vm581_vm15, %v4422_v61, -inf }
 0xc36   :  { %v4435_v22 = vpop.eup %3392  ;;  %v2024_v12 = vmul.f32 1.442695, %v2000_v34 }
 0xc37   :  { %v2049_v11 = vsel %vm581_vm15, %v4435_v22, 0.0 }
 0xc38   :  { %3394 = vpow2.f32 %v2024_v12  ;;  %2050 = vadd.xlane.f32.xlu0 %v2049_v11 }
 0xc39   :  { %3396 = vpow2.f32 %v2016_v40 }
 0xc3a   :  { %3398 = vpow2.f32 %v2026_v4 }
 0xc3e   :  { %v4440_v42 = vpop.eup %3394 }
 0xc3f   :  { %v2064_v45 = vsel %vm581_vm15, %v4440_v42, 0.0  ;;  %v4447_v50 = vpop.eup %3396 }
 0xc40   :  { %1987 = vmax.xlane.f32.xlu0 %v1986_v28  ;;  %2065 = vadd.xlane.f32.xlu1 %v2064_v45  ;;  %v2052_v20 = vsel %vm581_vm15, %v4447_v50, 0.0  ;;  %v4451_v36 = vpop.eup %3398 }
 0xc41   :  { %v2067_v18 = vsel %vm581_vm15, %v4451_v36, 0.0 }
 0xc48   :  { %2053 = vadd.xlane.f32.xlu1 %v2052_v20 }
 0xc4d   :  { %v1976_v43 = vpop.xlane.xlu1 %1975 }
 0xc50   :  { %2068 = vadd.xlane.f32.xlu1 %v2067_v18 }
 0xc54   :  { %3242 = vrot.lane.b32.xlu0 %v3241_v46, %s3507_s18 }
 0xc55   :  { %v4458_v58 = vpop.xlane.xlu0 %1978 }
 0xc5d   :  { %v1985_v16 = vpop.xlane.xlu0 %1984 }
 0xc5e   :  { %v2005_v12 = vsub.f32 %v4400_v60, %v1985_v16 }
 0xc60   :  { %v2034_v28 = vmul.f32 1.442695, %v2005_v12 }
 0xc69   :  { %v2042_v27 = vpop.xlane.xlu2 %2041 }
 0xc6a   :  { %3400 = vrcp.f32 %v2042_v27 }
 0xc70   :  { %v3401_v8 = vpop.eup %3400 }
 0xc71   :  { %v2104_v29 = vmul.f32 %v3401_v8, %v2042_v27  ;;  %v1961_v2 = vpop.xlane.xlu2 %1960  ;;  %v2045_v5 = vpop.xlane.xlu1 %2044 }
 0xc72   :  { %v1997_v6 = vsub.f32 %v4388_v38, %v1961_v2  ;;  %3402 = vrcp.f32 %v2045_v5  ;;  %v3256_v2 = vpack.i.bf16 %v4331_v48, %v4300_v3 }
 0xc73   :  { %v2120_v9 = vsub.f32 2.0, %v2104_v29 }
 0xc74   :  { %v2018_v14 = vmul.f32 1.442695, %v1997_v6 }
 0xc75   :  { %v2136_v15 = vmul.f32 %v3401_v8, %v2120_v9 }
 0xc76   :  { %3404 = vpow2.f32 %v2018_v14 }
 0xc77   :  { %v2152_v30 = vmul.f32 %v4404_v53, %v2136_v15  ;;  %v2002_v53 = vsub.f32 %v4390_v44, %v1976_v43 }
 0xc78   :  { %v3403_v35 = vpop.eup %3402 }
 0xc79   :  { %v2105_v21 = vmul.f32 %v3403_v35, %v2045_v5  ;;  %v1982_v23 = vpop.xlane.xlu2 %1981  ;;  %v1964_v54 = vpop.xlane.xlu1 %1963  ;;  %3108 = vmatmul.msk.f32.vlgmr.msrb.gmra.mxu0 %vm581_vm15, %v2152_v30  ;;  %v3246_v5 = vpack.i.bf16 %v4306_v59, %v4268_v13 }
 0xc7a   :  { %v2004_v31 = vsub.f32 %v4394_v10, %v1982_v23  ;;  %v1998_v34 = vsub.f32 %v4408_v32, %v1964_v54  ;;  %v2028_v32 = vmul.f32 1.442695, %v2002_v53 }
 0xc7b   :  { %v2121_v25 = vsub.f32 2.0, %v2105_v21 }
 0xc7c   :  { %v4465_v38 = vpop.eup %3404  ;;  %v2032_v11 = vmul.f32 1.442695, %v2004_v31  ;;  %v2020_v40 = vmul.f32 1.442695, %v1998_v34 }
 0xc7d   :  { %v2137_v55 = vmul.f32 %v3403_v35, %v2121_v25  ;;  %v2055_v49 = vsel %vm581_vm15, %v4465_v38, 0.0  ;;  %v2003_v35 = vsub.f32 %v4396_v39, %v4458_v58 }
 0xc7e   :  { %3406 = vpow2.f32 %v2032_v11  ;;  %2056 = vadd.xlane.f32.xlu0 %v2055_v49  ;;  %v3251_v49 = vpack.i.bf16 %v4315_v37, %v4297_v0 }
 0xc7f   :  { %3408 = vpow2.f32 %v2020_v40  ;;  %v2153_v10 = vmul.f32 %v4410_v63, %v2137_v55  ;;  %v2030_v3 = vmul.f32 1.442695, %v2003_v35 }
 0xc80   :  { %3410 = vpow2.f32 %v2034_v28 }
 0xc81   :  { %v1967_v45 = vpop.xlane.xlu2 %1966  ;;  %3109 = vmatmul.msk.f32.gmra.mxu0 %vm581_vm15, %v2153_v10  ;;  %3412 = vpow2.f32 %v2028_v32 }
 0xc82   :  { %v1999_v60 = vsub.f32 %v4416_v7, %v1967_v45 }
 0xc84   :  { %v4474_v4 = vpop.eup %3406  ;;  %v2022_v44 = vmul.f32 1.442695, %v1999_v60 }
 0xc85   :  { %v4476_v20 = vpop.eup %3408  ;;  %v2076_v18 = vsel %vm581_vm15, %v4474_v4, 0.0 }
 0xc86   :  { %3414 = vpow2.f32 %v2022_v44  ;;  %v2058_v63 = vsel %vm581_vm15, %v4476_v20, 0.0  ;;  %2077 = vadd.xlane.f32.xlu1 %v2076_v18  ;;  %v4482_v46 = vpop.eup %3410 }
 0xc87   :  { %2059 = vadd.xlane.f32.xlu0 %v2058_v63  ;;  %v4484_v43 = vpop.eup %3412  ;;  %v2079_v8 = vsel %vm581_vm15, %v4482_v46, 0.0 }
 0xc88   :  { %v2070_v29 = vsel %vm581_vm15, %v4484_v43, 0.0 }
 0xc89   :  { %v1991_v48 = vpop.xlane.xlu2 %1990 }
 0xc8a   :  { %v2007_v13 = vsub.f32 %v4426_v1, %v1991_v48 }
 0xc8c   :  { %v4486_v7 = vpop.eup %3414  ;;  %v2038_v54 = vmul.f32 1.442695, %v2007_v13 }
 0xc8d   :  { %v2061_v27 = vsel %vm581_vm15, %v4486_v7, 0.0 }
 0xc8e   :  { %2062 = vadd.xlane.f32.xlu2 %v2061_v27  ;;  %2080 = vadd.xlane.f32.xlu1 %v2079_v8 }
 0xc8f   :  { %2071 = vadd.xlane.f32.xlu0 %v2070_v29 }
 0xca3   :  { %3257 = vrot.lane.b32.xlu0 %v3256_v2, %s3507_s18  ;;  %v2048_v6 = vpop.xlane.xlu1 %2047 }
 0xca6   :  { %3247 = vrot.lane.b32.xlu2 %v3246_v5, %s3507_s18 }
 0xcab   :  { %v4500_v9 = vpop.xlane.xlu0 %2050 }
 0xcb3   :  { %v2066_v14 = vpop.xlane.xlu1 %2065  ;;  %v1988_v15 = vpop.xlane.xlu0 %1987 }
 0xcb4   :  { %v2006_v30 = vsub.f32 %v4422_v61, %v1988_v15 }
 0xcb6   :  { %v2036_v16 = vmul.f32 1.442695, %v2006_v30 }
 0xcb8   :  { %3416 = vpow2.f32 %v2036_v16 }
 0xcbb   :  { %v2054_v21 = vpop.xlane.xlu1 %2053 }
 0xcbc   :  { %3418 = vrcp.f32 %v2054_v21 }
 0xcbd   :  { %3420 = vpow2.f32 %v2030_v3 }
 0xcbe   :  { %v4506_v59 = vpop.eup %3416  ;;  %3422 = vpow2.f32 %v2038_v54 }
 0xcbf   :  { %v2082_v23 = vsel %vm581_vm15, %v4506_v59, 0.0 }
 0xcc0   :  { %2083 = vadd.xlane.f32.xlu1 %v2082_v23 }
 0xcc2   :  { %v3419_v61 = vpop.eup %3418 }
 0xcc3   :  { %v2108_v31 = vmul.f32 %v3419_v61, %v2054_v21  ;;  %v4510_v34 = vpop.eup %3420 }
 0xcc4   :  { %v2073_v1 = vsel %vm581_vm15, %v4510_v34, 0.0  ;;  %v4515_v53 = vpop.eup %3422 }
 0xcc5   :  { %v2124_v39 = vsub.f32 2.0, %v2108_v31  ;;  %v2085_v55 = vsel %vm581_vm15, %v4515_v53, 0.0 }
 0xcc6   :  { %v3243_v58 = vpop.permute.xlu0 %3242 }
 0xcc7   :  { %v2140_v25 = vmul.f32 %v3419_v61, %v2124_v39  ;;  %v3245_v12 = vunpack.i.h.bf16 %v3243_v58  ;;  %v3244_v11 = vunpack.i.l.bf16 %v3243_v58 }
 0xcc8   :  { %2074 = vadd.xlane.f32.xlu1 %v2073_v1 }
 0xcc9   :  { %v2156_v40 = vmul.f32 %v4447_v50, %v2140_v25  ;;  %2229 = vmatpush.msrb.mxu1 %v3244_v11  ;;  %2334 = vmatpush.msra.mxu0 %v3245_v12  ;;  %v2069_v50 = vpop.xlane.xlu1 %2068 }
 0xccb   :  { %3112 = vmatmul.msk.f32.vlgmr.msra.gmra.mxu2 %vm581_vm15, %v2156_v40 }
 0xccf   :  { %2086 = vadd.xlane.f32.xlu2 %v2085_v55 }
 0xce1   :  { %3252 = vrot.lane.b32.xlu1 %v3251_v49, %s3507_s18 }
 0xce7   :  { %3262 = vrot.lane.b32.xlu2 %v3261_v62, %s3508_s2 }
 0xce9   :  { %3267 = vrot.lane.b32.xlu1 %v3266_v52, %s3508_s2 }
 0xcf1   :  { %v2057_v10 = vpop.xlane.xlu0 %2056 }
 0xcf2   :  { %3424 = vrcp.f32 %v2057_v10 }
 0xcf3   :  { %3426 = vrcp.f32 %v2048_v6 }
 0xcf4   :  { %3428 = vrcp.f32 %v2066_v14 }
 0xcf8   :  { %v3425_v28 = vpop.eup %3424 }
 0xcf9   :  { %v2109_v32 = vmul.f32 %v3425_v28, %v2057_v10  ;;  %v2078_v0 = vpop.xlane.xlu1 %2077  ;;  %v3427_v45 = vpop.eup %3426 }
 0xcfa   :  { %3430 = vrcp.f32 %v2078_v0  ;;  %v2060_v37 = vpop.xlane.xlu0 %2059  ;;  %v3429_v57 = vpop.eup %3428  ;;  %v2106_v62 = vmul.f32 %v3427_v45, %v2048_v6 }
 0xcfb   :  { %v2125_v60 = vsub.f32 2.0, %v2109_v32  ;;  %3432 = vrcp.f32 %v2060_v37  ;;  %v2112_v26 = vmul.f32 %v3429_v57, %v2066_v14 }
 0xcfc   :  { %3434 = vrcp.f32 %v4500_v9  ;;  %v2122_v8 = vsub.f32 2.0, %v2106_v62 }
 0xcfd   :  { %v2141_v19 = vmul.f32 %v3425_v28, %v2125_v60  ;;  %3436 = vrcp.f32 %v2069_v50  ;;  %v2128_v5 = vsub.f32 2.0, %v2112_v26 }
 0xcfe   :  { %v2138_v16 = vmul.f32 %v3427_v45, %v2122_v8 }
 0xcff   :  { %v2157_v51 = vmul.f32 %v4465_v38, %v2141_v19  ;;  %v2144_v48 = vmul.f32 %v3429_v57, %v2128_v5 }
 0xd00   :  { %v3431_v52 = vpop.eup %3430  ;;  %v2154_v58 = vmul.f32 %v4430_v56, %v2138_v16 }
 0xd01   :  { %v3433_v44 = vpop.eup %3432  ;;  %v2116_v18 = vmul.f32 %v3431_v52, %v2078_v0  ;;  %v2063_v63 = vpop.xlane.xlu2 %2062  ;;  %3113 = vmatmul.msk.f32.gmra.mxu2 %vm581_vm15, %v2157_v51  ;;  %v2160_v1 = vmul.f32 %v4440_v42, %v2144_v48 }
 0xd02   :  { %v2081_v27 = vpop.xlane.xlu1 %2080  ;;  %v2110_v29 = vmul.f32 %v3433_v44, %v2060_v37  ;;  %3438 = vrcp.f32 %v2063_v63  ;;  %v3435_v2 = vpop.eup %3434 }
 0xd03   :  { %v2132_v15 = vsub.f32 2.0, %v2116_v18  ;;  %3440 = vrcp.f32 %v2081_v27  ;;  %v2072_v30 = vpop.xlane.xlu0 %2071  ;;  %v3437_v6 = vpop.eup %3436  ;;  %v2107_v3 = vmul.f32 %v3435_v2, %v4500_v9 }
 0xd04   :  { %v2126_v35 = vsub.f32 2.0, %v2110_v29  ;;  %3442 = vrcp.f32 %v2072_v30  ;;  %v2113_v21 = vmul.f32 %v3437_v6, %v2069_v50 }
 0xd05   :  { %v2148_v14 = vmul.f32 %v3431_v52, %v2132_v15  ;;  %v2123_v9 = vsub.f32 2.0, %v2107_v3 }
 0xd06   :  { %v2142_v38 = vmul.f32 %v3433_v44, %v2126_v35  ;;  %v2129_v40 = vsub.f32 2.0, %v2113_v21 }
 0xd07   :  { %v2164_v13 = vmul.f32 %v4474_v4, %v2148_v14  ;;  %v2139_v50 = vmul.f32 %v3435_v2, %v2123_v9 }
 0xd08   :  { %v3439_v23 = vpop.eup %3438  ;;  %v2158_v54 = vmul.f32 %v4476_v20, %v2142_v38  ;;  %v2145_v10 = vmul.f32 %v3437_v6, %v2129_v40  ;;  %v2197_v38 = vpop.f32.mrf.mxu0 }
 0xd09   :  { %v3441_v61 = vpop.eup %3440  ;;  %v2111_v31 = vmul.f32 %v3439_v23, %v2063_v63  ;;  %v3248_v39 = vpop.permute.xlu2 %3247  ;;  %3120 = vmatmul.msk.f32.vlgmr.msrb.gmra.mxu2 %vm581_vm15, %v2164_v13  ;;  %v2155_v37 = vmul.f32 %v4435_v22, %v2139_v50 }
 0xd0a   :  { %v2117_v25 = vmul.f32 %v3441_v61, %v2081_v27  ;;  %v3250_v12 = vunpack.i.h.bf16 %v3248_v39  ;;  %v3249_v11 = vunpack.i.l.bf16 %v3248_v39  ;;  %3114 = vmatmul.msk.f32.vlgmr.msra.gmra.mxu3 %vm581_vm15, %v2158_v54  ;;  %v3443_v55 = vpop.eup %3442  ;;  %v2161_v45 = vmul.f32 %v4451_v36, %v2145_v10 }
 0xd0b   :  { %v2127_v4 = vsub.f32 2.0, %v2111_v31  ;;  %v2114_v28 = vmul.f32 %v3443_v55, %v2072_v30 }
 0xd0c   :  { %v2133_v49 = vsub.f32 2.0, %v2117_v25  ;;  %2230 = vmatpush.msrb.mxu1 %v3249_v11  ;;  %2335 = vmatpush.msra.mxu0 %v3250_v12 }
 0xd0d   :  { %v2143_v20 = vmul.f32 %v3439_v23, %v2127_v4  ;;  %3110 = vmatmul.msk.f32.vlgmr.msrb.gmra.mxu1 %vm581_vm15, %v2154_v58  ;;  %3116 = vmatmul.msk.f32.vlgmr.msra.gmra.mxu0 %vm581_vm15, %v2160_v1  ;;  %v2130_v42 = vsub.f32 2.0, %v2114_v28 }
 0xd0e   :  { %v2149_v56 = vmul.f32 %v3441_v61, %v2133_v49 }
 0xd0f   :  { %v2159_v32 = vmul.f32 %v4486_v7, %v2143_v20  ;;  %v2146_v19 = vmul.f32 %v3443_v55, %v2130_v42 }
 0xd10   :  { %v2165_v0 = vmul.f32 %v4482_v46, %v2149_v56  ;;  %v2200_v3 = vpop.f32.mrf.mxu0 }
 0xd11   :  { %v2162_v46 = vmul.f32 %v4484_v43, %v2146_v19 }
 0xd12   :  { %3115 = vmatmul.msk.f32.gmra.mxu3 %vm581_vm15, %v2159_v32  ;;  %3121 = vmatmul.msk.f32.gmra.mxu2 %vm581_vm15, %v2165_v0 }
 0xd15   :  { %v3258_v60 = vpop.permute.xlu0 %3257  ;;  %3111 = vmatmul.msk.f32.gmra.mxu1 %vm581_vm15, %v2155_v37  ;;  %3117 = vmatmul.msk.f32.gmra.mxu0 %vm581_vm15, %v2161_v45 }
 0xd16   :  { %v3259_v57 = vunpack.i.l.bf16 %v3258_v60  ;;  %v3260_v62 = vunpack.i.h.bf16 %v3258_v60 }
 0xd18   :  { %2369 = vmatpush.msra.mxu1 %v3259_v57 }
 0xd1a   :  { %2370 = vmatpush.msra.mxu1 %v3260_v62 }
 0xd1d   :  { %3118 = vmatmul.msk.f32.vlgmr.msra.gmra.mxu1 %vm581_vm15, %v2162_v46 }
 0xd33   :  { %v2084_v7 = vpop.xlane.xlu1 %2083 }
 0xd3b   :  { %v2075_v26 = vpop.xlane.xlu1 %2074 }
 0xd3c   :  { %3444 = vrcp.f32 %v2075_v26 }
 0xd3d   :  { %3446 = vrcp.f32 %v2084_v7 }
 0xd42   :  { %v3445_v22 = vpop.eup %3444  ;;  %v2087_v44 = vpop.xlane.xlu2 %2086 }
 0xd43   :  { %v2115_v36 = vmul.f32 %v3445_v22, %v2075_v26  ;;  %v3447_v18 = vpop.eup %3446  ;;  %3448 = vrcp.f32 %v2087_v44 }
 0xd44   :  { %v2118_v27 = vmul.f32 %v3447_v18, %v2084_v7 }
 0xd45   :  { %v2131_v51 = vsub.f32 2.0, %v2115_v36 }
 0xd46   :  { %v2134_v43 = vsub.f32 2.0, %v2118_v27 }
 0xd47   :  { %v2147_v52 = vmul.f32 %v3445_v22, %v2131_v51 }
 0xd48   :  { %v2150_v2 = vmul.f32 %v3447_v18, %v2134_v43 }
 0xd49   :  { %v2163_v63 = vmul.f32 %v4510_v34, %v2147_v52  ;;  %v3449_v29 = vpop.eup %3448 }
 0xd4a   :  { %v2119_v5 = vmul.f32 %v3449_v29, %v2087_v44  ;;  %v2166_v35 = vmul.f32 %v4506_v59, %v2150_v2  ;;  %v3263_v58 = vpop.permute.xlu2 %3262 }
 0xd4b   :  { %3119 = vmatmul.msk.f32.gmra.mxu1 %vm581_vm15, %v2163_v63  ;;  %v3265_v25 = vunpack.i.h.bf16 %v3263_v58  ;;  %v3264_v12 = vunpack.i.l.bf16 %v3263_v58  ;;  %v3281_v63 = vld [vmem:[%s4834_s7 + $0x1] ss:$0 sm:$0xff] }
 0xd4c   :  { %v2135_v14 = vsub.f32 2.0, %v2119_v5 }
 0xd4d   :  { %2553 = vmatpush.msrb.mxu0 %v3264_v12 }
 0xd4e   :  { %v2267_v8 = vpop.f32.mrf.mxu2  ;;  %v2151_v34 = vmul.f32 %v3449_v29, %v2135_v14 }
 0xd4f   :  { %2452 = vrot.lane.b32.xlu1 %v2267_v8, %s3509_s3  ;;  %2554 = vmatpush.msrb.mxu0 %v3265_v25 }
 0xd50   :  { %v2167_v16 = vmul.f32 %v4515_v53, %v2151_v34 }
 0xd53   :  { %v3253_v15 = vpop.permute.xlu1 %3252 }
 0xd54   :  { %v3254_v30 = vunpack.i.l.bf16 %v3253_v15  ;;  %v3255_v6 = vunpack.i.h.bf16 %v3253_v15 }
 0xd56   :  { %2439 = vmatpush.msrb.mxu3 %v3254_v30 }
 0xd58   :  { %2440 = vmatpush.msrb.mxu3 %v3255_v6 }
 0xd59   :  { %3122 = vmatmul.msk.f32.vlgmr.msrb.gmra.mxu3 %vm581_vm15, %v2166_v35 }
 0xd5b   :  { %v3268_v11 = vpop.permute.xlu1 %3267 }
 0xd5c   :  { %v3269_v9 = vunpack.i.l.bf16 %v3268_v11  ;;  %v3270_v40 = vunpack.i.h.bf16 %v3268_v11 }
 0xd5e   :  { %2555 = vmatpush.msrb.mxu0 %v3269_v9 }
 0xd60   :  { %2556 = vmatpush.msrb.mxu0 %v3270_v40 }
 0xd61   :  { %3123 = vmatmul.msk.f32.gmra.mxu3 %vm581_vm15, %v2167_v16 }
 0xd84   :  { %v2270_v48 = vpop.f32.mrf.mxu2 }
 0xd8a   :  { %v2232_v21 = vpop.f32.mrf.mxu1  ;;  %v2337_v13 = vpop.f32.mrf.mxu0 }
 0xd8b   :  { %2468 = vrot.lane.b32.xlu0 %v2337_v13, %s4855_s4 }
 0xd8c   :  { %v2407_v23 = vpop.f32.mrf.mxu2 }
 0xd8d   :  { %2484 = vrot.lane.b32.xlu1 %v2407_v23, %s4856_s5  ;;  %v2302_v53 = vpop.f32.mrf.mxu3 }
 0xd92   :  { %v2235_v59 = vpop.f32.mrf.mxu1  ;;  %v2340_v54 = vpop.f32.mrf.mxu0 }
 0xd93   :  { %2454 = vrot.lane.b32.xlu0 %v2270_v48, %s3509_s3  ;;  %2470 = vrot.lane.b32.xlu2 %v2340_v54, %s4855_s4 }
 0xd95   :  { %v2410_v61 = vpop.f32.mrf.mxu2  ;;  %v2305_v39 = vpop.f32.mrf.mxu3 }
 0xd96   :  { %2486 = vrot.lane.b32.xlu1 %v2410_v61, %s4856_s5 }
 0xd9a   :  { %v2372_v31 = vpop.f32.mrf.mxu1 }
 0xd9b   :  { %2456 = vrot.lane.b32.xlu0 %v2302_v53, %s3509_s3  ;;  %2472 = vrot.lane.b32.xlu2 %v2372_v31, %s4855_s4 }
 0xda3   :  { %2458 = vrot.lane.b32.xlu0 %v2305_v39, %s3509_s3 }
 0xdc1   :  { %v2453_v49 = vpop.permute.xlu1 %2452 }
 0xdc2   :  { %v2496_v20 = vsel %vm304_vm14, %v2197_v38, %v2453_v49 }
 0xdc8   :  { %v2375_v1 = vpop.f32.mrf.mxu1 }
 0xdc9   :  { %2474 = vrot.lane.b32.xlu2 %v2375_v1, %s4855_s4 }
 0xddc   :  { %v2442_v4 = vpop.f32.mrf.mxu3 }
 0xddd   :  { %2488 = vrot.lane.b32.xlu1 %v2442_v4, %s4856_s5 }
 0xde4   :  { %v2445_v55 = vpop.f32.mrf.mxu3 }
 0xde5   :  { %2490 = vrot.lane.b32.xlu1 %v2445_v55, %s4856_s5 }
 0xded   :  { %v2471_v0 = vpop.permute.xlu2 %2470 }
 0xdf5   :  { %v2473_v19 = vpop.permute.xlu2 %2472 }
 0xdfd   :  { %v2469_v56 = vpop.permute.xlu0 %2468 }
 0xdfe   :  { %v2500_v50 = vsel %vm581_vm15, %v2496_v20, %v2469_v56  ;;  %v3134_v20 = vld [vmem:[%s4837_s10 + $0x38] sm:$0xff]  ;;  %v3133_v56 = vld [vmem:[%s4837_s10 + $0x30] sm:$0xff] }
 0xdff   :  { %v2485_v10 = vpop.permute.xlu1 %2484  ;;  %2735 = vmatpush.msrb.mxu1 %v3134_v20 }
 0xe00   :  { %v2504_v28 = vsel %vm1142_vm1, %v2500_v50, %v2485_v10  ;;  %v3132_v50 = vld [vmem:[%s4837_s10 + $0x28] sm:$0xff] }
 0xe01   :  { %3125 = vmatmul.msk.f32.vlgmr.msrb.gmra.mxu0 %vm68_vm0, %v2504_v28  ;;  %2736 = vmatpush.msrb.mxu1 %v3133_v56 }
 0xe03   :  { %2737 = vmatpush.msrb.mxu1 %v3132_v50 }
 0xe05   :  { %v2455_v32 = vpop.permute.xlu0 %2454 }
 0xe06   :  { %v2497_v42 = vsel %vm304_vm14, %v2200_v3, %v2455_v32 }
 0xe07   :  { %v2501_v37 = vsel %vm581_vm15, %v2497_v42, %v2471_v0 }
 0xe08   :  { %v2487_v45 = vpop.permute.xlu1 %2486 }
 0xe09   :  { %v2505_v60 = vsel %vm1142_vm1, %v2501_v37, %v2487_v45 }
 0xe0a   :  { %3126 = vmatmul.msk.f32.gmra.mxu0 %vm68_vm0, %v2505_v60 }
 0xe0d   :  { %v2457_v57 = vpop.permute.xlu0 %2456 }
 0xe0e   :  { %v2498_v62 = vsel %vm304_vm14, %v2232_v21, %v2457_v57 }
 0xe0f   :  { %v2502_v7 = vsel %vm581_vm15, %v2498_v62, %v2473_v19 }
 0xe15   :  { %v2459_v22 = vpop.permute.xlu0 %2458 }
 0xe16   :  { %v2499_v51 = vsel %vm304_vm14, %v2235_v59, %v2459_v22 }
 0xe23   :  { %v2475_v36 = vpop.permute.xlu2 %2474 }
 0xe24   :  { %v2503_v52 = vsel %vm581_vm15, %v2499_v51, %v2475_v36  ;;  %v3283_v51 = vld [vmem:[%s4836_s9 + $0x1] ss:$0 sm:$0xff]  ;;  %s3512_s9 = smov [#allocation2]  }
 0xe25   :  { %s2980_s23 = sshll.u32 %s3512_s9, 4  ;;  %s2981_s23 = int_to_ptr.vmem [resolvable:$true] %s2980_s23 }
 0xe4f   :  { %v2489_v46 = vpop.permute.xlu1 %2488 }
 0xe50   :  { %v2506_v26 = vsel %vm1142_vm1, %v2502_v7, %v2489_v46  ;;  %v4663_v46 = vld [vmem:[%s4835_s8 + $0x1] ss:$0 sm:$0xff] }
 0xe51   :  { %3127 = vmatmul.msk.f32.gmra.mxu0 %vm68_vm0, %v2506_v26 }
 0xe57   :  { %v2491_v44 = vpop.permute.xlu1 %2490 }
 0xe58   :  { %v2507_v18 = vsel %vm1142_vm1, %v2503_v52, %v2491_v44 }
 0xe59   :  { %3128 = vmatmul.msk.f32.gmra.mxu0 %vm68_vm0, %v2507_v18 }
 0xe7e   :  { %v2558_v27 = vpop.f32.mrf.mxu0 }
 0xe7f   :  { %v2559_v8 = vadd.f32 %v3281_v63, %v2558_v27 }
 0xe81   :  { %v4591_v43 = vadd.f32 %v2559_v8, %v4177_v47 }
 0xe83   :  { %v2599_v29 = vsel %vm68_vm0, %v4591_v43, 0.0 }
 0xe84   :  { %2600 = vadd.xlane.f32.xlu0 %v2599_v29 }
 0xe87   :  { %v2561_v2 = vpop.f32.mrf.mxu0 }
 0xe88   :  { %v2562_v5 = vadd.f32 %v3281_v63, %v2561_v2 }
 0xe8a   :  { %v4596_v15 = vadd.f32 %v2562_v5, %v4182_v41 }
 0xe8c   :  { %v2602_v30 = vsel %vm68_vm0, %v4596_v15, 0.0 }
 0xe8d   :  { %2603 = vadd.xlane.f32.xlu2 %v2602_v30 }
 0xece   :  { %v2564_v6 = vpop.f32.mrf.mxu0 }
 0xecf   :  { %v2565_v35 = vadd.f32 %v3281_v63, %v2564_v6 }
 0xed1   :  { %v4601_v14 = vadd.f32 %v2565_v35, %v4187_v17 }
 0xed3   :  { %v2605_v34 = vsel %vm68_vm0, %v4601_v14, 0.0 }
 0xed4   :  { %2606 = vadd.xlane.f32.xlu1 %v2605_v34 }
 0xed6   :  { %v2567_v16 = vpop.f32.mrf.mxu0 }
 0xed7   :  { %v2568_v38 = vadd.f32 %v3281_v63, %v2567_v16 }
 0xed9   :  { %v4606_v3 = vadd.f32 %v2568_v38, %v4192_v24 }
 0xedb   :  { %v2608_v48 = vsel %vm68_vm0, %v4606_v3, 0.0 }
 0xedc   :  { %2609 = vadd.xlane.f32.xlu2 %v2608_v48 }
 0xef7   :  { %v2601_v21 = vpop.xlane.xlu0 %2600 }
 0xef8   :  { %v2611_v13 = vmul.f32 %v2601_v21, %v3657_v33 }
 0xefa   :  { %v2615_v23 = vsub.f32 %v4591_v43, %v2611_v13 }
 0xefc   :  { %v2619_v59 = vmul.f32 %v2615_v23, %v2615_v23 }
 0xefe   :  { %v2623_v54 = vsel %vm68_vm0, %v2619_v59, 0.0 }
 0xeff   :  { %2624 = vadd.xlane.f32.xlu0 %v2623_v54 }
 0xf00   :  { %v2604_v61 = vpop.xlane.xlu2 %2603 }
 0xf01   :  { %v2612_v53 = vmul.f32 %v2604_v61, %v3657_v33 }
 0xf03   :  { %v4615_v31 = vsub.f32 %v4596_v15, %v2612_v53 }
 0xf05   :  { %v2620_v39 = vmul.f32 %v4615_v31, %v4615_v31 }
 0xf07   :  { %v2626_v58 = vsel %vm68_vm0, %v2620_v39, 0.0 }
 0xf08   :  { %2627 = vadd.xlane.f32.xlu1 %v2626_v58 }
 0xf21   :  { %1469 = vrot.lane.b32.xlu1 %v4182_v41, %s3508_s2 }
 0xf29   :  { %2580 = vrot.lane.b32.xlu1 %v4596_v15, %s3507_s18 }
 0xf47   :  { %v2607_v25 = vpop.xlane.xlu1 %2606 }
 0xf48   :  { %v2613_v12 = vmul.f32 %v2607_v25, %v3657_v33 }
 0xf4a   :  { %v4626_v11 = vsub.f32 %v4601_v14, %v2613_v12 }
 0xf4c   :  { %v2621_v9 = vmul.f32 %v4626_v11, %v4626_v11 }
 0xf4e   :  { %v2629_v1 = vsel %vm68_vm0, %v2621_v9, 0.0 }
 0xf4f   :  { %2630 = vadd.xlane.f32.xlu2 %v2629_v1  ;;  %v2610_v40 = vpop.xlane.xlu2 %2609 }
 0xf50   :  { %v2614_v4 = vmul.f32 %v2610_v40, %v3657_v33 }
 0xf52   :  { %v4633_v41 = vsub.f32 %v4606_v3, %v2614_v4 }
 0xf54   :  { %v2622_v55 = vmul.f32 %v4633_v41, %v4633_v41 }
 0xf56   :  { %v2632_v49 = vsel %vm68_vm0, %v2622_v55, 0.0 }
 0xf57   :  { %2633 = vadd.xlane.f32.xlu0 %v2632_v49 }
 0xf67   :  { %1471 = vrot.lane.b32.xlu2 %v4187_v17, %s3508_s2  ;;  %v3131_v17 = vld [vmem:[%s4837_s10 + $0x20] sm:$0xff] }
 0xf68   :  { %2738 = vmatpush.msrb.mxu1 %v3131_v17 }
 0xf6b   :  { %1467 = vrot.lane.b32.xlu0 %v4177_v47, %s3508_s2 }
 0xf72   :  { %v2625_v10 = vpop.xlane.xlu0 %2624 }
 0xf73   :  { %1473 = vrot.lane.b32.xlu0 %v4192_v24, %s3508_s2  ;;  %v2635_v47 = vmul.f32 %v2625_v10, %v3657_v33 }
 0xf75   :  { %v2639_v28 = vadd.f32 1e-05, %v2635_v47 }
 0xf77   :  { %3450 = vrsqrt.f32 %v2639_v28  ;;  %vm2649_vm15 = vweird.f32 %v2639_v28 }
 0xf7b   :  { %v2628_v32 = vpop.xlane.xlu1 %2627  ;;  %2578 = vrot.lane.b32.xlu0 %v4591_v43, %s3507_s18 }
 0xf7c   :  { %v2636_v0 = vmul.f32 %v2628_v32, %v3657_v33  ;;  %v3145_v32 = vld [vmem:[%s4839_s12 + $0x68] sm:$0xff] }
 0xf7d   :  { %v3451_v42 = vpop.eup %3450 }
 0xf7e   :  { %v2644_v37 = vmul.f32 %v3451_v42, %v2639_v28  ;;  %v2640_v45 = vadd.f32 1e-05, %v2636_v0  ;;  %vm2650_vm14 = vweird.f32 %v3451_v42  ;;  %v3146_v28 = vld [vmem:[%s4839_s12 + $0x70] sm:$0xff]  ;;  %v3144_v0 = vld [vmem:[%s4839_s12 + $0x60] sm:$0xff] }
 0xf7f   :  { %vm2651_vm1 = vmor %vm2649_vm15, %vm2650_vm14 }
 0xf80   :  { %v2645_v60 = vmul.f32 %v3451_v42, %v2644_v37  ;;  %3452 = vrsqrt.f32 %v2640_v45  ;;  %vm2659_vm5 = vweird.f32 %v2640_v45  ;;  %v3142_v37 = vld [vmem:[%s4839_s12 + $0x50] sm:$0xff] }
 0xf82   :  { %v2646_v57 = vmul.f32 0.5, %v2645_v60  ;;  %v3140_v60 = vld [vmem:[%s4839_s12 + $0x40] sm:$0xff] }
 0xf84   :  { %v2647_v19 = vsub.f32 1.5, %v2646_v57  ;;  %v3284_v57 = vld [vmem:[%s4838_s11 + $0x1] ss:$0 sm:$0xff] }
 0xf86   :  { %v3453_v62 = vpop.eup %3452  ;;  %v2648_v24 = vmul.f32 %v3451_v42, %v2647_v19 }
 0xf87   :  { %v2654_v7 = vmul.f32 %v3453_v62, %v2640_v45  ;;  %vm2660_vm4 = vweird.f32 %v3453_v62  ;;  %v3141_v45 = vld [vmem:[%s4839_s12 + $0x48] sm:$0xff] }
 0xf88   :  { %v2652_v26 = vsel %vm2651_vm1, %v3451_v42, %v2648_v24  ;;  %vm2661_vm6 = vmor %vm2659_vm5, %vm2660_vm4  ;;  %v3143_v42 = vld [vmem:[%s4839_s12 + $0x58] sm:$0xff] }
 0xf89   :  { %v2683_v22 = vmul.f32 %v2652_v26, %v2615_v23  ;;  %v2655_v36 = vmul.f32 %v3453_v62, %v2654_v7 }
 0xf8b   :  { %v2690_v52 = vmul.f32 %v4663_v46, %v2683_v22  ;;  %v2656_v44 = vmul.f32 0.5, %v2655_v36 }
 0xf8d   :  { %v2657_v18 = vsub.f32 1.5, %v2656_v44  ;;  %v2697_v63 = vadd.f32 %v3283_v51, %v2690_v52 }
 0xf8f   :  { %v2658_v27 = vmul.f32 %v3453_v62, %v2657_v18  ;;  %3136 = vmatmul.msk.f32.vlgmr.msrb.gmra.mxu1 %vm68_vm0, %v2697_v63 }
 0xf91   :  { %v2662_v8 = vsel %vm2661_vm6, %v3453_v62, %v2658_v27 }
 0xf92   :  { %v2684_v29 = vmul.f32 %v2662_v8, %v4615_v31 }
 0xf93   :  { %v1470_v2 = vpop.permute.xlu1 %1469 }
 0xf94   :  { %1481 = vst.msk [vmem:[%s4844_s17 + $0x8] sm:$0xff] %vm1479_vm7, %v1470_v2  ;;  %v2691_v5 = vmul.f32 %v4663_v46, %v2684_v29 }
 0xf96   :  { %v2698_v30 = vadd.f32 %v3283_v51, %v2691_v5 }
 0xf98   :  { %3137 = vmatmul.msk.f32.gmra.mxu1 %vm68_vm0, %v2698_v30 }
 0xf9b   :  { %v2581_v6 = vpop.permute.xlu1 %2580 }
 0xf9c   :  { %2592 = vst.msk [vmem:[%s4844_s17 + $0x8] sm:$0xff] %vm2590_vm8, %v2581_v6 }
 0xfc2   :  { %v2631_v35 = vpop.xlane.xlu2 %2630 }
 0xfc3   :  { %v2637_v34 = vmul.f32 %v2631_v35, %v3657_v33 }
 0xfc5   :  { %v2641_v16 = vadd.f32 1e-05, %v2637_v34 }
 0xfc7   :  { %3454 = vrsqrt.f32 %v2641_v16  ;;  %vm2669_vm10 = vweird.f32 %v2641_v16 }
 0xfca   :  { %v1472_v38 = vpop.permute.xlu2 %1471  ;;  %v2634_v48 = vpop.xlane.xlu0 %2633 }
 0xfcb   :  { %1482 = vst.msk [vmem:[%s4844_s17 + $0x10] sm:$0xff] %vm1479_vm7, %v1472_v38  ;;  %v2638_v21 = vmul.f32 %v2634_v48, %v3657_v33 }
 0xfcd   :  { %v3455_v13 = vpop.eup %3454  ;;  %v2642_v23 = vadd.f32 1e-05, %v2638_v21 }
 0xfce   :  { %v2664_v59 = vmul.f32 %v3455_v13, %v2641_v16  ;;  %vm2670_vm9 = vweird.f32 %v3455_v13 }
 0xfcf   :  { %3456 = vrsqrt.f32 %v2642_v23  ;;  %vm2671_vm11 = vmor %vm2669_vm10, %vm2670_vm9  ;;  %vm2679_vm13 = vweird.f32 %v2642_v23 }
 0xfd0   :  { %v2665_v54 = vmul.f32 %v3455_v13, %v2664_v59 }
 0xfd2   :  { %v2666_v61 = vmul.f32 0.5, %v2665_v54 }
 0xfd4   :  { %v2667_v53 = vsub.f32 1.5, %v2666_v61 }
 0xfd5   :  { %v3457_v31 = vpop.eup %3456 }
 0xfd6   :  { %v2668_v39 = vmul.f32 %v3455_v13, %v2667_v53  ;;  %v2674_v58 = vmul.f32 %v3457_v31, %v2642_v23  ;;  %vm2680_vm12 = vweird.f32 %v3457_v31 }
 0xfd7   :  { %vm2681_vm3 = vmor %vm2679_vm13, %vm2680_vm12 }
 0xfd8   :  { %v2672_v25 = vsel %vm2671_vm11, %v3455_v13, %v2668_v39  ;;  %v2675_v12 = vmul.f32 %v3457_v31, %v2674_v58 }
 0xfd9   :  { %v2685_v9 = vmul.f32 %v2672_v25, %v4626_v11 }
 0xfda   :  { %v2676_v1 = vmul.f32 0.5, %v2675_v12 }
 0xfdb   :  { %v2692_v40 = vmul.f32 %v4663_v46, %v2685_v9 }
 0xfdc   :  { %v2677_v4 = vsub.f32 1.5, %v2676_v1 }
 0xfdd   :  { %v1468_v55 = vpop.permute.xlu0 %1467  ;;  %v2699_v49 = vadd.f32 %v3283_v51, %v2692_v40 }
 0xfde   :  { %v2678_v20 = vmul.f32 %v3457_v31, %v2677_v4  ;;  %1480 = vst.msk [vmem:[%s4844_s17] sm:$0xff] %vm1479_vm7, %v1468_v55 }
 0xfdf   :  { %3138 = vmatmul.msk.f32.gmra.mxu1 %vm68_vm0, %v2699_v49 }
 0xfe0   :  { %v2682_v56 = vsel %vm2681_vm3, %v3457_v31, %v2678_v20 }
 0xfe1   :  { %v2686_v11 = vmul.f32 %v2682_v56, %v4633_v41  ;;  %v3147_v41 = vld [vmem:[%s4839_s12 + $0x78] sm:$0xff]  ;;  %v3285_v56 = vld [vmem:[%s4840_s13 + $0x1] ss:$0 sm:$0xff] }
 0xfe2   :  { %2822 = vmatpush.msra.mxu2 %v3147_v41 }
 0xfe3   :  { %v2693_v50 = vmul.f32 %v4663_v46, %v2686_v11 }
 0xfe4   :  { %2823 = vmatpush.msra.mxu2 %v3146_v28 }
 0xfe5   :  { %v1474_v17 = vpop.permute.xlu0 %1473  ;;  %v2700_v10 = vadd.f32 %v3283_v51, %v2693_v50 }
 0xfe6   :  { %1483 = vst.msk [vmem:[%s4844_s17 + $0x18] sm:$0xff] %vm1479_vm7, %v1474_v17  ;;  %2824 = vmatpush.msra.mxu2 %v3145_v32 }
 0xfe7   :  { %3139 = vmatmul.msk.f32.gmra.mxu1 %vm68_vm0, %v2700_v10 }
 0xfe8   :  { %2825 = vmatpush.msra.mxu2 %v3144_v0 }
 0xfea   :  { %2826 = vmatpush.msra.mxu2 %v3143_v42 }
 0xfec   :  { %2827 = vmatpush.msra.mxu2 %v3142_v37 }
 0xfed   :  { %v2579_v47 = vpop.permute.xlu0 %2578 }
 0xfee   :  { %2591 = vst.msk [vmem:[%s4844_s17] sm:$0xff] %vm2590_vm8, %v2579_v47  ;;  %2828 = vmatpush.msra.mxu2 %v3141_v45 }
 0xff0   :  { %2829 = vmatpush.msra.mxu2 %v3140_v60 }
0x100c   :  { %v2740_v19 = vpop.f32.mrf.mxu1 }
0x100d   :  { %v2741_v62 = vadd.f32 %v3284_v57, %v2740_v19 }
0x100f   :  { %v2756_v24 = vmul.f32 0.044715, %v2741_v62  ;;  %v2752_v8 = vmul.f32 0.5, %v2741_v62 }
0x1011   :  { %v2760_v46 = vmul.f32 %v2756_v24, %v2741_v62 }
0x1013   :  { %v2764_v7 = vmul.f32 %v2760_v46, %v2741_v62 }
0x1015   :  { %v2768_v26 = vadd.f32 %v2764_v7, %v2741_v62  ;;  %v2743_v22 = vpop.f32.mrf.mxu1 }
0x1016   :  { %v2744_v36 = vadd.f32 %v3284_v57, %v2743_v22 }
0x1017   :  { %v2772_v51 = vmul.f32 0.7978846, %v2768_v26 }
0x1018   :  { %v2757_v52 = vmul.f32 0.044715, %v2744_v36  ;;  %v2753_v6 = vmul.f32 0.5, %v2744_v36 }
0x1019   :  { %3458 = vtanh.f32 %v2772_v51 }
0x101a   :  { %v2761_v44 = vmul.f32 %v2757_v52, %v2744_v36 }
0x101c   :  { %v2765_v18 = vmul.f32 %v2761_v44, %v2744_v36 }
0x101e   :  { %v2769_v63 = vadd.f32 %v2765_v18, %v2744_v36 }
0x101f   :  { %v3459_v27 = vpop.eup %3458 }
0x1020   :  { %v2780_v29 = vadd.f32 1.0, %v3459_v27  ;;  %v2773_v2 = vmul.f32 0.7978846, %v2769_v63 }
0x1022   :  { %v2784_v5 = vmul.f32 %v2780_v29, %v2752_v8  ;;  %3460 = vtanh.f32 %v2773_v2 }
0x1024   :  { %3149 = vmatmul.msk.f32.vlgmr.msra.gmra.mxu2 %vm1417_vm2, %v2784_v5 }
0x1028   :  { %v3461_v30 = vpop.eup %3460 }
0x1029   :  { %v2781_v35 = vadd.f32 1.0, %v3461_v30 }
0x102b   :  { %v2785_v34 = vmul.f32 %v2781_v35, %v2753_v6 }
0x102d   :  { %3150 = vmatmul.msk.f32.gmra.mxu2 %vm1417_vm2, %v2785_v34 }
0x105c   :  { %v2746_v16 = vpop.f32.mrf.mxu1 }
0x105d   :  { %v2747_v38 = vadd.f32 %v3284_v57, %v2746_v16 }
0x105f   :  { %v2758_v48 = vmul.f32 0.044715, %v2747_v38  ;;  %v2754_v9 = vmul.f32 0.5, %v2747_v38 }
0x1061   :  { %v2762_v21 = vmul.f32 %v2758_v48, %v2747_v38 }
0x1063   :  { %v2766_v13 = vmul.f32 %v2762_v21, %v2747_v38 }
0x1064   :  { %v2749_v23 = vpop.f32.mrf.mxu1 }
0x1065   :  { %v2750_v59 = vadd.f32 %v3284_v57, %v2749_v23  ;;  %v2770_v54 = vadd.f32 %v2766_v13, %v2747_v38 }
0x1067   :  { %v2759_v61 = vmul.f32 0.044715, %v2750_v59  ;;  %v2774_v53 = vmul.f32 0.7978846, %v2770_v54  ;;  %v2755_v55 = vmul.f32 0.5, %v2750_v59 }
0x1069   :  { %v2763_v31 = vmul.f32 %v2759_v61, %v2750_v59  ;;  %3462 = vtanh.f32 %v2774_v53 }
0x106b   :  { %v2767_v39 = vmul.f32 %v2763_v31, %v2750_v59  ;;  %v4788_v31 = vld [vmem:[%s4841_s14] ss:$0 sm:$0xff] }
0x106d   :  { %v2771_v58 = vadd.f32 %v2767_v39, %v2750_v59 }
0x106f   :  { %v3463_v25 = vpop.eup %3462  ;;  %v2775_v12 = vmul.f32 0.7978846, %v2771_v58 }
0x1070   :  { %v2782_v1 = vadd.f32 1.0, %v3463_v25  ;;  %v4793_v25 = vld [vmem:[%s4842_s15] ss:$0 sm:$0xff] }
0x1071   :  { %3464 = vtanh.f32 %v2775_v12 }
0x1072   :  { %v2786_v40 = vmul.f32 %v2782_v1, %v2754_v9 }
0x1074   :  { %3151 = vmatmul.msk.f32.gmra.mxu2 %vm1417_vm2, %v2786_v40 }
0x1077   :  { %v3465_v4 = vpop.eup %3464 }
0x1078   :  { %v2783_v49 = vadd.f32 1.0, %v3465_v4 }
0x107a   :  { %v2787_v20 = vmul.f32 %v2783_v49, %v2755_v55 }
0x107c   :  { %3152 = vmatmul.msk.f32.gmra.mxu2 %vm1417_vm2, %v2787_v20  ;;  %vm2863_vm2 = vcmask 1048320  }
0x10a7   :  { %v2831_v11 = vpop.f32.mrf.mxu2 }
0x10a8   :  { %v2832_v50 = vadd.f32 %v3285_v56, %v2831_v11 }
0x10aa   :  { %v2843_v17 = vadd.f32 %v2832_v50, %v4591_v43 }
0x10ac   :  { %v2870_v10 = vsel %vm68_vm0, %v2843_v17, 0.0 }
0x10ad   :  { %2871 = vadd.xlane.f32.xlu1 %v2870_v10 }
0x10b0   :  { %v2834_v47 = vpop.f32.mrf.mxu2 }
0x10b1   :  { %v2835_v41 = vadd.f32 %v3285_v56, %v2834_v47 }
0x10b3   :  { %v2844_v28 = vadd.f32 %v2835_v41, %v4596_v15 }
0x10b5   :  { %v2873_v32 = vsel %vm68_vm0, %v2844_v28, 0.0 }
0x10b6   :  { %2874 = vadd.xlane.f32.xlu2 %v2873_v32 }
0x10ce   :  { %2582 = vrot.lane.b32.xlu2 %v4601_v14, %s3507_s18 }
0x10f7   :  { %v2837_v0 = vpop.f32.mrf.mxu2 }
0x10f8   :  { %v2838_v42 = vadd.f32 %v3285_v56, %v2837_v0 }
0x10fa   :  { %v2845_v37 = vadd.f32 %v2838_v42, %v4601_v14 }
0x10fc   :  { %v2876_v45 = vsel %vm68_vm0, %v2845_v37, 0.0 }
0x10fd   :  { %2877 = vadd.xlane.f32.xlu0 %v2876_v45 }
0x10ff   :  { %v2840_v43 = vpop.f32.mrf.mxu2 }
0x1100   :  { %v2841_v60 = vadd.f32 %v3285_v56, %v2840_v43 }
0x1102   :  { %v2846_v57 = vadd.f32 %v2841_v60, %v4606_v3 }
0x1104   :  { %v2879_v19 = vsel %vm68_vm0, %v2846_v57, 0.0 }
0x1105   :  { %2880 = vadd.xlane.f32.xlu1 %v2879_v19 }
0x1111   :  { %2584 = vrot.lane.b32.xlu0 %v4606_v3, %s3507_s18 }
0x111e   :  { %2851 = vrot.lane.b32.xlu1 %v2843_v17, %s3505_s0 }
0x1120   :  { %v2872_v15 = vpop.xlane.xlu1 %2871 }
0x1121   :  { %v2882_v62 = vmul.f32 %v2872_v15, %v3657_v33 }
0x1123   :  { %v2886_v24 = vsub.f32 %v2843_v17, %v2882_v62 }
0x1125   :  { %v2890_v14 = vmul.f32 %v2886_v24, %v2886_v24 }
0x1127   :  { %v2894_v46 = vsel %vm68_vm0, %v2890_v14, 0.0 }
0x1128   :  { %2895 = vadd.xlane.f32.xlu2 %v2894_v46 }
0x1129   :  { %v2875_v7 = vpop.xlane.xlu2 %2874 }
0x112a   :  { %v2883_v26 = vmul.f32 %v2875_v7, %v3657_v33 }
0x112c   :  { %v2887_v36 = vsub.f32 %v2844_v28, %v2883_v26 }
0x112e   :  { %v2891_v3 = vmul.f32 %v2887_v36, %v2887_v36 }
0x1130   :  { %v2897_v51 = vsel %vm68_vm0, %v2891_v3, 0.0 }
0x1131   :  { %v2583_v22 = vpop.permute.xlu2 %2582 }
0x1132   :  { %2593 = vst.msk [vmem:[%s4844_s17 + $0x10] sm:$0xff] %vm2590_vm8, %v2583_v22 }
0x113b   :  { %2898 = vadd.xlane.f32.xlu0 %v2897_v51 }
0x114f   :  { %2855 = vrot.lane.b32.xlu0 %v2845_v37, %s3505_s0 }
0x1170   :  { %v2878_v52 = vpop.xlane.xlu0 %2877 }
0x1171   :  { %v2884_v44 = vmul.f32 %v2878_v52, %v3657_v33 }
0x1173   :  { %v4762_v18 = vsub.f32 %v2845_v37, %v2884_v44 }
0x1175   :  { %v2892_v63 = vmul.f32 %v4762_v18, %v4762_v18 }
0x1177   :  { %v2900_v27 = vsel %vm68_vm0, %v2892_v63, 0.0 }
0x1178   :  { %v2881_v8 = vpop.xlane.xlu1 %2880  ;;  %2901 = vadd.xlane.f32.xlu1 %v2900_v27 }
0x1179   :  { %v2885_v29 = vmul.f32 %v2881_v8, %v3657_v33 }
0x117b   :  { %v4768_v2 = vsub.f32 %v2846_v57, %v2885_v29 }
0x117d   :  { %v2893_v5 = vmul.f32 %v4768_v2, %v4768_v2 }
0x117f   :  { %v2903_v30 = vsel %vm68_vm0, %v2893_v5, 0.0 }
0x1180   :  { %2904 = vadd.xlane.f32.xlu2 %v2903_v30 }
0x1183   :  { %v2585_v6 = vpop.permute.xlu0 %2584 }
0x1184   :  { %2594 = vst.msk [vmem:[%s4844_s17 + $0x18] sm:$0xff] %vm2590_vm8, %v2585_v6 }
0x1190   :  { %v2852_v35 = vpop.permute.xlu1 %2851 }
0x1191   :  { %2864 = vst.msk [vmem:[%s4844_s17] sm:$0xff] %vm2863_vm2, %v2852_v35  ;;  %2857 = vrot.lane.b32.xlu1 %v2846_v57, %s3505_s0 }
0x1198   :  { %2853 = vrot.lane.b32.xlu2 %v2844_v28, %s3505_s0 }
0x119b   :  { %v2896_v34 = vpop.xlane.xlu2 %2895 }
0x119c   :  { %v2906_v16 = vmul.f32 %v2896_v34, %v3657_v33 }
0x119e   :  { %v2910_v38 = vadd.f32 1e-05, %v2906_v16 }
0x11a0   :  { %3466 = vrsqrt.f32 %v2910_v38  ;;  %vm2920_vm15 = vweird.f32 %v2910_v38 }
0x11a6   :  { %v3467_v48 = vpop.eup %3466 }
0x11a7   :  { %v2915_v21 = vmul.f32 %v3467_v48, %v2910_v38  ;;  %vm2921_vm14 = vweird.f32 %v3467_v48 }
0x11a8   :  { %vm2922_vm1 = vmor %vm2920_vm15, %vm2921_vm14 }
0x11a9   :  { %v2916_v13 = vmul.f32 %v3467_v48, %v2915_v21 }
0x11ab   :  { %v2917_v23 = vmul.f32 0.5, %v2916_v13 }
0x11ad   :  { %v2918_v59 = vsub.f32 1.5, %v2917_v23 }
0x11ae   :  { %v2899_v54 = vpop.xlane.xlu0 %2898 }
0x11af   :  { %v2919_v61 = vmul.f32 %v3467_v48, %v2918_v59  ;;  %v2907_v53 = vmul.f32 %v2899_v54, %v3657_v33 }
0x11b1   :  { %v2923_v39 = vsel %vm2922_vm1, %v3467_v48, %v2919_v61  ;;  %v2911_v58 = vadd.f32 1e-05, %v2907_v53 }
0x11b2   :  { %v2954_v12 = vmul.f32 %v2923_v39, %v2886_v24 }
0x11b3   :  { %3468 = vrsqrt.f32 %v2911_v58  ;;  %vm2930_vm5 = vweird.f32 %v2911_v58 }
0x11b4   :  { %v2961_v9 = vmul.f32 %v4788_v31, %v2954_v12 }
0x11b6   :  { %v2968_v1 = vadd.f32 %v4793_v25, %v2961_v9 }
0x11b8   :  { %2972 = vst.msk [vmem:[#allocation2] sm:$0xff] %vm68_vm0, %v2968_v1 }
0x11b9   :  { %v3469_v40 = vpop.eup %3468 }
0x11ba   :  { %v2925_v4 = vmul.f32 %v3469_v40, %v2911_v58  ;;  %vm2931_vm4 = vweird.f32 %v3469_v40 }
0x11bb   :  { %vm2932_vm6 = vmor %vm2930_vm5, %vm2931_vm4 }
0x11bc   :  { %v2926_v55 = vmul.f32 %v3469_v40, %v2925_v4 }
0x11be   :  { %v2927_v49 = vmul.f32 0.5, %v2926_v55 }
0x11c0   :  { %v2928_v20 = vsub.f32 1.5, %v2927_v49 }
0x11c1   :  { %v2856_v56 = vpop.permute.xlu0 %2855 }
0x11c2   :  { %v2929_v11 = vmul.f32 %v3469_v40, %v2928_v20  ;;  %2866 = vst.msk [vmem:[%s4844_s17 + $0x10] sm:$0xff] %vm2863_vm2, %v2856_v56 }
0x11c4   :  { %v2933_v50 = vsel %vm2932_vm6, %v3469_v40, %v2929_v11 }
0x11c5   :  { %v2955_v17 = vmul.f32 %v2933_v50, %v2887_v36 }
0x11c7   :  { %v2962_v10 = vmul.f32 %v4788_v31, %v2955_v17 }
0x11c9   :  { %v2969_v47 = vadd.f32 %v4793_v25, %v2962_v10 }
0x11cb   :  { %2973 = vst.msk [vmem:[#allocation2 + $0x8] sm:$0xff] %vm68_vm0, %v2969_v47 }
0x11eb   :  { %v2902_v41 = vpop.xlane.xlu1 %2901 }
0x11ec   :  { %v2908_v28 = vmul.f32 %v2902_v41, %v3657_v33 }
0x11ee   :  { %v2912_v32 = vadd.f32 1e-05, %v2908_v28 }
0x11f0   :  { %3470 = vrsqrt.f32 %v2912_v32  ;;  %vm2940_vm8 = vweird.f32 %v2912_v32 }
0x11f3   :  { %v2905_v0 = vpop.xlane.xlu2 %2904 }
0x11f4   :  { %v2909_v42 = vmul.f32 %v2905_v0, %v3657_v33 }
0x11f6   :  { %v3471_v37 = vpop.eup %3470  ;;  %v2913_v45 = vadd.f32 1e-05, %v2909_v42 }
0x11f7   :  { %v2935_v43 = vmul.f32 %v3471_v37, %v2912_v32  ;;  %vm2941_vm7 = vweird.f32 %v3471_v37 }
0x11f8   :  { %3472 = vrsqrt.f32 %v2913_v45  ;;  %vm2942_vm9 = vmor %vm2940_vm8, %vm2941_vm7  ;;  %vm2950_vm11 = vweird.f32 %v2913_v45 }
0x11f9   :  { %v2936_v60 = vmul.f32 %v3471_v37, %v2935_v43 }
0x11fb   :  { %v2937_v57 = vmul.f32 0.5, %v2936_v60  ;;  %v2854_v19 = vpop.permute.xlu2 %2853 }
0x11fc   :  { %2865 = vst.msk [vmem:[%s4844_s17 + $0x8] sm:$0xff] %vm2863_vm2, %v2854_v19 }
0x11fd   :  { %v2938_v15 = vsub.f32 1.5, %v2937_v57 }
0x11fe   :  { %v3473_v62 = vpop.eup %3472 }
0x11ff   :  { %v2939_v24 = vmul.f32 %v3471_v37, %v2938_v15  ;;  %v2945_v14 = vmul.f32 %v3473_v62, %v2913_v45  ;;  %vm2951_vm10 = vweird.f32 %v3473_v62 }
0x1200   :  { %vm2952_vm12 = vmor %vm2950_vm11, %vm2951_vm10 }
0x1201   :  { %v2943_v33 = vsel %vm2942_vm9, %v3471_v37, %v2939_v24  ;;  %v2946_v46 = vmul.f32 %v3473_v62, %v2945_v14 }
0x1202   :  { %v2956_v7 = vmul.f32 %v2943_v33, %v4762_v18 }
0x1203   :  { %v2947_v26 = vmul.f32 0.5, %v2946_v46  ;;  %v2858_v22 = vpop.permute.xlu1 %2857 }
0x1204   :  { %v2963_v36 = vmul.f32 %v4788_v31, %v2956_v7  ;;  %2867 = vst.msk [vmem:[%s4844_s17 + $0x18] sm:$0xff] %vm2863_vm2, %v2858_v22  ;;  %s3513_s17 = smov 128  }
0x1205   :  { %v2948_v3 = vsub.f32 1.5, %v2947_v26 }
0x1206   :  { %v2970_v51 = vadd.f32 %v4793_v25, %v2963_v36 }
0x1207   :  { %v2949_v52 = vmul.f32 %v3473_v62, %v2948_v3 }
0x1208   :  { %2974 = vst.msk [vmem:[#allocation2 + $0x10] sm:$0xff] %vm68_vm0, %v2970_v51 }
0x1209   :  { %v2953_v44 = vsel %vm2952_vm12, %v3473_v62, %v2949_v52 }
0x120a   :  { %v2957_v18 = vmul.f32 %v2953_v44, %v4768_v2 }
0x120c   :  { %v2964_v63 = vmul.f32 %v4788_v31, %v2957_v18 }
0x120e   :  { %v2971_v27 = vadd.f32 %v4793_v25, %v2964_v63 }
0x1210   :  { %2975 = vst.msk [vmem:[#allocation2 + $0x18] sm:$0xff] %vm68_vm0, %v2971_v27 }
0x1211   :  { %2988 = dma.vmem_to_hbm [thread:$0]  %s2981_s23, 512, %s2983_s22, [#allocation3], %s3513_s17, %s3513_s17, %s3509_s3  }
0x1212   :  { %3500 = dma.done.wait [#allocation3], 512  }
0x1213   :  { %3501 = vsyncadd [#allocation3], 4294966784 }
0x1214   :  { %2997 = vsyncpa [#allocation3], 1 }

</bundles_post_ra>
